<compile_context>
chip_gen: v7x
topology: tpu7x:2x2x1
jax: 0.10.0
libtpu: 0.0.40
codegen_flags: <defaults>
</compile_context>

<pallas_src>
import functools

import jax
import jax.numpy as jnp
import numpy as np
from jax.experimental import pallas as pl
from jax.experimental.pallas import tpu as pltpu

HIDDEN_SIZE = 128
INPUT_SIZE = 3
OUTPUT_SIZE = 3
NUM_LAYERS = 2


# ----------------------------- Pallas kernel ------------------------------ #
def _lstm_net_kernel(T, B,
                     x_ref, h0_ref, c0_ref,
                     wih0_ref, whh0_ref, b0_ref,
                     wih1_ref, whh1_ref, b1_ref,
                     wlin_ref, blin_ref,
                     out_ref, hn_ref, cn_ref,
                     xg_ref, hbuf_ref):
    """2-layer LSTM over T steps + final Linear, entirely in VMEM.

    x_ref   : (T*B, I)   time-major input, flattened over (t, b)
    h0/c0   : (2, B, H)  initial hidden / cell state (per layer)
    wih0    : (I, 4H)  whh0: (H, 4H)  b0: (1, 4H)   (layer 0, bias = b_ih+b_hh)
    wih1    : (H, 4H)  whh1: (H, 4H)  b1: (1, 4H)   (layer 1)
    wlin    : (H, 3)   blin: (1, 3)
    out_ref : (T*B, 3)   per-step linear output (row = t*B + b)
    hn/cn   : (2, B, H)  final hidden / cell state
    xg_ref  : (T*B, 4H)  scratch: hoisted layer-0 input projection
    hbuf_ref: (T*B, H)   scratch: per-step top-layer hidden states
    """
    H = HIDDEN_SIZE

    # ---- hoisted layer-0 input projection: one matmul for all timesteps ----
    xg_ref[...] = (jnp.dot(x_ref[...], wih0_ref[...],
                           preferred_element_type=jnp.float32)
                   + b0_ref[...])

    # Hoist the layer-1 bias broadcast out of the loop (no per-iter broadcast_in_dim).
    b1_b = jnp.broadcast_to(b1_ref[...], (B, 4 * H))

    def gates_to_hc(gates, c):
        # PyTorch gate ordering: [i, f, g, o]
        i_g = jax.nn.sigmoid(gates[:, 0 * H:1 * H])
        f_g = jax.nn.sigmoid(gates[:, 1 * H:2 * H])
        g_g = jnp.tanh(gates[:, 2 * H:3 * H])
        o_g = jax.nn.sigmoid(gates[:, 3 * H:4 * H])
        c_new = f_g * c + i_g * g_g
        h_new = o_g * jnp.tanh(c_new)
        return h_new, c_new

    def body(t, carry):
        h_l0, c_l0, h_l1, c_l1 = carry
        row = pl.multiple_of(t * B, 8)

        # Both recurrence matmuls depend only on the previous carry: issue them
        # back-to-back so the MXU stays fed while EUP sigmoid/tanh work drains.
        hh0 = jnp.dot(h_l0, whh0_ref[...], preferred_element_type=jnp.float32)
        hh1 = jnp.dot(h_l1, whh1_ref[...], preferred_element_type=jnp.float32)

        # Layer 0: input projection (and its bias) were hoisted out of the loop.
        gates0 = xg_ref[pl.ds(row, B), :] + hh0
        h_l0, c_l0 = gates_to_hc(gates0, c_l0)

        # Layer 1: only the fresh-h_l0 matmul sits behind the layer-0 nonlinearities.
        gates1 = (jnp.dot(h_l0, wih1_ref[...], preferred_element_type=jnp.float32)
                  + hh1 + b1_b)
        h_l1, c_l1 = gates_to_hc(gates1, c_l1)

        # Lane-dense (B, 128) store; final Linear happens once after the loop.
        hbuf_ref[pl.ds(row, B), :] = h_l1
        return (h_l0, c_l0, h_l1, c_l1)

    init = (h0_ref[0], c0_ref[0], h0_ref[1], c0_ref[1])
    h_l0, c_l0, h_l1, c_l1 = jax.lax.fori_loop(0, T, body, init, unroll=True)

    hn_ref[0] = h_l0
    hn_ref[1] = h_l1
    cn_ref[0] = c_l0
    cn_ref[1] = c_l1

    # ---- hoisted final Linear: one (T*B,128)@(128,3) matmul + one store ----
    out_ref[...] = (jnp.dot(hbuf_ref[...], wlin_ref[...],
                            preferred_element_type=jnp.float32)
                    + blin_ref[...])


# ------------------------------- Wrapper ---------------------------------- #
def lstm_net_forward(x, hidden, params):
    """Mirrors LSTMNet.forward(x, hidden).

    x      : (B, T, INPUT_SIZE) float32   (batch_first, like the PyTorch module)
    hidden : None or (h0, c0), each (2, B, HIDDEN_SIZE)
    returns: (out, (h_n, c_n)) with out of shape (1, B*T, OUTPUT_SIZE)
    """
    B, T, I = x.shape
    Bp = ((B + 7) // 8) * 8  # pad batch to the f32 sublane tile (8)

    if hidden is None:
        h0 = jnp.zeros((NUM_LAYERS, Bp, HIDDEN_SIZE), jnp.float32)
        c0 = jnp.zeros((NUM_LAYERS, Bp, HIDDEN_SIZE), jnp.float32)
    else:
        h0, c0 = hidden
        if Bp != B:
            h0 = jnp.pad(h0, ((0, 0), (0, Bp - B), (0, 0)))
            c0 = jnp.pad(c0, ((0, 0), (0, Bp - B), (0, 0)))
        h0 = h0.astype(jnp.float32)
        c0 = c0.astype(jnp.float32)

    x_tbi = jnp.transpose(x, (1, 0, 2)).astype(jnp.float32)  # (T, B, I)
    if Bp != B:
        x_tbi = jnp.pad(x_tbi, ((0, 0), (0, Bp - B), (0, 0)))
    x2d = x_tbi.reshape(T * Bp, I)                            # row = t*Bp + b

    vmem = lambda: pl.BlockSpec(memory_space=pltpu.MemorySpace.VMEM)
    out_shape = (
        jax.ShapeDtypeStruct((T * Bp, OUTPUT_SIZE), jnp.float32),
        jax.ShapeDtypeStruct((NUM_LAYERS, Bp, HIDDEN_SIZE), jnp.float32),
        jax.ShapeDtypeStruct((NUM_LAYERS, Bp, HIDDEN_SIZE), jnp.float32),
    )

    out2d, h_n, c_n = pl.pallas_call(
        functools.partial(_lstm_net_kernel, T, Bp),
        out_shape=out_shape,
        in_specs=[vmem() for _ in range(11)],
        out_specs=(vmem(), vmem(), vmem()),
        scratch_shapes=[
            pltpu.VMEM((T * Bp, 4 * HIDDEN_SIZE), jnp.float32),  # hoisted x-proj
            pltpu.VMEM((T * Bp, HIDDEN_SIZE), jnp.float32),      # per-step h_l1
        ],
    )(x2d, h0, c0, *params)

    # out.view(-1, H) on a batch_first (B, T, H) tensor orders rows as (b, t):
    out = out2d.reshape(T, Bp, OUTPUT_SIZE)[:, :B, :]
    out = jnp.transpose(out, (1, 0, 2)).reshape(B * T, OUTPUT_SIZE)
    out = out[None]  # unsqueeze(dim=0) -> (1, B*T, 3)
    return out, (h_n[:, :B, :], c_n[:, :B, :])


# --------------------------- Parameter init -------------------------------- #
def init_params(key):
    """Deterministic PyTorch-style init: U(-1/sqrt(H), 1/sqrt(H))."""
    H = HIDDEN_SIZE
    k = 1.0 / np.sqrt(H)
    keys = jax.random.split(key, 10)

    def u(kk, shape):
        return jax.random.uniform(kk, shape, jnp.float32, -k, k)

    w_ih_l0 = u(keys[0], (4 * H, INPUT_SIZE))
    w_hh_l0 = u(keys[1], (4 * H, H))
    b_ih_l0 = u(keys[2], (4 * H,))
    b_hh_l0 = u(keys[3], (4 * H,))
    w_ih_l1 = u(keys[4], (4 * H, H))
    w_hh_l1 = u(keys[5], (4 * H, H))
    b_ih_l1 = u(keys[6], (4 * H,))
    b_hh_l1 = u(keys[7], (4 * H,))
    w_lin = u(keys[8], (OUTPUT_SIZE, H))  # nn.Linear also uses 1/sqrt(128)
    b_lin = u(keys[9], (OUTPUT_SIZE,))

    # Pre-transpose to (in, out) and fuse the two biases per layer.
    kernel_params = (
        w_ih_l0.T, w_hh_l0.T, (b_ih_l0 + b_hh_l0)[None, :],
        w_ih_l1.T, w_hh_l1.T, (b_ih_l1 + b_hh_l1)[None, :],
        w_lin.T, b_lin[None, :],
    )
    raw = dict(w_ih_l0=w_ih_l0, w_hh_l0=w_hh_l0, b_ih_l0=b_ih_l0, b_hh_l0=b_hh_l0,
               w_ih_l1=w_ih_l1, w_hh_l1=w_hh_l1, b_ih_l1=b_ih_l1, b_hh_l1=b_hh_l1,
               w_lin=w_lin, b_lin=b_lin)
    return kernel_params, raw


# --------------------------- Pure-JAX reference ---------------------------- #
def reference_forward(x, raw):
    H = HIDDEN_SIZE
    B, T, _ = x.shape

    def cell(x_t, h, c, w_ih, w_hh, b_ih, b_hh):
        gates = x_t @ w_ih.T + b_ih + h @ w_hh.T + b_hh
        i = jax.nn.sigmoid(gates[:, 0 * H:1 * H])
        f = jax.nn.sigmoid(gates[:, 1 * H:2 * H])
        g = jnp.tanh(gates[:, 2 * H:3 * H])
        o = jax.nn.sigmoid(gates[:, 3 * H:4 * H])
        c = f * c + i * g
        h = o * jnp.tanh(c)
        return h, c

    h0 = jnp.zeros((B, H)); c0 = jnp.zeros((B, H))
    h1 = jnp.zeros((B, H)); c1 = jnp.zeros((B, H))
    outs = []
    for t in range(T):
        h0, c0 = cell(x[:, t, :], h0, c0,
                      raw["w_ih_l0"], raw["w_hh_l0"], raw["b_ih_l0"], raw["b_hh_l0"])
        h1, c1 = cell(h0, h1, c1,
                      raw["w_ih_l1"], raw["w_hh_l1"], raw["b_ih_l1"], raw["b_hh_l1"])
        outs.append(h1)
    out = jnp.stack(outs, axis=1)                       # (B, T, H)
    out = out.reshape(-1, H) @ raw["w_lin"].T + raw["b_lin"]
    out = out[None]                                     # (1, B*T, 3)
    h_n = jnp.stack([h0, h1], axis=0)
    c_n = jnp.stack([c0, c1], axis=0)
    return out, (h_n, c_n)


# ------------------------------- Main -------------------------------------- #
if __name__ == "__main__":
    key = jax.random.PRNGKey(0)
    k_param, k_x = jax.random.split(key)

    B, T = 2, 8
    x = jax.random.normal(k_x, (B, T, INPUT_SIZE), jnp.float32)
    kernel_params, raw = init_params(k_param)

    out, (h_n, c_n) = lstm_net_forward(x, None, kernel_params)
    jax.block_until_ready((out, h_n, c_n))

    # sanity check against pure-JAX reference of the PyTorch semantics
    out_ref, (h_ref, c_ref) = reference_forward(x, raw)
    assert out.shape == (1, B * T, OUTPUT_SIZE)
    assert h_n.shape == (NUM_LAYERS, B, HIDDEN_SIZE)
    assert c_n.shape == (NUM_LAYERS, B, HIDDEN_SIZE)
    np.testing.assert_allclose(np.asarray(out), np.asarray(out_ref), rtol=1e-4, atol=1e-4)
    np.testing.assert_allclose(np.asarray(h_n), np.asarray(h_ref), rtol=1e-4, atol=1e-4)
    np.testing.assert_allclose(np.asarray(c_n), np.asarray(c_ref), rtol=1e-4, atol=1e-4)

    print("KERNEL_OK")
</pallas_src>

<mosaic_0001>
module attributes {stable_mosaic.version = 11 : i64} {
  func.func @_lstm_net_kernel(%arg0: memref<64x3xf32, #tpu.memory_space<vmem>>, %arg1: memref<2x8x128xf32, #tpu.memory_space<vmem>>, %arg2: memref<2x8x128xf32, #tpu.memory_space<vmem>>, %arg3: memref<3x512xf32, #tpu.memory_space<vmem>>, %arg4: memref<128x512xf32, #tpu.memory_space<vmem>>, %arg5: memref<1x512xf32, #tpu.memory_space<vmem>>, %arg6: memref<128x512xf32, #tpu.memory_space<vmem>>, %arg7: memref<128x512xf32, #tpu.memory_space<vmem>>, %arg8: memref<1x512xf32, #tpu.memory_space<vmem>>, %arg9: memref<128x3xf32, #tpu.memory_space<vmem>>, %arg10: memref<1x3xf32, #tpu.memory_space<vmem>>, %arg11: memref<64x3xf32, #tpu.memory_space<vmem>>, %arg12: memref<2x8x128xf32, #tpu.memory_space<vmem>>, %arg13: memref<2x8x128xf32, #tpu.memory_space<vmem>>, %arg14: memref<64x512xf32, #tpu.memory_space<vmem>>, %arg15: memref<64x128xf32, #tpu.memory_space<vmem>>) attributes {dimension_semantics = [], scalar_prefetch = 0 : i64, scratch_operands = 2 : i64, tpu.core_type = #tpu.core_type<tc>} {
    %c0 = arith.constant 0 : index
    %c0_0 = arith.constant 0 : index
    %0 = vector.load %arg0[%c0, %c0_0] : memref<64x3xf32, #tpu.memory_space<vmem>>, vector<64x3xf32>
    %c0_1 = arith.constant 0 : index
    %c0_2 = arith.constant 0 : index
    %1 = vector.load %arg3[%c0_1, %c0_2] : memref<3x512xf32, #tpu.memory_space<vmem>>, vector<3x512xf32>
    %cst = arith.constant dense<0.000000e+00> : vector<64x512xf32>
    %2 = tpu.matmul %0, %1, %cst {dimension_numbers = #tpu.dot_dimension_numbers<[1], [0], [0], [1], [0, 0, 1, 1], [], []>} : vector<64x3xf32>, vector<3x512xf32>, vector<64x512xf32> -> vector<64x512xf32>
    %c0_3 = arith.constant 0 : index
    %c0_4 = arith.constant 0 : index
    %3 = vector.load %arg5[%c0_3, %c0_4] : memref<1x512xf32, #tpu.memory_space<vmem>>, vector<1x512xf32>
    %4 = vector.broadcast %3 : vector<1x512xf32> to vector<64x512xf32>
    %5 = arith.addf %2, %4 : vector<64x512xf32>
    %c0_5 = arith.constant 0 : index
    %c0_6 = arith.constant 0 : index
    %6 = vector.load %arg14[%c0_5, %c0_6] : memref<64x512xf32, #tpu.memory_space<vmem>>, vector<64x512xf32>
    tpu.vector_store %arg14[%c0_5, %c0_6], %5 {strides = array<i32>} : memref<64x512xf32, #tpu.memory_space<vmem>>, vector<64x512xf32>,
    %c0_7 = arith.constant 0 : index
    %c0_8 = arith.constant 0 : index
    %7 = vector.load %arg8[%c0_7, %c0_8] : memref<1x512xf32, #tpu.memory_space<vmem>>, vector<1x512xf32>
    %8 = vector.shape_cast %7 : vector<1x512xf32> to vector<1x512xf32>
    %9 = vector.broadcast %8 : vector<1x512xf32> to vector<8x512xf32>
    %c0_9 = arith.constant 0 : index
    %c0_10 = arith.constant 0 : index
    %c0_11 = arith.constant 0 : index
    %10 = vector.load %arg1[%c0_9, %c0_10, %c0_11] : memref<2x8x128xf32, #tpu.memory_space<vmem>>, vector<1x8x128xf32>
    %11 = vector.shape_cast %10 : vector<1x8x128xf32> to vector<8x128xf32>
    %c0_12 = arith.constant 0 : index
    %c0_13 = arith.constant 0 : index
    %c0_14 = arith.constant 0 : index
    %12 = vector.load %arg2[%c0_12, %c0_13, %c0_14] : memref<2x8x128xf32, #tpu.memory_space<vmem>>, vector<1x8x128xf32>
    %13 = vector.shape_cast %12 : vector<1x8x128xf32> to vector<8x128xf32>
    %c1 = arith.constant 1 : index
    %c0_15 = arith.constant 0 : index
    %c0_16 = arith.constant 0 : index
    %14 = vector.load %arg1[%c1, %c0_15, %c0_16] : memref<2x8x128xf32, #tpu.memory_space<vmem>>, vector<1x8x128xf32>
    %15 = vector.shape_cast %14 : vector<1x8x128xf32> to vector<8x128xf32>
    %c1_17 = arith.constant 1 : index
    %c0_18 = arith.constant 0 : index
    %c0_19 = arith.constant 0 : index
    %16 = vector.load %arg2[%c1_17, %c0_18, %c0_19] : memref<2x8x128xf32, #tpu.memory_space<vmem>>, vector<1x8x128xf32>
    %17 = vector.shape_cast %16 : vector<1x8x128xf32> to vector<8x128xf32>
    %c0_i32 = arith.constant 0 : i32
    %c8_i32 = arith.constant 8 : i32
    %18 = arith.muli %c0_i32, %c8_i32 : i32
    %19 = tpu.assume_multiple %18, 8 : i32
    %c0_20 = arith.constant 0 : index
    %c0_21 = arith.constant 0 : index
    %20 = vector.load %arg4[%c0_20, %c0_21] : memref<128x512xf32, #tpu.memory_space<vmem>>, vector<128x512xf32>
    %cst_22 = arith.constant dense<0.000000e+00> : vector<8x512xf32>
    %21 = tpu.matmul %11, %20, %cst_22 {dimension_numbers = #tpu.dot_dimension_numbers<[1], [0], [0], [1], [0, 0, 1, 1], [], []>} : vector<8x128xf32>, vector<128x512xf32>, vector<8x512xf32> -> vector<8x512xf32>
    %c0_23 = arith.constant 0 : index
    %c0_24 = arith.constant 0 : index
    %22 = vector.load %arg7[%c0_23, %c0_24] : memref<128x512xf32, #tpu.memory_space<vmem>>, vector<128x512xf32>
    %cst_25 = arith.constant dense<0.000000e+00> : vector<8x512xf32>
    %23 = tpu.matmul %15, %22, %cst_25 {dimension_numbers = #tpu.dot_dimension_numbers<[1], [0], [0], [1], [0, 0, 1, 1], [], []>} : vector<8x128xf32>, vector<128x512xf32>, vector<8x512xf32> -> vector<8x512xf32>
    %24 = arith.index_cast %19 : i32 to index
    %c0_26 = arith.constant 0 : index
    %25 = vector.load %arg14[%24, %c0_26] : memref<64x512xf32, #tpu.memory_space<vmem>>, vector<8x512xf32>
    %26 = arith.addf %25, %21 : vector<8x512xf32>
    %27 = vector.extract_strided_slice %26 {offsets = [0, 0], sizes = [8, 128], strides = [1, 1]} : vector<8x512xf32> to vector<8x128xf32>
    %28 = arith.negf %27 : vector<8x128xf32>
    %29 = math.exp %28 : vector<8x128xf32>
    %cst_27 = arith.constant 1.000000e+00 : f32
    %30 = vector.broadcast %cst_27 : f32 to vector<8x128xf32>
    %31 = arith.addf %30, %29 : vector<8x128xf32>
    %32 = arith.divf %30, %31 : vector<8x128xf32>
    %33 = vector.extract_strided_slice %26 {offsets = [0, 128], sizes = [8, 128], strides = [1, 1]} : vector<8x512xf32> to vector<8x128xf32>
    %34 = arith.negf %33 : vector<8x128xf32>
    %35 = math.exp %34 : vector<8x128xf32>
    %cst_28 = arith.constant 1.000000e+00 : f32
    %36 = vector.broadcast %cst_28 : f32 to vector<8x128xf32>
    %37 = arith.addf %36, %35 : vector<8x128xf32>
    %38 = arith.divf %36, %37 : vector<8x128xf32>
    %39 = vector.extract_strided_slice %26 {offsets = [0, 256], sizes = [8, 128], strides = [1, 1]} : vector<8x512xf32> to vector<8x128xf32>
    %40 = math.tanh %39 : vector<8x128xf32>
    %41 = vector.extract_strided_slice %26 {offsets = [0, 384], sizes = [8, 128], strides = [1, 1]} : vector<8x512xf32> to vector<8x128xf32>
    %42 = arith.negf %41 : vector<8x128xf32>
    %43 = math.exp %42 : vector<8x128xf32>
    %cst_29 = arith.constant 1.000000e+00 : f32
    %44 = vector.broadcast %cst_29 : f32 to vector<8x128xf32>
    %45 = arith.addf %44, %43 : vector<8x128xf32>
    %46 = arith.divf %44, %45 : vector<8x128xf32>
    %47 = arith.mulf %38, %13 : vector<8x128xf32>
    %48 = arith.mulf %32, %40 : vector<8x128xf32>
    %49 = arith.addf %47, %48 : vector<8x128xf32>
    %50 = math.tanh %49 : vector<8x128xf32>
    %51 = arith.mulf %46, %50 : vector<8x128xf32>
    %c0_30 = arith.constant 0 : index
    %c0_31 = arith.constant 0 : index
    %52 = vector.load %arg6[%c0_30, %c0_31] : memref<128x512xf32, #tpu.memory_space<vmem>>, vector<128x512xf32>
    %cst_32 = arith.constant dense<0.000000e+00> : vector<8x512xf32>
    %53 = tpu.matmul %51, %52, %cst_32 {dimension_numbers = #tpu.dot_dimension_numbers<[1], [0], [0], [1], [0, 0, 1, 1], [], []>} : vector<8x128xf32>, vector<128x512xf32>, vector<8x512xf32> -> vector<8x512xf32>
    %54 = arith.addf %53, %23 : vector<8x512xf32>
    %55 = arith.addf %54, %9 : vector<8x512xf32>
    %56 = vector.extract_strided_slice %55 {offsets = [0, 0], sizes = [8, 128], strides = [1, 1]} : vector<8x512xf32> to vector<8x128xf32>
    %57 = arith.negf %56 : vector<8x128xf32>
    %58 = math.exp %57 : vector<8x128xf32>
    %cst_33 = arith.constant 1.000000e+00 : f32
    %59 = vector.broadcast %cst_33 : f32 to vector<8x128xf32>
    %60 = arith.addf %59, %58 : vector<8x128xf32>
    %61 = arith.divf %59, %60 : vector<8x128xf32>
    %62 = vector.extract_strided_slice %55 {offsets = [0, 128], sizes = [8, 128], strides = [1, 1]} : vector<8x512xf32> to vector<8x128xf32>
    %63 = arith.negf %62 : vector<8x128xf32>
    %64 = math.exp %63 : vector<8x128xf32>
    %cst_34 = arith.constant 1.000000e+00 : f32
    %65 = vector.broadcast %cst_34 : f32 to vector<8x128xf32>
    %66 = arith.addf %65, %64 : vector<8x128xf32>
    %67 = arith.divf %65, %66 : vector<8x128xf32>
    %68 = vector.extract_strided_slice %55 {offsets = [0, 256], sizes = [8, 128], strides = [1, 1]} : vector<8x512xf32> to vector<8x128xf32>
    %69 = math.tanh %68 : vector<8x128xf32>
    %70 = vector.extract_strided_slice %55 {offsets = [0, 384], sizes = [8, 128], strides = [1, 1]} : vector<8x512xf32> to vector<8x128xf32>
    %71 = arith.negf %70 : vector<8x128xf32>
    %72 = math.exp %71 : vector<8x128xf32>
    %cst_35 = arith.constant 1.000000e+00 : f32
    %73 = vector.broadcast %cst_35 : f32 to vector<8x128xf32>
    %74 = arith.addf %73, %72 : vector<8x128xf32>
    %75 = arith.divf %73, %74 : vector<8x128xf32>
    %76 = arith.mulf %67, %17 : vector<8x128xf32>
    %77 = arith.mulf %61, %69 : vector<8x128xf32>
    %78 = arith.addf %76, %77 : vector<8x128xf32>
    %79 = math.tanh %78 : vector<8x128xf32>
    %80 = arith.mulf %75, %79 : vector<8x128xf32>
    %81 = arith.index_cast %19 : i32 to index
    %c0_36 = arith.constant 0 : index
    %82 = vector.load %arg15[%81, %c0_36] : memref<64x128xf32, #tpu.memory_space<vmem>>, vector<8x128xf32>
    tpu.vector_store %arg15[%81, %c0_36], %80 {strides = array<i32>} : memref<64x128xf32, #tpu.memory_space<vmem>>, vector<8x128xf32>,
    %c1_i32 = arith.constant 1 : i32
    %c8_i32_37 = arith.constant 8 : i32
    %83 = arith.muli %c1_i32, %c8_i32_37 : i32
    %84 = tpu.assume_multiple %83, 8 : i32
    %c0_38 = arith.constant 0 : index
    %c0_39 = arith.constant 0 : index
    %85 = vector.load %arg4[%c0_38, %c0_39] : memref<128x512xf32, #tpu.memory_space<vmem>>, vector<128x512xf32>
    %cst_40 = arith.constant dense<0.000000e+00> : vector<8x512xf32>
    %86 = tpu.matmul %51, %85, %cst_40 {dimension_numbers = #tpu.dot_dimension_numbers<[1], [0], [0], [1], [0, 0, 1, 1], [], []>} : vector<8x128xf32>, vector<128x512xf32>, vector<8x512xf32> -> vector<8x512xf32>
    %c0_41 = arith.constant 0 : index
    %c0_42 = arith.constant 0 : index
    %87 = vector.load %arg7[%c0_41, %c0_42] : memref<128x512xf32, #tpu.memory_space<vmem>>, vector<128x512xf32>
    %cst_43 = arith.constant dense<0.000000e+00> : vector<8x512xf32>
    %88 = tpu.matmul %80, %87, %cst_43 {dimension_numbers = #tpu.dot_dimension_numbers<[1], [0], [0], [1], [0, 0, 1, 1], [], []>} : vector<8x128xf32>, vector<128x512xf32>, vector<8x512xf32> -> vector<8x512xf32>
    %89 = arith.index_cast %84 : i32 to index
    %c0_44 = arith.constant 0 : index
    %90 = vector.load %arg14[%89, %c0_44] : memref<64x512xf32, #tpu.memory_space<vmem>>, vector<8x512xf32>
    %91 = arith.addf %90, %86 : vector<8x512xf32>
    %92 = vector.extract_strided_slice %91 {offsets = [0, 0], sizes = [8, 128], strides = [1, 1]} : vector<8x512xf32> to vector<8x128xf32>
    %93 = arith.negf %92 : vector<8x128xf32>
    %94 = math.exp %93 : vector<8x128xf32>
    %cst_45 = arith.constant 1.000000e+00 : f32
    %95 = vector.broadcast %cst_45 : f32 to vector<8x128xf32>
    %96 = arith.addf %95, %94 : vector<8x128xf32>
    %97 = arith.divf %95, %96 : vector<8x128xf32>
    %98 = vector.extract_strided_slice %91 {offsets = [0, 128], sizes = [8, 128], strides = [1, 1]} : vector<8x512xf32> to vector<8x128xf32>
    %99 = arith.negf %98 : vector<8x128xf32>
    %100 = math.exp %99 : vector<8x128xf32>
    %cst_46 = arith.constant 1.000000e+00 : f32
    %101 = vector.broadcast %cst_46 : f32 to vector<8x128xf32>
    %102 = arith.addf %101, %100 : vector<8x128xf32>
    %103 = arith.divf %101, %102 : vector<8x128xf32>
    %104 = vector.extract_strided_slice %91 {offsets = [0, 256], sizes = [8, 128], strides = [1, 1]} : vector<8x512xf32> to vector<8x128xf32>
    %105 = math.tanh %104 : vector<8x128xf32>
    %106 = vector.extract_strided_slice %91 {offsets = [0, 384], sizes = [8, 128], strides = [1, 1]} : vector<8x512xf32> to vector<8x128xf32>
    %107 = arith.negf %106 : vector<8x128xf32>
    %108 = math.exp %107 : vector<8x128xf32>
    %cst_47 = arith.constant 1.000000e+00 : f32
    %109 = vector.broadcast %cst_47 : f32 to vector<8x128xf32>
    %110 = arith.addf %109, %108 : vector<8x128xf32>
    %111 = arith.divf %109, %110 : vector<8x128xf32>
    %112 = arith.mulf %103, %49 : vector<8x128xf32>
    %113 = arith.mulf %97, %105 : vector<8x128xf32>
    %114 = arith.addf %112, %113 : vector<8x128xf32>
    %115 = math.tanh %114 : vector<8x128xf32>
    %116 = arith.mulf %111, %115 : vector<8x128xf32>
    %c0_48 = arith.constant 0 : index
    %c0_49 = arith.constant 0 : index
    %117 = vector.load %arg6[%c0_48, %c0_49] : memref<128x512xf32, #tpu.memory_space<vmem>>, vector<128x512xf32>
    %cst_50 = arith.constant dense<0.000000e+00> : vector<8x512xf32>
    %118 = tpu.matmul %116, %117, %cst_50 {dimension_numbers = #tpu.dot_dimension_numbers<[1], [0], [0], [1], [0, 0, 1, 1], [], []>} : vector<8x128xf32>, vector<128x512xf32>, vector<8x512xf32> -> vector<8x512xf32>
    %119 = arith.addf %118, %88 : vector<8x512xf32>
    %120 = arith.addf %119, %9 : vector<8x512xf32>
    %121 = vector.extract_strided_slice %120 {offsets = [0, 0], sizes = [8, 128], strides = [1, 1]} : vector<8x512xf32> to vector<8x128xf32>
    %122 = arith.negf %121 : vector<8x128xf32>
    %123 = math.exp %122 : vector<8x128xf32>
    %cst_51 = arith.constant 1.000000e+00 : f32
    %124 = vector.broadcast %cst_51 : f32 to vector<8x128xf32>
    %125 = arith.addf %124, %123 : vector<8x128xf32>
    %126 = arith.divf %124, %125 : vector<8x128xf32>
    %127 = vector.extract_strided_slice %120 {offsets = [0, 128], sizes = [8, 128], strides = [1, 1]} : vector<8x512xf32> to vector<8x128xf32>
    %128 = arith.negf %127 : vector<8x128xf32>
    %129 = math.exp %128 : vector<8x128xf32>
    %cst_52 = arith.constant 1.000000e+00 : f32
    %130 = vector.broadcast %cst_52 : f32 to vector<8x128xf32>
    %131 = arith.addf %130, %129 : vector<8x128xf32>
    %132 = arith.divf %130, %131 : vector<8x128xf32>
    %133 = vector.extract_strided_slice %120 {offsets = [0, 256], sizes = [8, 128], strides = [1, 1]} : vector<8x512xf32> to vector<8x128xf32>
    %134 = math.tanh %133 : vector<8x128xf32>
    %135 = vector.extract_strided_slice %120 {offsets = [0, 384], sizes = [8, 128], strides = [1, 1]} : vector<8x512xf32> to vector<8x128xf32>
    %136 = arith.negf %135 : vector<8x128xf32>
    %137 = math.exp %136 : vector<8x128xf32>
    %cst_53 = arith.constant 1.000000e+00 : f32
    %138 = vector.broadcast %cst_53 : f32 to vector<8x128xf32>
    %139 = arith.addf %138, %137 : vector<8x128xf32>
    %140 = arith.divf %138, %139 : vector<8x128xf32>
    %141 = arith.mulf %132, %78 : vector<8x128xf32>
    %142 = arith.mulf %126, %134 : vector<8x128xf32>
    %143 = arith.addf %141, %142 : vector<8x128xf32>
    %144 = math.tanh %143 : vector<8x128xf32>
    %145 = arith.mulf %140, %144 : vector<8x128xf32>
    %146 = arith.index_cast %84 : i32 to index
    %c0_54 = arith.constant 0 : index
    %147 = vector.load %arg15[%146, %c0_54] : memref<64x128xf32, #tpu.memory_space<vmem>>, vector<8x128xf32>
    tpu.vector_store %arg15[%146, %c0_54], %145 {strides = array<i32>} : memref<64x128xf32, #tpu.memory_space<vmem>>, vector<8x128xf32>,
    %c2_i32 = arith.constant 2 : i32
    %c8_i32_55 = arith.constant 8 : i32
    %148 = arith.muli %c2_i32, %c8_i32_55 : i32
    %149 = tpu.assume_multiple %148, 8 : i32
    %c0_56 = arith.constant 0 : index
    %c0_57 = arith.constant 0 : index
    %150 = vector.load %arg4[%c0_56, %c0_57] : memref<128x512xf32, #tpu.memory_space<vmem>>, vector<128x512xf32>
    %cst_58 = arith.constant dense<0.000000e+00> : vector<8x512xf32>
    %151 = tpu.matmul %116, %150, %cst_58 {dimension_numbers = #tpu.dot_dimension_numbers<[1], [0], [0], [1], [0, 0, 1, 1], [], []>} : vector<8x128xf32>, vector<128x512xf32>, vector<8x512xf32> -> vector<8x512xf32>
    %c0_59 = arith.constant 0 : index
    %c0_60 = arith.constant 0 : index
    %152 = vector.load %arg7[%c0_59, %c0_60] : memref<128x512xf32, #tpu.memory_space<vmem>>, vector<128x512xf32>
    %cst_61 = arith.constant dense<0.000000e+00> : vector<8x512xf32>
    %153 = tpu.matmul %145, %152, %cst_61 {dimension_numbers = #tpu.dot_dimension_numbers<[1], [0], [0], [1], [0, 0, 1, 1], [], []>} : vector<8x128xf32>, vector<128x512xf32>, vector<8x512xf32> -> vector<8x512xf32>
    %154 = arith.index_cast %149 : i32 to index
    %c0_62 = arith.constant 0 : index
    %155 = vector.load %arg14[%154, %c0_62] : memref<64x512xf32, #tpu.memory_space<vmem>>, vector<8x512xf32>
    %156 = arith.addf %155, %151 : vector<8x512xf32>
    %157 = vector.extract_strided_slice %156 {offsets = [0, 0], sizes = [8, 128], strides = [1, 1]} : vector<8x512xf32> to vector<8x128xf32>
    %158 = arith.negf %157 : vector<8x128xf32>
    %159 = math.exp %158 : vector<8x128xf32>
    %cst_63 = arith.constant 1.000000e+00 : f32
    %160 = vector.broadcast %cst_63 : f32 to vector<8x128xf32>
    %161 = arith.addf %160, %159 : vector<8x128xf32>
    %162 = arith.divf %160, %161 : vector<8x128xf32>
    %163 = vector.extract_strided_slice %156 {offsets = [0, 128], sizes = [8, 128], strides = [1, 1]} : vector<8x512xf32> to vector<8x128xf32>
    %164 = arith.negf %163 : vector<8x128xf32>
    %165 = math.exp %164 : vector<8x128xf32>
    %cst_64 = arith.constant 1.000000e+00 : f32
    %166 = vector.broadcast %cst_64 : f32 to vector<8x128xf32>
    %167 = arith.addf %166, %165 : vector<8x128xf32>
    %168 = arith.divf %166, %167 : vector<8x128xf32>
    %169 = vector.extract_strided_slice %156 {offsets = [0, 256], sizes = [8, 128], strides = [1, 1]} : vector<8x512xf32> to vector<8x128xf32>
    %170 = math.tanh %169 : vector<8x128xf32>
    %171 = vector.extract_strided_slice %156 {offsets = [0, 384], sizes = [8, 128], strides = [1, 1]} : vector<8x512xf32> to vector<8x128xf32>
    %172 = arith.negf %171 : vector<8x128xf32>
    %173 = math.exp %172 : vector<8x128xf32>
    %cst_65 = arith.constant 1.000000e+00 : f32
    %174 = vector.broadcast %cst_65 : f32 to vector<8x128xf32>
    %175 = arith.addf %174, %173 : vector<8x128xf32>
    %176 = arith.divf %174, %175 : vector<8x128xf32>
    %177 = arith.mulf %168, %114 : vector<8x128xf32>
    %178 = arith.mulf %162, %170 : vector<8x128xf32>
    %179 = arith.addf %177, %178 : vector<8x128xf32>
    %180 = math.tanh %179 : vector<8x128xf32>
    %181 = arith.mulf %176, %180 : vector<8x128xf32>
    %c0_66 = arith.constant 0 : index
    %c0_67 = arith.constant 0 : index
    %182 = vector.load %arg6[%c0_66, %c0_67] : memref<128x512xf32, #tpu.memory_space<vmem>>, vector<128x512xf32>
    %cst_68 = arith.constant dense<0.000000e+00> : vector<8x512xf32>
    %183 = tpu.matmul %181, %182, %cst_68 {dimension_numbers = #tpu.dot_dimension_numbers<[1], [0], [0], [1], [0, 0, 1, 1], [], []>} : vector<8x128xf32>, vector<128x512xf32>, vector<8x512xf32> -> vector<8x512xf32>
    %184 = arith.addf %183, %153 : vector<8x512xf32>
    %185 = arith.addf %184, %9 : vector<8x512xf32>
    %186 = vector.extract_strided_slice %185 {offsets = [0, 0], sizes = [8, 128], strides = [1, 1]} : vector<8x512xf32> to vector<8x128xf32>
    %187 = arith.negf %186 : vector<8x128xf32>
    %188 = math.exp %187 : vector<8x128xf32>
    %cst_69 = arith.constant 1.000000e+00 : f32
    %189 = vector.broadcast %cst_69 : f32 to vector<8x128xf32>
    %190 = arith.addf %189, %188 : vector<8x128xf32>
    %191 = arith.divf %189, %190 : vector<8x128xf32>
    %192 = vector.extract_strided_slice %185 {offsets = [0, 128], sizes = [8, 128], strides = [1, 1]} : vector<8x512xf32> to vector<8x128xf32>
    %193 = arith.negf %192 : vector<8x128xf32>
    %194 = math.exp %193 : vector<8x128xf32>
    %cst_70 = arith.constant 1.000000e+00 : f32
    %195 = vector.broadcast %cst_70 : f32 to vector<8x128xf32>
    %196 = arith.addf %195, %194 : vector<8x128xf32>
    %197 = arith.divf %195, %196 : vector<8x128xf32>
    %198 = vector.extract_strided_slice %185 {offsets = [0, 256], sizes = [8, 128], strides = [1, 1]} : vector<8x512xf32> to vector<8x128xf32>
    %199 = math.tanh %198 : vector<8x128xf32>
    %200 = vector.extract_strided_slice %185 {offsets = [0, 384], sizes = [8, 128], strides = [1, 1]} : vector<8x512xf32> to vector<8x128xf32>
    %201 = arith.negf %200 : vector<8x128xf32>
    %202 = math.exp %201 : vector<8x128xf32>
    %cst_71 = arith.constant 1.000000e+00 : f32
    %203 = vector.broadcast %cst_71 : f32 to vector<8x128xf32>
    %204 = arith.addf %203, %202 : vector<8x128xf32>
    %205 = arith.divf %203, %204 : vector<8x128xf32>
    %206 = arith.mulf %197, %143 : vector<8x128xf32>
    %207 = arith.mulf %191, %199 : vector<8x128xf32>
    %208 = arith.addf %206, %207 : vector<8x128xf32>
    %209 = math.tanh %208 : vector<8x128xf32>
    %210 = arith.mulf %205, %209 : vector<8x128xf32>
    %211 = arith.index_cast %149 : i32 to index
    %c0_72 = arith.constant 0 : index
    %212 = vector.load %arg15[%211, %c0_72] : memref<64x128xf32, #tpu.memory_space<vmem>>, vector<8x128xf32>
    tpu.vector_store %arg15[%211, %c0_72], %210 {strides = array<i32>} : memref<64x128xf32, #tpu.memory_space<vmem>>, vector<8x128xf32>,
    %c3_i32 = arith.constant 3 : i32
    %c8_i32_73 = arith.constant 8 : i32
    %213 = arith.muli %c3_i32, %c8_i32_73 : i32
    %214 = tpu.assume_multiple %213, 8 : i32
    %c0_74 = arith.constant 0 : index
    %c0_75 = arith.constant 0 : index
    %215 = vector.load %arg4[%c0_74, %c0_75] : memref<128x512xf32, #tpu.memory_space<vmem>>, vector<128x512xf32>
    %cst_76 = arith.constant dense<0.000000e+00> : vector<8x512xf32>
    %216 = tpu.matmul %181, %215, %cst_76 {dimension_numbers = #tpu.dot_dimension_numbers<[1], [0], [0], [1], [0, 0, 1, 1], [], []>} : vector<8x128xf32>, vector<128x512xf32>, vector<8x512xf32> -> vector<8x512xf32>
    %c0_77 = arith.constant 0 : index
    %c0_78 = arith.constant 0 : index
    %217 = vector.load %arg7[%c0_77, %c0_78] : memref<128x512xf32, #tpu.memory_space<vmem>>, vector<128x512xf32>
    %cst_79 = arith.constant dense<0.000000e+00> : vector<8x512xf32>
    %218 = tpu.matmul %210, %217, %cst_79 {dimension_numbers = #tpu.dot_dimension_numbers<[1], [0], [0], [1], [0, 0, 1, 1], [], []>} : vector<8x128xf32>, vector<128x512xf32>, vector<8x512xf32> -> vector<8x512xf32>
    %219 = arith.index_cast %214 : i32 to index
    %c0_80 = arith.constant 0 : index
    %220 = vector.load %arg14[%219, %c0_80] : memref<64x512xf32, #tpu.memory_space<vmem>>, vector<8x512xf32>
    %221 = arith.addf %220, %216 : vector<8x512xf32>
    %222 = vector.extract_strided_slice %221 {offsets = [0, 0], sizes = [8, 128], strides = [1, 1]} : vector<8x512xf32> to vector<8x128xf32>
    %223 = arith.negf %222 : vector<8x128xf32>
    %224 = math.exp %223 : vector<8x128xf32>
    %cst_81 = arith.constant 1.000000e+00 : f32
    %225 = vector.broadcast %cst_81 : f32 to vector<8x128xf32>
    %226 = arith.addf %225, %224 : vector<8x128xf32>
    %227 = arith.divf %225, %226 : vector<8x128xf32>
    %228 = vector.extract_strided_slice %221 {offsets = [0, 128], sizes = [8, 128], strides = [1, 1]} : vector<8x512xf32> to vector<8x128xf32>
    %229 = arith.negf %228 : vector<8x128xf32>
    %230 = math.exp %229 : vector<8x128xf32>
    %cst_82 = arith.constant 1.000000e+00 : f32
    %231 = vector.broadcast %cst_82 : f32 to vector<8x128xf32>
    %232 = arith.addf %231, %230 : vector<8x128xf32>
    %233 = arith.divf %231, %232 : vector<8x128xf32>
    %234 = vector.extract_strided_slice %221 {offsets = [0, 256], sizes = [8, 128], strides = [1, 1]} : vector<8x512xf32> to vector<8x128xf32>
    %235 = math.tanh %234 : vector<8x128xf32>
    %236 = vector.extract_strided_slice %221 {offsets = [0, 384], sizes = [8, 128], strides = [1, 1]} : vector<8x512xf32> to vector<8x128xf32>
    %237 = arith.negf %236 : vector<8x128xf32>
    %238 = math.exp %237 : vector<8x128xf32>
    %cst_83 = arith.constant 1.000000e+00 : f32
    %239 = vector.broadcast %cst_83 : f32 to vector<8x128xf32>
    %240 = arith.addf %239, %238 : vector<8x128xf32>
    %241 = arith.divf %239, %240 : vector<8x128xf32>
    %242 = arith.mulf %233, %179 : vector<8x128xf32>
    %243 = arith.mulf %227, %235 : vector<8x128xf32>
    %244 = arith.addf %242, %243 : vector<8x128xf32>
    %245 = math.tanh %244 : vector<8x128xf32>
    %246 = arith.mulf %241, %245 : vector<8x128xf32>
    %c0_84 = arith.constant 0 : index
    %c0_85 = arith.constant 0 : index
    %247 = vector.load %arg6[%c0_84, %c0_85] : memref<128x512xf32, #tpu.memory_space<vmem>>, vector<128x512xf32>
    %cst_86 = arith.constant dense<0.000000e+00> : vector<8x512xf32>
    %248 = tpu.matmul %246, %247, %cst_86 {dimension_numbers = #tpu.dot_dimension_numbers<[1], [0], [0], [1], [0, 0, 1, 1], [], []>} : vector<8x128xf32>, vector<128x512xf32>, vector<8x512xf32> -> vector<8x512xf32>
    %249 = arith.addf %248, %218 : vector<8x512xf32>
    %250 = arith.addf %249, %9 : vector<8x512xf32>
    %251 = vector.extract_strided_slice %250 {offsets = [0, 0], sizes = [8, 128], strides = [1, 1]} : vector<8x512xf32> to vector<8x128xf32>
    %252 = arith.negf %251 : vector<8x128xf32>
    %253 = math.exp %252 : vector<8x128xf32>
    %cst_87 = arith.constant 1.000000e+00 : f32
    %254 = vector.broadcast %cst_87 : f32 to vector<8x128xf32>
    %255 = arith.addf %254, %253 : vector<8x128xf32>
    %256 = arith.divf %254, %255 : vector<8x128xf32>
    %257 = vector.extract_strided_slice %250 {offsets = [0, 128], sizes = [8, 128], strides = [1, 1]} : vector<8x512xf32> to vector<8x128xf32>
    %258 = arith.negf %257 : vector<8x128xf32>
    %259 = math.exp %258 : vector<8x128xf32>
    %cst_88 = arith.constant 1.000000e+00 : f32
    %260 = vector.broadcast %cst_88 : f32 to vector<8x128xf32>
    %261 = arith.addf %260, %259 : vector<8x128xf32>
    %262 = arith.divf %260, %261 : vector<8x128xf32>
    %263 = vector.extract_strided_slice %250 {offsets = [0, 256], sizes = [8, 128], strides = [1, 1]} : vector<8x512xf32> to vector<8x128xf32>
    %264 = math.tanh %263 : vector<8x128xf32>
    %265 = vector.extract_strided_slice %250 {offsets = [0, 384], sizes = [8, 128], strides = [1, 1]} : vector<8x512xf32> to vector<8x128xf32>
    %266 = arith.negf %265 : vector<8x128xf32>
    %267 = math.exp %266 : vector<8x128xf32>
    %cst_89 = arith.constant 1.000000e+00 : f32
    %268 = vector.broadcast %cst_89 : f32 to vector<8x128xf32>
    %269 = arith.addf %268, %267 : vector<8x128xf32>
    %270 = arith.divf %268, %269 : vector<8x128xf32>
    %271 = arith.mulf %262, %208 : vector<8x128xf32>
    %272 = arith.mulf %256, %264 : vector<8x128xf32>
    %273 = arith.addf %271, %272 : vector<8x128xf32>
    %274 = math.tanh %273 : vector<8x128xf32>
    %275 = arith.mulf %270, %274 : vector<8x128xf32>
    %276 = arith.index_cast %214 : i32 to index
    %c0_90 = arith.constant 0 : index
    %277 = vector.load %arg15[%276, %c0_90] : memref<64x128xf32, #tpu.memory_space<vmem>>, vector<8x128xf32>
    tpu.vector_store %arg15[%276, %c0_90], %275 {strides = array<i32>} : memref<64x128xf32, #tpu.memory_space<vmem>>, vector<8x128xf32>,
    %c4_i32 = arith.constant 4 : i32
    %c8_i32_91 = arith.constant 8 : i32
    %278 = arith.muli %c4_i32, %c8_i32_91 : i32
    %279 = tpu.assume_multiple %278, 8 : i32
    %c0_92 = arith.constant 0 : index
    %c0_93 = arith.constant 0 : index
    %280 = vector.load %arg4[%c0_92, %c0_93] : memref<128x512xf32, #tpu.memory_space<vmem>>, vector<128x512xf32>
    %cst_94 = arith.constant dense<0.000000e+00> : vector<8x512xf32>
    %281 = tpu.matmul %246, %280, %cst_94 {dimension_numbers = #tpu.dot_dimension_numbers<[1], [0], [0], [1], [0, 0, 1, 1], [], []>} : vector<8x128xf32>, vector<128x512xf32>, vector<8x512xf32> -> vector<8x512xf32>
    %c0_95 = arith.constant 0 : index
    %c0_96 = arith.constant 0 : index
    %282 = vector.load %arg7[%c0_95, %c0_96] : memref<128x512xf32, #tpu.memory_space<vmem>>, vector<128x512xf32>
    %cst_97 = arith.constant dense<0.000000e+00> : vector<8x512xf32>
    %283 = tpu.matmul %275, %282, %cst_97 {dimension_numbers = #tpu.dot_dimension_numbers<[1], [0], [0], [1], [0, 0, 1, 1], [], []>} : vector<8x128xf32>, vector<128x512xf32>, vector<8x512xf32> -> vector<8x512xf32>
    %284 = arith.index_cast %279 : i32 to index
    %c0_98 = arith.constant 0 : index
    %285 = vector.load %arg14[%284, %c0_98] : memref<64x512xf32, #tpu.memory_space<vmem>>, vector<8x512xf32>
    %286 = arith.addf %285, %281 : vector<8x512xf32>
    %287 = vector.extract_strided_slice %286 {offsets = [0, 0], sizes = [8, 128], strides = [1, 1]} : vector<8x512xf32> to vector<8x128xf32>
    %288 = arith.negf %287 : vector<8x128xf32>
    %289 = math.exp %288 : vector<8x128xf32>
    %cst_99 = arith.constant 1.000000e+00 : f32
    %290 = vector.broadcast %cst_99 : f32 to vector<8x128xf32>
    %291 = arith.addf %290, %289 : vector<8x128xf32>
    %292 = arith.divf %290, %291 : vector<8x128xf32>
    %293 = vector.extract_strided_slice %286 {offsets = [0, 128], sizes = [8, 128], strides = [1, 1]} : vector<8x512xf32> to vector<8x128xf32>
    %294 = arith.negf %293 : vector<8x128xf32>
    %295 = math.exp %294 : vector<8x128xf32>
    %cst_100 = arith.constant 1.000000e+00 : f32
    %296 = vector.broadcast %cst_100 : f32 to vector<8x128xf32>
    %297 = arith.addf %296, %295 : vector<8x128xf32>
    %298 = arith.divf %296, %297 : vector<8x128xf32>
    %299 = vector.extract_strided_slice %286 {offsets = [0, 256], sizes = [8, 128], strides = [1, 1]} : vector<8x512xf32> to vector<8x128xf32>
    %300 = math.tanh %299 : vector<8x128xf32>
    %301 = vector.extract_strided_slice %286 {offsets = [0, 384], sizes = [8, 128], strides = [1, 1]} : vector<8x512xf32> to vector<8x128xf32>
    %302 = arith.negf %301 : vector<8x128xf32>
    %303 = math.exp %302 : vector<8x128xf32>
    %cst_101 = arith.constant 1.000000e+00 : f32
    %304 = vector.broadcast %cst_101 : f32 to vector<8x128xf32>
    %305 = arith.addf %304, %303 : vector<8x128xf32>
    %306 = arith.divf %304, %305 : vector<8x128xf32>
    %307 = arith.mulf %298, %244 : vector<8x128xf32>
    %308 = arith.mulf %292, %300 : vector<8x128xf32>
    %309 = arith.addf %307, %308 : vector<8x128xf32>
    %310 = math.tanh %309 : vector<8x128xf32>
    %311 = arith.mulf %306, %310 : vector<8x128xf32>
    %c0_102 = arith.constant 0 : index
    %c0_103 = arith.constant 0 : index
    %312 = vector.load %arg6[%c0_102, %c0_103] : memref<128x512xf32, #tpu.memory_space<vmem>>, vector<128x512xf32>
    %cst_104 = arith.constant dense<0.000000e+00> : vector<8x512xf32>
    %313 = tpu.matmul %311, %312, %cst_104 {dimension_numbers = #tpu.dot_dimension_numbers<[1], [0], [0], [1], [0, 0, 1, 1], [], []>} : vector<8x128xf32>, vector<128x512xf32>, vector<8x512xf32> -> vector<8x512xf32>
    %314 = arith.addf %313, %283 : vector<8x512xf32>
    %315 = arith.addf %314, %9 : vector<8x512xf32>
    %316 = vector.extract_strided_slice %315 {offsets = [0, 0], sizes = [8, 128], strides = [1, 1]} : vector<8x512xf32> to vector<8x128xf32>
    %317 = arith.negf %316 : vector<8x128xf32>
    %318 = math.exp %317 : vector<8x128xf32>
    %cst_105 = arith.constant 1.000000e+00 : f32
    %319 = vector.broadcast %cst_105 : f32 to vector<8x128xf32>
    %320 = arith.addf %319, %318 : vector<8x128xf32>
    %321 = arith.divf %319, %320 : vector<8x128xf32>
    %322 = vector.extract_strided_slice %315 {offsets = [0, 128], sizes = [8, 128], strides = [1, 1]} : vector<8x512xf32> to vector<8x128xf32>
    %323 = arith.negf %322 : vector<8x128xf32>
    %324 = math.exp %323 : vector<8x128xf32>
    %cst_106 = arith.constant 1.000000e+00 : f32
    %325 = vector.broadcast %cst_106 : f32 to vector<8x128xf32>
    %326 = arith.addf %325, %324 : vector<8x128xf32>
    %327 = arith.divf %325, %326 : vector<8x128xf32>
    %328 = vector.extract_strided_slice %315 {offsets = [0, 256], sizes = [8, 128], strides = [1, 1]} : vector<8x512xf32> to vector<8x128xf32>
    %329 = math.tanh %328 : vector<8x128xf32>
    %330 = vector.extract_strided_slice %315 {offsets = [0, 384], sizes = [8, 128], strides = [1, 1]} : vector<8x512xf32> to vector<8x128xf32>
    %331 = arith.negf %330 : vector<8x128xf32>
    %332 = math.exp %331 : vector<8x128xf32>
    %cst_107 = arith.constant 1.000000e+00 : f32
    %333 = vector.broadcast %cst_107 : f32 to vector<8x128xf32>
    %334 = arith.addf %333, %332 : vector<8x128xf32>
    %335 = arith.divf %333, %334 : vector<8x128xf32>
    %336 = arith.mulf %327, %273 : vector<8x128xf32>
    %337 = arith.mulf %321, %329 : vector<8x128xf32>
    %338 = arith.addf %336, %337 : vector<8x128xf32>
    %339 = math.tanh %338 : vector<8x128xf32>
    %340 = arith.mulf %335, %339 : vector<8x128xf32>
    %341 = arith.index_cast %279 : i32 to index
    %c0_108 = arith.constant 0 : index
    %342 = vector.load %arg15[%341, %c0_108] : memref<64x128xf32, #tpu.memory_space<vmem>>, vector<8x128xf32>
    tpu.vector_store %arg15[%341, %c0_108], %340 {strides = array<i32>} : memref<64x128xf32, #tpu.memory_space<vmem>>, vector<8x128xf32>,
    %c5_i32 = arith.constant 5 : i32
    %c8_i32_109 = arith.constant 8 : i32
    %343 = arith.muli %c5_i32, %c8_i32_109 : i32
    %344 = tpu.assume_multiple %343, 8 : i32
    %c0_110 = arith.constant 0 : index
    %c0_111 = arith.constant 0 : index
    %345 = vector.load %arg4[%c0_110, %c0_111] : memref<128x512xf32, #tpu.memory_space<vmem>>, vector<128x512xf32>
    %cst_112 = arith.constant dense<0.000000e+00> : vector<8x512xf32>
    %346 = tpu.matmul %311, %345, %cst_112 {dimension_numbers = #tpu.dot_dimension_numbers<[1], [0], [0], [1], [0, 0, 1, 1], [], []>} : vector<8x128xf32>, vector<128x512xf32>, vector<8x512xf32> -> vector<8x512xf32>
    %c0_113 = arith.constant 0 : index
    %c0_114 = arith.constant 0 : index
    %347 = vector.load %arg7[%c0_113, %c0_114] : memref<128x512xf32, #tpu.memory_space<vmem>>, vector<128x512xf32>
    %cst_115 = arith.constant dense<0.000000e+00> : vector<8x512xf32>
    %348 = tpu.matmul %340, %347, %cst_115 {dimension_numbers = #tpu.dot_dimension_numbers<[1], [0], [0], [1], [0, 0, 1, 1], [], []>} : vector<8x128xf32>, vector<128x512xf32>, vector<8x512xf32> -> vector<8x512xf32>
    %349 = arith.index_cast %344 : i32 to index
    %c0_116 = arith.constant 0 : index
    %350 = vector.load %arg14[%349, %c0_116] : memref<64x512xf32, #tpu.memory_space<vmem>>, vector<8x512xf32>
    %351 = arith.addf %350, %346 : vector<8x512xf32>
    %352 = vector.extract_strided_slice %351 {offsets = [0, 0], sizes = [8, 128], strides = [1, 1]} : vector<8x512xf32> to vector<8x128xf32>
    %353 = arith.negf %352 : vector<8x128xf32>
    %354 = math.exp %353 : vector<8x128xf32>
    %cst_117 = arith.constant 1.000000e+00 : f32
    %355 = vector.broadcast %cst_117 : f32 to vector<8x128xf32>
    %356 = arith.addf %355, %354 : vector<8x128xf32>
    %357 = arith.divf %355, %356 : vector<8x128xf32>
    %358 = vector.extract_strided_slice %351 {offsets = [0, 128], sizes = [8, 128], strides = [1, 1]} : vector<8x512xf32> to vector<8x128xf32>
    %359 = arith.negf %358 : vector<8x128xf32>
    %360 = math.exp %359 : vector<8x128xf32>
    %cst_118 = arith.constant 1.000000e+00 : f32
    %361 = vector.broadcast %cst_118 : f32 to vector<8x128xf32>
    %362 = arith.addf %361, %360 : vector<8x128xf32>
    %363 = arith.divf %361, %362 : vector<8x128xf32>
    %364 = vector.extract_strided_slice %351 {offsets = [0, 256], sizes = [8, 128], strides = [1, 1]} : vector<8x512xf32> to vector<8x128xf32>
    %365 = math.tanh %364 : vector<8x128xf32>
    %366 = vector.extract_strided_slice %351 {offsets = [0, 384], sizes = [8, 128], strides = [1, 1]} : vector<8x512xf32> to vector<8x128xf32>
    %367 = arith.negf %366 : vector<8x128xf32>
    %368 = math.exp %367 : vector<8x128xf32>
    %cst_119 = arith.constant 1.000000e+00 : f32
    %369 = vector.broadcast %cst_119 : f32 to vector<8x128xf32>
    %370 = arith.addf %369, %368 : vector<8x128xf32>
    %371 = arith.divf %369, %370 : vector<8x128xf32>
    %372 = arith.mulf %363, %309 : vector<8x128xf32>
    %373 = arith.mulf %357, %365 : vector<8x128xf32>
    %374 = arith.addf %372, %373 : vector<8x128xf32>
    %375 = math.tanh %374 : vector<8x128xf32>
    %376 = arith.mulf %371, %375 : vector<8x128xf32>
    %c0_120 = arith.constant 0 : index
    %c0_121 = arith.constant 0 : index
    %377 = vector.load %arg6[%c0_120, %c0_121] : memref<128x512xf32, #tpu.memory_space<vmem>>, vector<128x512xf32>
    %cst_122 = arith.constant dense<0.000000e+00> : vector<8x512xf32>
    %378 = tpu.matmul %376, %377, %cst_122 {dimension_numbers = #tpu.dot_dimension_numbers<[1], [0], [0], [1], [0, 0, 1, 1], [], []>} : vector<8x128xf32>, vector<128x512xf32>, vector<8x512xf32> -> vector<8x512xf32>
    %379 = arith.addf %378, %348 : vector<8x512xf32>
    %380 = arith.addf %379, %9 : vector<8x512xf32>
    %381 = vector.extract_strided_slice %380 {offsets = [0, 0], sizes = [8, 128], strides = [1, 1]} : vector<8x512xf32> to vector<8x128xf32>
    %382 = arith.negf %381 : vector<8x128xf32>
    %383 = math.exp %382 : vector<8x128xf32>
    %cst_123 = arith.constant 1.000000e+00 : f32
    %384 = vector.broadcast %cst_123 : f32 to vector<8x128xf32>
    %385 = arith.addf %384, %383 : vector<8x128xf32>
    %386 = arith.divf %384, %385 : vector<8x128xf32>
    %387 = vector.extract_strided_slice %380 {offsets = [0, 128], sizes = [8, 128], strides = [1, 1]} : vector<8x512xf32> to vector<8x128xf32>
    %388 = arith.negf %387 : vector<8x128xf32>
    %389 = math.exp %388 : vector<8x128xf32>
    %cst_124 = arith.constant 1.000000e+00 : f32
    %390 = vector.broadcast %cst_124 : f32 to vector<8x128xf32>
    %391 = arith.addf %390, %389 : vector<8x128xf32>
    %392 = arith.divf %390, %391 : vector<8x128xf32>
    %393 = vector.extract_strided_slice %380 {offsets = [0, 256], sizes = [8, 128], strides = [1, 1]} : vector<8x512xf32> to vector<8x128xf32>
    %394 = math.tanh %393 : vector<8x128xf32>
    %395 = vector.extract_strided_slice %380 {offsets = [0, 384], sizes = [8, 128], strides = [1, 1]} : vector<8x512xf32> to vector<8x128xf32>
    %396 = arith.negf %395 : vector<8x128xf32>
    %397 = math.exp %396 : vector<8x128xf32>
    %cst_125 = arith.constant 1.000000e+00 : f32
    %398 = vector.broadcast %cst_125 : f32 to vector<8x128xf32>
    %399 = arith.addf %398, %397 : vector<8x128xf32>
    %400 = arith.divf %398, %399 : vector<8x128xf32>
    %401 = arith.mulf %392, %338 : vector<8x128xf32>
    %402 = arith.mulf %386, %394 : vector<8x128xf32>
    %403 = arith.addf %401, %402 : vector<8x128xf32>
    %404 = math.tanh %403 : vector<8x128xf32>
    %405 = arith.mulf %400, %404 : vector<8x128xf32>
    %406 = arith.index_cast %344 : i32 to index
    %c0_126 = arith.constant 0 : index
    %407 = vector.load %arg15[%406, %c0_126] : memref<64x128xf32, #tpu.memory_space<vmem>>, vector<8x128xf32>
    tpu.vector_store %arg15[%406, %c0_126], %405 {strides = array<i32>} : memref<64x128xf32, #tpu.memory_space<vmem>>, vector<8x128xf32>,
    %c6_i32 = arith.constant 6 : i32
    %c8_i32_127 = arith.constant 8 : i32
    %408 = arith.muli %c6_i32, %c8_i32_127 : i32
    %409 = tpu.assume_multiple %408, 8 : i32
    %c0_128 = arith.constant 0 : index
    %c0_129 = arith.constant 0 : index
    %410 = vector.load %arg4[%c0_128, %c0_129] : memref<128x512xf32, #tpu.memory_space<vmem>>, vector<128x512xf32>
    %cst_130 = arith.constant dense<0.000000e+00> : vector<8x512xf32>
    %411 = tpu.matmul %376, %410, %cst_130 {dimension_numbers = #tpu.dot_dimension_numbers<[1], [0], [0], [1], [0, 0, 1, 1], [], []>} : vector<8x128xf32>, vector<128x512xf32>, vector<8x512xf32> -> vector<8x512xf32>
    %c0_131 = arith.constant 0 : index
    %c0_132 = arith.constant 0 : index
    %412 = vector.load %arg7[%c0_131, %c0_132] : memref<128x512xf32, #tpu.memory_space<vmem>>, vector<128x512xf32>
    %cst_133 = arith.constant dense<0.000000e+00> : vector<8x512xf32>
    %413 = tpu.matmul %405, %412, %cst_133 {dimension_numbers = #tpu.dot_dimension_numbers<[1], [0], [0], [1], [0, 0, 1, 1], [], []>} : vector<8x128xf32>, vector<128x512xf32>, vector<8x512xf32> -> vector<8x512xf32>
    %414 = arith.index_cast %409 : i32 to index
    %c0_134 = arith.constant 0 : index
    %415 = vector.load %arg14[%414, %c0_134] : memref<64x512xf32, #tpu.memory_space<vmem>>, vector<8x512xf32>
    %416 = arith.addf %415, %411 : vector<8x512xf32>
    %417 = vector.extract_strided_slice %416 {offsets = [0, 0], sizes = [8, 128], strides = [1, 1]} : vector<8x512xf32> to vector<8x128xf32>
    %418 = arith.negf %417 : vector<8x128xf32>
    %419 = math.exp %418 : vector<8x128xf32>
    %cst_135 = arith.constant 1.000000e+00 : f32
    %420 = vector.broadcast %cst_135 : f32 to vector<8x128xf32>
    %421 = arith.addf %420, %419 : vector<8x128xf32>
    %422 = arith.divf %420, %421 : vector<8x128xf32>
    %423 = vector.extract_strided_slice %416 {offsets = [0, 128], sizes = [8, 128], strides = [1, 1]} : vector<8x512xf32> to vector<8x128xf32>
    %424 = arith.negf %423 : vector<8x128xf32>
    %425 = math.exp %424 : vector<8x128xf32>
    %cst_136 = arith.constant 1.000000e+00 : f32
    %426 = vector.broadcast %cst_136 : f32 to vector<8x128xf32>
    %427 = arith.addf %426, %425 : vector<8x128xf32>
    %428 = arith.divf %426, %427 : vector<8x128xf32>
    %429 = vector.extract_strided_slice %416 {offsets = [0, 256], sizes = [8, 128], strides = [1, 1]} : vector<8x512xf32> to vector<8x128xf32>
    %430 = math.tanh %429 : vector<8x128xf32>
    %431 = vector.extract_strided_slice %416 {offsets = [0, 384], sizes = [8, 128], strides = [1, 1]} : vector<8x512xf32> to vector<8x128xf32>
    %432 = arith.negf %431 : vector<8x128xf32>
    %433 = math.exp %432 : vector<8x128xf32>
    %cst_137 = arith.constant 1.000000e+00 : f32
    %434 = vector.broadcast %cst_137 : f32 to vector<8x128xf32>
    %435 = arith.addf %434, %433 : vector<8x128xf32>
    %436 = arith.divf %434, %435 : vector<8x128xf32>
    %437 = arith.mulf %428, %374 : vector<8x128xf32>
    %438 = arith.mulf %422, %430 : vector<8x128xf32>
    %439 = arith.addf %437, %438 : vector<8x128xf32>
    %440 = math.tanh %439 : vector<8x128xf32>
    %441 = arith.mulf %436, %440 : vector<8x128xf32>
    %c0_138 = arith.constant 0 : index
    %c0_139 = arith.constant 0 : index
    %442 = vector.load %arg6[%c0_138, %c0_139] : memref<128x512xf32, #tpu.memory_space<vmem>>, vector<128x512xf32>
    %cst_140 = arith.constant dense<0.000000e+00> : vector<8x512xf32>
    %443 = tpu.matmul %441, %442, %cst_140 {dimension_numbers = #tpu.dot_dimension_numbers<[1], [0], [0], [1], [0, 0, 1, 1], [], []>} : vector<8x128xf32>, vector<128x512xf32>, vector<8x512xf32> -> vector<8x512xf32>
    %444 = arith.addf %443, %413 : vector<8x512xf32>
    %445 = arith.addf %444, %9 : vector<8x512xf32>
    %446 = vector.extract_strided_slice %445 {offsets = [0, 0], sizes = [8, 128], strides = [1, 1]} : vector<8x512xf32> to vector<8x128xf32>
    %447 = arith.negf %446 : vector<8x128xf32>
    %448 = math.exp %447 : vector<8x128xf32>
    %cst_141 = arith.constant 1.000000e+00 : f32
    %449 = vector.broadcast %cst_141 : f32 to vector<8x128xf32>
    %450 = arith.addf %449, %448 : vector<8x128xf32>
    %451 = arith.divf %449, %450 : vector<8x128xf32>
    %452 = vector.extract_strided_slice %445 {offsets = [0, 128], sizes = [8, 128], strides = [1, 1]} : vector<8x512xf32> to vector<8x128xf32>
    %453 = arith.negf %452 : vector<8x128xf32>
    %454 = math.exp %453 : vector<8x128xf32>
    %cst_142 = arith.constant 1.000000e+00 : f32
    %455 = vector.broadcast %cst_142 : f32 to vector<8x128xf32>
    %456 = arith.addf %455, %454 : vector<8x128xf32>
    %457 = arith.divf %455, %456 : vector<8x128xf32>
    %458 = vector.extract_strided_slice %445 {offsets = [0, 256], sizes = [8, 128], strides = [1, 1]} : vector<8x512xf32> to vector<8x128xf32>
    %459 = math.tanh %458 : vector<8x128xf32>
    %460 = vector.extract_strided_slice %445 {offsets = [0, 384], sizes = [8, 128], strides = [1, 1]} : vector<8x512xf32> to vector<8x128xf32>
    %461 = arith.negf %460 : vector<8x128xf32>
    %462 = math.exp %461 : vector<8x128xf32>
    %cst_143 = arith.constant 1.000000e+00 : f32
    %463 = vector.broadcast %cst_143 : f32 to vector<8x128xf32>
    %464 = arith.addf %463, %462 : vector<8x128xf32>
    %465 = arith.divf %463, %464 : vector<8x128xf32>
    %466 = arith.mulf %457, %403 : vector<8x128xf32>
    %467 = arith.mulf %451, %459 : vector<8x128xf32>
    %468 = arith.addf %466, %467 : vector<8x128xf32>
    %469 = math.tanh %468 : vector<8x128xf32>
    %470 = arith.mulf %465, %469 : vector<8x128xf32>
    %471 = arith.index_cast %409 : i32 to index
    %c0_144 = arith.constant 0 : index
    %472 = vector.load %arg15[%471, %c0_144] : memref<64x128xf32, #tpu.memory_space<vmem>>, vector<8x128xf32>
    tpu.vector_store %arg15[%471, %c0_144], %470 {strides = array<i32>} : memref<64x128xf32, #tpu.memory_space<vmem>>, vector<8x128xf32>,
    %c7_i32 = arith.constant 7 : i32
    %c8_i32_145 = arith.constant 8 : i32
    %473 = arith.muli %c7_i32, %c8_i32_145 : i32
    %474 = tpu.assume_multiple %473, 8 : i32
    %c0_146 = arith.constant 0 : index
    %c0_147 = arith.constant 0 : index
    %475 = vector.load %arg4[%c0_146, %c0_147] : memref<128x512xf32, #tpu.memory_space<vmem>>, vector<128x512xf32>
    %cst_148 = arith.constant dense<0.000000e+00> : vector<8x512xf32>
    %476 = tpu.matmul %441, %475, %cst_148 {dimension_numbers = #tpu.dot_dimension_numbers<[1], [0], [0], [1], [0, 0, 1, 1], [], []>} : vector<8x128xf32>, vector<128x512xf32>, vector<8x512xf32> -> vector<8x512xf32>
    %c0_149 = arith.constant 0 : index
    %c0_150 = arith.constant 0 : index
    %477 = vector.load %arg7[%c0_149, %c0_150] : memref<128x512xf32, #tpu.memory_space<vmem>>, vector<128x512xf32>
    %cst_151 = arith.constant dense<0.000000e+00> : vector<8x512xf32>
    %478 = tpu.matmul %470, %477, %cst_151 {dimension_numbers = #tpu.dot_dimension_numbers<[1], [0], [0], [1], [0, 0, 1, 1], [], []>} : vector<8x128xf32>, vector<128x512xf32>, vector<8x512xf32> -> vector<8x512xf32>
    %479 = arith.index_cast %474 : i32 to index
    %c0_152 = arith.constant 0 : index
    %480 = vector.load %arg14[%479, %c0_152] : memref<64x512xf32, #tpu.memory_space<vmem>>, vector<8x512xf32>
    %481 = arith.addf %480, %476 : vector<8x512xf32>
    %482 = vector.extract_strided_slice %481 {offsets = [0, 0], sizes = [8, 128], strides = [1, 1]} : vector<8x512xf32> to vector<8x128xf32>
    %483 = arith.negf %482 : vector<8x128xf32>
    %484 = math.exp %483 : vector<8x128xf32>
    %cst_153 = arith.constant 1.000000e+00 : f32
    %485 = vector.broadcast %cst_153 : f32 to vector<8x128xf32>
    %486 = arith.addf %485, %484 : vector<8x128xf32>
    %487 = arith.divf %485, %486 : vector<8x128xf32>
    %488 = vector.extract_strided_slice %481 {offsets = [0, 128], sizes = [8, 128], strides = [1, 1]} : vector<8x512xf32> to vector<8x128xf32>
    %489 = arith.negf %488 : vector<8x128xf32>
    %490 = math.exp %489 : vector<8x128xf32>
    %cst_154 = arith.constant 1.000000e+00 : f32
    %491 = vector.broadcast %cst_154 : f32 to vector<8x128xf32>
    %492 = arith.addf %491, %490 : vector<8x128xf32>
    %493 = arith.divf %491, %492 : vector<8x128xf32>
    %494 = vector.extract_strided_slice %481 {offsets = [0, 256], sizes = [8, 128], strides = [1, 1]} : vector<8x512xf32> to vector<8x128xf32>
    %495 = math.tanh %494 : vector<8x128xf32>
    %496 = vector.extract_strided_slice %481 {offsets = [0, 384], sizes = [8, 128], strides = [1, 1]} : vector<8x512xf32> to vector<8x128xf32>
    %497 = arith.negf %496 : vector<8x128xf32>
    %498 = math.exp %497 : vector<8x128xf32>
    %cst_155 = arith.constant 1.000000e+00 : f32
    %499 = vector.broadcast %cst_155 : f32 to vector<8x128xf32>
    %500 = arith.addf %499, %498 : vector<8x128xf32>
    %501 = arith.divf %499, %500 : vector<8x128xf32>
    %502 = arith.mulf %493, %439 : vector<8x128xf32>
    %503 = arith.mulf %487, %495 : vector<8x128xf32>
    %504 = arith.addf %502, %503 : vector<8x128xf32>
    %505 = math.tanh %504 : vector<8x128xf32>
    %506 = arith.mulf %501, %505 : vector<8x128xf32>
    %c0_156 = arith.constant 0 : index
    %c0_157 = arith.constant 0 : index
    %507 = vector.load %arg6[%c0_156, %c0_157] : memref<128x512xf32, #tpu.memory_space<vmem>>, vector<128x512xf32>
    %cst_158 = arith.constant dense<0.000000e+00> : vector<8x512xf32>
    %508 = tpu.matmul %506, %507, %cst_158 {dimension_numbers = #tpu.dot_dimension_numbers<[1], [0], [0], [1], [0, 0, 1, 1], [], []>} : vector<8x128xf32>, vector<128x512xf32>, vector<8x512xf32> -> vector<8x512xf32>
    %509 = arith.addf %508, %478 : vector<8x512xf32>
    %510 = arith.addf %509, %9 : vector<8x512xf32>
    %511 = vector.extract_strided_slice %510 {offsets = [0, 0], sizes = [8, 128], strides = [1, 1]} : vector<8x512xf32> to vector<8x128xf32>
    %512 = arith.negf %511 : vector<8x128xf32>
    %513 = math.exp %512 : vector<8x128xf32>
    %cst_159 = arith.constant 1.000000e+00 : f32
    %514 = vector.broadcast %cst_159 : f32 to vector<8x128xf32>
    %515 = arith.addf %514, %513 : vector<8x128xf32>
    %516 = arith.divf %514, %515 : vector<8x128xf32>
    %517 = vector.extract_strided_slice %510 {offsets = [0, 128], sizes = [8, 128], strides = [1, 1]} : vector<8x512xf32> to vector<8x128xf32>
    %518 = arith.negf %517 : vector<8x128xf32>
    %519 = math.exp %518 : vector<8x128xf32>
    %cst_160 = arith.constant 1.000000e+00 : f32
    %520 = vector.broadcast %cst_160 : f32 to vector<8x128xf32>
    %521 = arith.addf %520, %519 : vector<8x128xf32>
    %522 = arith.divf %520, %521 : vector<8x128xf32>
    %523 = vector.extract_strided_slice %510 {offsets = [0, 256], sizes = [8, 128], strides = [1, 1]} : vector<8x512xf32> to vector<8x128xf32>
    %524 = math.tanh %523 : vector<8x128xf32>
    %525 = vector.extract_strided_slice %510 {offsets = [0, 384], sizes = [8, 128], strides = [1, 1]} : vector<8x512xf32> to vector<8x128xf32>
    %526 = arith.negf %525 : vector<8x128xf32>
    %527 = math.exp %526 : vector<8x128xf32>
    %cst_161 = arith.constant 1.000000e+00 : f32
    %528 = vector.broadcast %cst_161 : f32 to vector<8x128xf32>
    %529 = arith.addf %528, %527 : vector<8x128xf32>
    %530 = arith.divf %528, %529 : vector<8x128xf32>
    %531 = arith.mulf %522, %468 : vector<8x128xf32>
    %532 = arith.mulf %516, %524 : vector<8x128xf32>
    %533 = arith.addf %531, %532 : vector<8x128xf32>
    %534 = math.tanh %533 : vector<8x128xf32>
    %535 = arith.mulf %530, %534 : vector<8x128xf32>
    %536 = arith.index_cast %474 : i32 to index
    %c0_162 = arith.constant 0 : index
    %537 = vector.load %arg15[%536, %c0_162] : memref<64x128xf32, #tpu.memory_space<vmem>>, vector<8x128xf32>
    tpu.vector_store %arg15[%536, %c0_162], %535 {strides = array<i32>} : memref<64x128xf32, #tpu.memory_space<vmem>>, vector<8x128xf32>,
    %c8_i32_163 = arith.constant 8 : i32
    %c0_164 = arith.constant 0 : index
    %c0_165 = arith.constant 0 : index
    %c0_166 = arith.constant 0 : index
    %538 = vector.load %arg12[%c0_164, %c0_165, %c0_166] : memref<2x8x128xf32, #tpu.memory_space<vmem>>, vector<1x8x128xf32>
    %539 = vector.shape_cast %538 : vector<1x8x128xf32> to vector<8x128xf32>
    %540 = vector.shape_cast %506 : vector<8x128xf32> to vector<1x8x128xf32>
    tpu.vector_store %arg12[%c0_164, %c0_165, %c0_166], %540 {strides = array<i32>} : memref<2x8x128xf32, #tpu.memory_space<vmem>>, vector<1x8x128xf32>,
    %c1_167 = arith.constant 1 : index
    %c0_168 = arith.constant 0 : index
    %c0_169 = arith.constant 0 : index
    %541 = vector.load %arg12[%c1_167, %c0_168, %c0_169] : memref<2x8x128xf32, #tpu.memory_space<vmem>>, vector<1x8x128xf32>
    %542 = vector.shape_cast %541 : vector<1x8x128xf32> to vector<8x128xf32>
    %543 = vector.shape_cast %535 : vector<8x128xf32> to vector<1x8x128xf32>
    tpu.vector_store %arg12[%c1_167, %c0_168, %c0_169], %543 {strides = array<i32>} : memref<2x8x128xf32, #tpu.memory_space<vmem>>, vector<1x8x128xf32>,
    %c0_170 = arith.constant 0 : index
    %c0_171 = arith.constant 0 : index
    %c0_172 = arith.constant 0 : index
    %544 = vector.load %arg13[%c0_170, %c0_171, %c0_172] : memref<2x8x128xf32, #tpu.memory_space<vmem>>, vector<1x8x128xf32>
    %545 = vector.shape_cast %544 : vector<1x8x128xf32> to vector<8x128xf32>
    %546 = vector.shape_cast %504 : vector<8x128xf32> to vector<1x8x128xf32>
    tpu.vector_store %arg13[%c0_170, %c0_171, %c0_172], %546 {strides = array<i32>} : memref<2x8x128xf32, #tpu.memory_space<vmem>>, vector<1x8x128xf32>,
    %c1_173 = arith.constant 1 : index
    %c0_174 = arith.constant 0 : index
    %c0_175 = arith.constant 0 : index
    %547 = vector.load %arg13[%c1_173, %c0_174, %c0_175] : memref<2x8x128xf32, #tpu.memory_space<vmem>>, vector<1x8x128xf32>
    %548 = vector.shape_cast %547 : vector<1x8x128xf32> to vector<8x128xf32>
    %549 = vector.shape_cast %533 : vector<8x128xf32> to vector<1x8x128xf32>
    tpu.vector_store %arg13[%c1_173, %c0_174, %c0_175], %549 {strides = array<i32>} : memref<2x8x128xf32, #tpu.memory_space<vmem>>, vector<1x8x128xf32>,
    %c0_176 = arith.constant 0 : index
    %c0_177 = arith.constant 0 : index
    %550 = vector.load %arg15[%c0_176, %c0_177] : memref<64x128xf32, #tpu.memory_space<vmem>>, vector<64x128xf32>
    %c0_178 = arith.constant 0 : index
    %c0_179 = arith.constant 0 : index
    %551 = vector.load %arg9[%c0_178, %c0_179] : memref<128x3xf32, #tpu.memory_space<vmem>>, vector<128x3xf32>
    %cst_180 = arith.constant dense<0.000000e+00> : vector<64x3xf32>
    %552 = tpu.matmul %550, %551, %cst_180 {dimension_numbers = #tpu.dot_dimension_numbers<[1], [0], [0], [1], [0, 0, 1, 1], [], []>} : vector<64x128xf32>, vector<128x3xf32>, vector<64x3xf32> -> vector<64x3xf32>
    %c0_181 = arith.constant 0 : index
    %c0_182 = arith.constant 0 : index
    %553 = vector.load %arg10[%c0_181, %c0_182] : memref<1x3xf32, #tpu.memory_space<vmem>>, vector<1x3xf32>
    %554 = vector.broadcast %553 : vector<1x3xf32> to vector<64x3xf32>
    %555 = arith.addf %552, %554 : vector<64x3xf32>
    %c0_183 = arith.constant 0 : index
    %c0_184 = arith.constant 0 : index
    %556 = vector.load %arg11[%c0_183, %c0_184] : memref<64x3xf32, #tpu.memory_space<vmem>>, vector<64x3xf32>
    tpu.vector_store %arg11[%c0_183, %c0_184], %555 {strides = array<i32>} : memref<64x3xf32, #tpu.memory_space<vmem>>, vector<64x3xf32>,
    return
  }
}

</mosaic_0001>

<bundles_post_ra>
// kernel: tpu_custom_call.1
= control target key start
LH: loop header
LB: loop body
LE: loop exit
PB: predicated region body
PF: predicated region fallthrough
CT: control target
= control target key end

     0   :  { %19 = vsyncpa [#allocation5], 0  ;;  %s10414_s0 = inlined_call_operand.vmem [shape: f32[64,3], index: 0, kind: input, shape index: {}]   ;;  %s10415_s1 = inlined_call_operand.vmem [shape: f32[2,8,128], index: 1, kind: input, shape index: {}]   ;;  %s10416_s2 = inlined_call_operand.vmem [shape: f32[2,8,128], index: 2, kind: input, shape index: {}]   ;;  %s10417_s3 = inlined_call_operand.vmem [shape: f32[3,512], index: 3, kind: input, shape index: {}]   ;;  %s10418_s4 = inlined_call_operand.hbm [shape: f32[128,512], index: 4, kind: input, shape index: {}]   ;;  %s10419_s5 = inlined_call_operand.vmem [shape: f32[1,512], index: 5, kind: input, shape index: {}]   ;;  %s10420_s6 = inlined_call_operand.hbm [shape: f32[128,512], index: 6, kind: input, shape index: {}]   ;;  %s10421_s7 = inlined_call_operand.hbm [shape: f32[128,512], index: 7, kind: input, shape index: {}]   ;;  %s10422_s8 = inlined_call_operand.vmem [shape: f32[1,512], index: 8, kind: input, shape index: {}]   ;;  %s10423_s9 = inlined_call_operand.vmem [shape: f32[128,3], index: 9, kind: input, shape index: {}]   ;;  %s10424_s10 = inlined_call_operand.vmem [shape: f32[1,3], index: 10, kind: input, shape index: {}]   ;;  %s10425_s11 = inlined_call_operand.vmem [shape: f32[64,3], index: 11, kind: output, shape index: {0}]   ;;  %s10426_s12 = inlined_call_operand.hbm [shape: f32[2,8,128], index: 12, kind: output, shape index: {1}]   ;;  %s10427_s13 = inlined_call_operand.hbm [shape: f32[2,8,128], index: 13, kind: output, shape index: {2}]  }
   0x1   :  { %20 = vsyncpa [#allocation8], 0 }
   0x2   :  { %21 = vsyncpa [#allocation6], 0 }
   0x3   :  { %22 = vsyncpa [#allocation12], 0  ;;  %s8287_s25 = smov [#allocation7]   ;;  %s8288_s27 = smov [#allocation4]  }
   0x4   :  { %s50_s26 = sshll.u32 %s8287_s25, 4  ;;  %s36_s28 = sshll.u32 %s8288_s27, 4  ;;  %s51_s26 = int_to_ptr.vmem [resolvable:$true] %s50_s26  ;;  %s8367_s28 = int_to_ptr.vmem [resolvable:$true] %s36_s28 }
   0x5   :  { %s8169_s14 = scalar_lea.hbm %s10420_s6, 8192 }
   0x6   :  { %p8170_p0 = scmp.ne.s32.totalorder %s10420_s6, %s8169_s14  ;;  %p8173_p1 = scmp.lt.u32.totalorder %s8169_s14, %s10420_s6 }
   0x8   :  { %p8175_p2 = pnand %p8173_p1, %p8170_p0 }
   0xa   :  { %8178 = shalt.err (!%p8175_p2)
}
   0xb   :  { %s8179_s19 = scalar_lea.vmem %s51_s26, 8192  ;;  %p8184_p4 = scmp.lt.s32.totalorder %s51_s26, %s51_s26 }
   0xc   :  { %p8180_p3 = scmp.ne.s32.totalorder %s51_s26, %s8179_s19  ;;  %p8185_p5 = scmp.lt.s32.totalorder %s8179_s19, %s8179_s19 }
   0xe   :  { %p8186_p6 = por %p8185_p5, %p8184_p4 }
  0x10   :  { %p8187_p7 = pnand %p8186_p6, %p8180_p3 }
  0x12   :  { %8190 = shalt.err (!%p8187_p7)
}
  0x13   :  { %s8289_s20 = smov 512   ;;  %s8290_s21 = smov 32  }
  0x14   :  { %56 = dma.hbm_to_vmem [thread:$0]  %s10420_s6, 8192, %s51_s26, [#allocation8], %s8289_s20, %s8289_s20, %s8290_s21  }
  0x15   :  { %s8191_s27 = scalar_lea.hbm %s10418_s4, 8192 }
  0x16   :  { %p8192_p8 = scmp.ne.s32.totalorder %s10418_s4, %s8191_s27  ;;  %p8195_p9 = scmp.lt.u32.totalorder %s8191_s27, %s10418_s4 }
  0x18   :  { %p8197_p10 = pnand %p8195_p9, %p8192_p8 }
  0x1a   :  { %8200 = shalt.err (!%p8197_p10)
}
  0x1b   :  { %s8201_s16 = scalar_lea.vmem %s8367_s28, 8192  ;;  %p8206_p12 = scmp.lt.s32.totalorder %s8367_s28, %s8367_s28 }
  0x1c   :  { %p8202_p11 = scmp.ne.s32.totalorder %s8367_s28, %s8201_s16  ;;  %p8207_p13 = scmp.lt.s32.totalorder %s8201_s16, %s8201_s16 }
  0x1e   :  { %p8208_p0 = por %p8207_p13, %p8206_p12 }
  0x20   :  { %p8209_p1 = pnand %p8208_p0, %p8202_p11 }
  0x22   :  { %8212 = shalt.err (!%p8209_p1)
}
  0x23   :  { %42 = dma.hbm_to_vmem [thread:$0]  %s10418_s4, 8192, %s8367_s28, [#allocation5], %s8289_s20, %s8289_s20, %s8290_s21  }
  0x24   :  { %s8291_s17 = smov [#allocation9]   ;;  %s8213_s23 = scalar_lea.hbm %s10421_s7, 8192 }
  0x25   :  { %s62_s18 = sshll.u32 %s8291_s17, 4  ;;  %p8214_p2 = scmp.ne.s32.totalorder %s10421_s7, %s8213_s23  ;;  %s63_s18 = int_to_ptr.vmem [resolvable:$true] %s62_s18 }
  0x26   :  { %p8217_p3 = scmp.lt.u32.totalorder %s8213_s23, %s10421_s7 }
  0x28   :  { %p8219_p4 = pnand %p8217_p3, %p8214_p2 }
  0x2a   :  { %8222 = shalt.err (!%p8219_p4)
}
  0x2b   :  { %s8223_s30 = scalar_lea.vmem %s63_s18, 8192  ;;  %p8228_p6 = scmp.lt.s32.totalorder %s63_s18, %s63_s18 }
  0x2c   :  { %p8224_p5 = scmp.ne.s32.totalorder %s63_s18, %s8223_s30  ;;  %p8229_p7 = scmp.lt.s32.totalorder %s8223_s30, %s8223_s30 }
  0x2e   :  { %p8230_p8 = por %p8229_p7, %p8228_p6 }
  0x30   :  { %p8231_p9 = pnand %p8230_p8, %p8224_p5 }
  0x32   :  { %8234 = shalt.err (!%p8231_p9)
}
  0x33   :  { %68 = dma.hbm_to_vmem [thread:$0]  %s10421_s7, 8192, %s63_s18, [#allocation8], %s8289_s20, %s8289_s20, %s8290_s21  }
  0x34   :  { %8279 = dma.done.wait [#allocation5], 8192  }
  0x35   :  { %8280 = vsyncadd [#allocation5], 4294959104 }
  0x36   :  { %8281 = dma.done.wait [#allocation8], 16384  }
  0x37   :  { %8282 = vsyncadd [#allocation8], 4294950912  ;;  %v10428_v0 = vmov 0.0   ;;  %v93_v1 = vld [vmem:[%s10417_s3 + $0x8] sm:$0x77]  ;;  %vm145_vm0 = vcmask 1042432  }
  0x38   :  { %331 = vmatprep.mubr.f32.mxu1 %v10428_v0  ;;  %218 = vmatprep.mubr.f32.mxu0 %v10428_v0  ;;  %v441_v2 = vld [vmem:[#allocation4 + $0x8] sm:$0xff]  ;;  %v119_v3 = vcombine.high %v93_v1, %v93_v1  ;;  %v440_v5 = vld [vmem:[#allocation4] sm:$0xff]  ;;  %vm120_vm1 = vcmask 23552   ;;  %v86_v24 = vld [vmem:[%s10414_s0 + $0x10] sm:$0xff] }
  0x39   :  { %v445_v4 = vld [vmem:[#allocation4 + $0x28] sm:$0xff]  ;;  %v444_v6 = vld [vmem:[#allocation4 + $0x20] sm:$0xff]  ;;  %v87_v33 = vld [vmem:[%s10414_s0 + $0x18] sm:$0xff] }
  0x3a   :  { %v84_v7 = vld [vmem:[%s10414_s0] sm:$0xff]  ;;  %v8427_v8 = vpack.c.bf16 %v445_v4, %v441_v2  ;;  %v8429_v9 = vpack.c.bf16 %v444_v6, %v440_v5  ;;  %v449_v10 = vld [vmem:[#allocation4 + $0x48] sm:$0xff]  ;;  %6108 = vmatprep.subr.msk.mxu1 %vm145_vm0, %v119_v3  ;;  %v90_v54 = vld [vmem:[%s10414_s0 + $0x30] sm:$0xff] }
  0x3b   :  { %v453_v11 = vld [vmem:[#allocation4 + $0x68] sm:$0xff]  ;;  %v448_v13 = vld [vmem:[#allocation4 + $0x40] sm:$0xff]  ;;  %6109 = vmatpush1.msk.msra.mxu1 %vm145_vm0, %v93_v1  ;;  %v443_v59 = vld [vmem:[#allocation4 + $0x18] sm:$0xff] }
  0x3c   :  { %v8432_v12 = vpack.c.bf16 %v453_v11, %v449_v10  ;;  %v452_v14 = vld [vmem:[#allocation4 + $0x60] sm:$0xff]  ;;  %v457_v15 = vld [vmem:[#allocation4 + $0x88] sm:$0xff]  ;;  %6110 = vmatmul.mubr.msk.f32.vlgmr.msra.gmra.mrb[0].mxu1 %vm120_vm1, %v84_v7  ;;  %6238 = vmatprep.subr.bf16.mxu1 %v8427_v8  ;;  %v447_v60 = vld [vmem:[#allocation4 + $0x38] sm:$0xff] }
  0x3d   :  { %v461_v16 = vld [vmem:[#allocation4 + $0xa8] sm:$0xff]  ;;  %6240 = vmatpush1.bf16.msra.mxu1 %v8429_v9  ;;  %337 = vmatprep.mubr.f32.mxu1 %v10428_v0  ;;  %v8442_v18 = vpack.c.bf16 %v452_v14, %v448_v13  ;;  %v456_v20 = vld [vmem:[#allocation4 + $0x80] sm:$0xff]  ;;  %v91_v61 = vld [vmem:[%s10414_s0 + $0x38] sm:$0xff]  ;;  %v8515_v63 = vpack.c.bf16 %v447_v60, %v443_v59 }
  0x3e   :  { %v85_v17 = vld [vmem:[%s10414_s0 + $0x8] sm:$0xff]  ;;  %6242 = vmatprep.subr.bf16.mxu1 %v8432_v12  ;;  %v8445_v19 = vpack.c.bf16 %v461_v16, %v457_v15  ;;  %v460_v21 = vld [vmem:[#allocation4 + $0xa0] sm:$0xff]  ;;  %v442_v1 = vld [vmem:[#allocation4 + $0x10] sm:$0xff] }
  0x3f   :  { %v465_v22 = vld [vmem:[#allocation4 + $0xc8] sm:$0xff]  ;;  %v8453_v25 = vpack.c.bf16 %v460_v21, %v456_v20  ;;  %v464_v27 = vld [vmem:[#allocation4 + $0xc0] sm:$0xff]  ;;  %v446_v2 = vld [vmem:[#allocation4 + $0x30] sm:$0xff] }
  0x40   :  { %v469_v23 = vld [vmem:[#allocation4 + $0xe8] sm:$0xff]  ;;  %6111 = vmatmul.mubr.msk.f32.gmra.mrb[2].mxu1 %vm120_vm1, %v85_v17  ;;  %v468_v28 = vld [vmem:[#allocation4 + $0xe0] sm:$0xff]  ;;  %v451_v3 = vld [vmem:[#allocation4 + $0x58] sm:$0xff]  ;;  %v8526_v6 = vpack.c.bf16 %v446_v2, %v442_v1 }
  0x41   :  { %6244 = vmatpush1.bf16.msra.mxu1 %v8442_v18  ;;  %343 = vmatprep.mubr.f32.mxu1 %v10428_v0  ;;  %v8456_v26 = vpack.c.bf16 %v469_v23, %v465_v22  ;;  %v473_v29 = vld [vmem:[#allocation4 + $0x108] sm:$0xff]  ;;  %v92_v31 = vld [vmem:[%s10417_s3] sm:$0x77]  ;;  %v8467_v34 = vpack.c.bf16 %v468_v28, %v464_v27  ;;  %v455_v4 = vld [vmem:[#allocation4 + $0x78] sm:$0xff] }
  0x42   :  { %6246 = vmatprep.subr.bf16.mxu1 %v8445_v19  ;;  %v477_v30 = vld [vmem:[#allocation4 + $0x128] sm:$0xff]  ;;  %v118_v32 = vcombine.high %v92_v31, %v92_v31  ;;  %v472_v36 = vld [vmem:[#allocation4 + $0x100] sm:$0xff]  ;;  %v450_v10 = vld [vmem:[#allocation4 + $0x50] sm:$0xff] }
  0x43   :  { %v8470_v35 = vpack.c.bf16 %v477_v30, %v473_v29  ;;  %v476_v37 = vld [vmem:[#allocation4 + $0x120] sm:$0xff]  ;;  %v481_v38 = vld [vmem:[#allocation4 + $0x148] sm:$0xff]  ;;  %v454_v11 = vld [vmem:[#allocation4 + $0x70] sm:$0xff] }
  0x44   :  { %6112 = vmatmul.mubr.msk.f32.gmra.mrb[4].mxu1 %vm120_vm1, %v86_v24  ;;  %6098 = vmatprep.subr.msk.mxu0 %vm145_vm0, %v118_v32  ;;  %v485_v39 = vld [vmem:[#allocation4 + $0x168] sm:$0xff]  ;;  %v88_v40 = vld [vmem:[%s10414_s0 + $0x20] sm:$0xff]  ;;  %v8481_v41 = vpack.c.bf16 %v476_v37, %v472_v36  ;;  %v459_v13 = vld [vmem:[#allocation4 + $0x98] sm:$0xff]  ;;  %v8535_v15 = vpack.c.bf16 %v454_v11, %v450_v10 }
  0x45   :  { %6248 = vmatpush1.bf16.msra.mxu1 %v8453_v25  ;;  %349 = vmatprep.mubr.f32.mxu1 %v10428_v0  ;;  %v8484_v42 = vpack.c.bf16 %v485_v39, %v481_v38  ;;  %v480_v43 = vld [vmem:[#allocation4 + $0x140] sm:$0xff]  ;;  %v489_v45 = vld [vmem:[#allocation4 + $0x188] sm:$0xff]  ;;  %v463_v14 = vld [vmem:[#allocation4 + $0xb8] sm:$0xff] }
  0x46   :  { %6250 = vmatprep.subr.bf16.mxu1 %v8456_v26  ;;  %6099 = vmatpush1.msk.msra.mxu0 %vm145_vm0, %v92_v31  ;;  %v484_v44 = vld [vmem:[#allocation4 + $0x160] sm:$0xff]  ;;  %v493_v46 = vld [vmem:[#allocation4 + $0x1a8] sm:$0xff]  ;;  %v8539_v16 = vpack.c.bf16 %v463_v14, %v459_v13  ;;  %v462_v20 = vld [vmem:[#allocation4 + $0xb0] sm:$0xff] }
  0x47   :  { %6100 = vmatmul.mubr.msk.f32.vlgmr.msra.gmra.mrb[0].mxu0 %vm120_vm1, %v84_v7  ;;  %v89_v47 = vld [vmem:[%s10414_s0 + $0x28] sm:$0xff]  ;;  %v8494_v48 = vpack.c.bf16 %v484_v44, %v480_v43  ;;  %v8497_v49 = vpack.c.bf16 %v493_v46, %v489_v45  ;;  %v488_v50 = vld [vmem:[#allocation4 + $0x180] sm:$0xff]  ;;  %v8529_v7 = vpack.c.bf16 %v455_v4, %v451_v3  ;;  %v467_v21 = vld [vmem:[#allocation4 + $0xd8] sm:$0xff] }
  0x48   :  { %6113 = vmatmul.mubr.msk.f32.gmra.mrb[6].mxu1 %vm120_vm1, %v87_v33  ;;  %224 = vmatprep.mubr.f32.mxu0 %v10428_v0  ;;  %v492_v51 = vld [vmem:[#allocation4 + $0x1a0] sm:$0xff]  ;;  %v497_v52 = vld [vmem:[#allocation4 + $0x1c8] sm:$0xff]  ;;  %v471_v22 = vld [vmem:[#allocation4 + $0xf8] sm:$0xff] }
  0x49   :  { %6252 = vmatpush1.bf16.msra.mxu1 %v8467_v34  ;;  %355 = vmatprep.mubr.f32.mxu1 %v10428_v0  ;;  %v501_v53 = vld [vmem:[#allocation4 + $0x1e8] sm:$0xff]  ;;  %v6263_v55 = vpack.c.bf16 %v492_v51, %v488_v50  ;;  %v496_v57 = vld [vmem:[#allocation4 + $0x1c0] sm:$0xff]  ;;  %v466_v27 = vld [vmem:[#allocation4 + $0xd0] sm:$0xff] }
  0x4a   :  { %6254 = vmatprep.subr.bf16.mxu1 %v8470_v35  ;;  %v6265_v56 = vpack.c.bf16 %v501_v53, %v497_v52  ;;  %v500_v58 = vld [vmem:[#allocation4 + $0x1e0] sm:$0xff]  ;;  %v470_v28 = vld [vmem:[#allocation4 + $0xf0] sm:$0xff]  ;;  %v475_v29 = vld [vmem:[#allocation4 + $0x118] sm:$0xff] }
  0x4b   :  { %6101 = vmatmul.mubr.msk.f32.gmra.mrb[2].mxu0 %vm120_vm1, %v85_v17  ;;  %v6267_v62 = vpack.c.bf16 %v500_v58, %v496_v57  ;;  %v8524_v5 = vld [vmem:[%s10415_s1] sm:$0xff]  ;;  %v458_v17 = vld [vmem:[#allocation4 + $0x90] sm:$0xff]  ;;  %v479_v30 = vld [vmem:[#allocation4 + $0x138] sm:$0xff]  ;;  %v8552_v31 = vpack.c.bf16 %v470_v28, %v466_v27 }
  0x4c   :  { %6114 = vmatmul.mubr.msk.f32.gmra.mrb[8].mxu1 %vm120_vm1, %v88_v40  ;;  %230 = vmatprep.mubr.f32.mxu0 %v10428_v0  ;;  %v8544_v23 = vpack.c.bf16 %v462_v20, %v458_v17  ;;  %v8556_v32 = vpack.c.bf16 %v479_v30, %v475_v29  ;;  %v478_v36 = vld [vmem:[#allocation4 + $0x130] sm:$0xff]  ;;  %v483_v37 = vld [vmem:[#allocation4 + $0x158] sm:$0xff]  ;;  %v647_v60 = vld [vmem:[#allocation9 + $0x8] sm:$0xff] }
  0x4d   :  { %6256 = vmatpush1.bf16.msra.mxu1 %v8481_v41  ;;  %361 = vmatprep.mubr.f32.mxu1 %v10428_v0  ;;  %v487_v38 = vld [vmem:[#allocation4 + $0x178] sm:$0xff]  ;;  %v482_v43 = vld [vmem:[#allocation4 + $0x150] sm:$0xff]  ;;  %v646_v4 = vld [vmem:[#allocation9] sm:$0xff] }
  0x4e   :  { %6258 = vmatprep.subr.bf16.mxu1 %v8484_v42  ;;  %v486_v44 = vld [vmem:[#allocation4 + $0x170] sm:$0xff]  ;;  %v491_v45 = vld [vmem:[#allocation4 + $0x198] sm:$0xff]  ;;  %v650_v10 = vld [vmem:[#allocation9 + $0x20] sm:$0xff] }
  0x4f   :  { %6102 = vmatmul.mubr.msk.f32.gmra.mrb[4].mxu0 %vm120_vm1, %v86_v24  ;;  %v8548_v24 = vpack.c.bf16 %v471_v22, %v467_v21  ;;  %v495_v46 = vld [vmem:[#allocation4 + $0x1b8] sm:$0xff]  ;;  %v490_v51 = vld [vmem:[#allocation4 + $0x190] sm:$0xff]  ;;  %v8589_v13 = vpack.c.bf16 %v650_v10, %v646_v4  ;;  %v655_v17 = vld [vmem:[#allocation9 + $0x48] sm:$0xff] }
  0x50   :  { %6115 = vmatmul.mubr.msk.f32.gmra.mrb[10].mxu1 %vm120_vm1, %v89_v47  ;;  %236 = vmatprep.mubr.f32.mxu0 %v10428_v0  ;;  %v8568_v50 = vpack.c.bf16 %v495_v46, %v491_v45  ;;  %v494_v52 = vld [vmem:[#allocation4 + $0x1b0] sm:$0xff]  ;;  %v499_v53 = vld [vmem:[#allocation4 + $0x1d8] sm:$0xff]  ;;  %v659_v20 = vld [vmem:[#allocation9 + $0x68] sm:$0xff] }
  0x51   :  { %6260 = vmatpush1.bf16.msra.mxu1 %v8494_v48  ;;  %367 = vmatprep.mubr.f32.mxu1 %v10428_v0  ;;  %v498_v57 = vld [vmem:[#allocation4 + $0x1d0] sm:$0xff]  ;;  %v653_v2 = vld [vmem:[#allocation9 + $0x38] sm:$0xff]  ;;  %v8595_v22 = vpack.c.bf16 %v659_v20, %v655_v17  ;;  %v654_v28 = vld [vmem:[#allocation9 + $0x40] sm:$0xff] }
  0x52   :  { %6262 = vmatprep.subr.bf16.mxu1 %v8497_v49  ;;  %v502_v58 = vld [vmem:[#allocation4 + $0x1f0] sm:$0xff]  ;;  %v657_v21 = vld [vmem:[#allocation9 + $0x58] sm:$0xff]  ;;  %v658_v29 = vld [vmem:[#allocation9 + $0x60] sm:$0xff] }
  0x53   :  { %6103 = vmatmul.mubr.msk.f32.gmra.mrb[6].mxu0 %vm120_vm1, %v87_v33  ;;  %v474_v33 = vld [vmem:[#allocation4 + $0x110] sm:$0xff]  ;;  %v8577_v59 = vpack.c.bf16 %v502_v58, %v498_v57  ;;  %v661_v27 = vld [vmem:[#allocation9 + $0x78] sm:$0xff]  ;;  %v674_v17 = vld [vmem:[#allocation9 + $0xe0] sm:$0xff] }
  0x54   :  { %6116 = vmatmul.mubr.msk.f32.gmra.mrb[12].mxu1 %vm120_vm1, %v90_v54  ;;  %242 = vmatprep.mubr.f32.mxu0 %v10428_v0  ;;  %v8559_v39 = vpack.c.bf16 %v478_v36, %v474_v33  ;;  %v648_v11 = vld [vmem:[#allocation9 + $0x10] sm:$0xff]  ;;  %v8597_v30 = vpack.c.bf16 %v661_v27, %v657_v21  ;;  %v8599_v33 = vpack.c.bf16 %v658_v29, %v654_v28  ;;  %v665_v45 = vld [vmem:[#allocation9 + $0x98] sm:$0xff] }
  0x55   :  { %6264 = vmatpush1.bf16.msra.mxu1 %v6263_v55  ;;  %373 = vmatprep.mubr.f32.mxu1 %v10428_v0  ;;  %v8571_v55 = vpack.c.bf16 %v494_v52, %v490_v51  ;;  %v656_v36 = vld [vmem:[#allocation9 + $0x50] sm:$0xff]  ;;  %v669_v51 = vld [vmem:[#allocation9 + $0xb8] sm:$0xff]  ;;  %v662_v52 = vld [vmem:[#allocation9 + $0x80] sm:$0xff] }
  0x56   :  { %6266 = vmatprep.subr.bf16.mxu1 %v6265_v56  ;;  %v664_v58 = vld [vmem:[#allocation9 + $0x90] sm:$0xff]  ;;  %v673_v4 = vld [vmem:[#allocation9 + $0xd8] sm:$0xff] }
  0x57   :  { %6104 = vmatmul.mubr.msk.f32.gmra.mrb[8].mxu0 %vm120_vm1, %v88_v40  ;;  %v8562_v40 = vpack.c.bf16 %v487_v38, %v483_v37  ;;  %v660_v37 = vld [vmem:[#allocation9 + $0x70] sm:$0xff] }
  0x58   :  { %6117 = vmatmul.mubr.msk.f32.gmra.mrb[14].mxu1 %vm120_vm1, %v91_v61  ;;  %248 = vmatprep.mubr.f32.mxu0 %v10428_v0  ;;  %v8602_v38 = vpack.c.bf16 %v660_v37, %v656_v36  ;;  %v672_v27 = vld [vmem:[#allocation9 + $0xd0] sm:$0xff]  ;;  %v679_v36 = vld [vmem:[#allocation9 + $0x108] sm:$0xff] }
  0x59   :  { %6268 = vmatpush1.bf16.msra.mxu1 %v6267_v62  ;;  %568 = vmatprep.mubr.f32.mxu1 %v10428_v0  ;;  %v649_v62 = vld [vmem:[#allocation9 + $0x18] sm:$0xff]  ;;  %v676_v28 = vld [vmem:[#allocation9 + $0xf0] sm:$0xff]  ;;  %v683_v37 = vld [vmem:[#allocation9 + $0x128] sm:$0xff] }
  0x5a   :  { %6270 = vmatprep.subr.bf16.mxu1 %v8515_v63  ;;  %v8585_v3 = vpack.c.bf16 %v653_v2, %v649_v62  ;;  %v671_v62 = vld [vmem:[#allocation9 + $0xc8] sm:$0xff]  ;;  %v8626_v29 = vpack.c.bf16 %v676_v28, %v672_v27  ;;  %v693_v27 = vld [vmem:[#allocation9 + $0x178] sm:$0xff]  ;;  %v686_v28 = vld [vmem:[#allocation9 + $0x140] sm:$0xff] }
  0x5b   :  { %6105 = vmatmul.mubr.msk.f32.gmra.mrb[10].mxu0 %vm120_vm1, %v89_v47  ;;  %v8565_v47 = vpack.c.bf16 %v486_v44, %v482_v43  ;;  %v663_v43 = vld [vmem:[#allocation9 + $0x88] sm:$0xff] }
  0x5c   :  { %569 = vmatmul.mubr.f32.vlgmr.msra.gmra.mrb[16].mxu1 %v8524_v5  ;;  %254 = vmatprep.mubr.f32.mxu0 %v10428_v0  ;;  %v667_v44 = vld [vmem:[#allocation9 + $0xa8] sm:$0xff] }
  0x5d   :  { %6272 = vmatpush1.bf16.msra.mxu1 %v8526_v6  ;;  %639 = vmatprep.mubr.f32.mxu1 %v10428_v0  ;;  %v8607_v46 = vpack.c.bf16 %v667_v44, %v663_v43  ;;  %v675_v2 = vld [vmem:[#allocation9 + $0xe8] sm:$0xff]  ;;  %v681_v43 = vld [vmem:[#allocation9 + $0x118] sm:$0xff]  ;;  %v8631_v44 = vpack.c.bf16 %v683_v37, %v679_v36  ;;  %v690_v36 = vld [vmem:[#allocation9 + $0x160] sm:$0xff] }
  0x5e   :  { %6274 = vmatprep.subr.bf16.mxu1 %v8529_v7  ;;  %v8619_v10 = vpack.c.bf16 %v675_v2, %v671_v62  ;;  %v684_v62 = vld [vmem:[#allocation9 + $0x130] sm:$0xff] }
  0x5f   :  { %6106 = vmatmul.mubr.msk.f32.gmra.mrb[12].mxu0 %vm120_vm1, %v90_v54  ;;  %v503_v54 = vld [vmem:[#allocation4 + $0x1f8] sm:$0xff] }
  0x60   :  { %260 = vmatprep.mubr.f32.mxu0 %v10428_v0  ;;  %v8574_v56 = vpack.c.bf16 %v503_v54, %v499_v53  ;;  %v666_v53 = vld [vmem:[#allocation9 + $0xa0] sm:$0xff]  ;;  %v8609_v54 = vpack.c.bf16 %v669_v51, %v665_v45  ;;  %v685_v45 = vld [vmem:[#allocation9 + $0x138] sm:$0xff] }
  0x61   :  { %6276 = vmatpush1.bf16.msra.mxu1 %v8535_v15  ;;  %v8611_v57 = vpack.c.bf16 %v666_v53, %v662_v52  ;;  %v678_v51 = vld [vmem:[#allocation9 + $0x100] sm:$0xff]  ;;  %v8633_v53 = vpack.c.bf16 %v685_v45, %v681_v43  ;;  %v8647_v43 = vpack.c.bf16 %v690_v36, %v686_v28  ;;  %v688_v45 = vld [vmem:[#allocation9 + $0x150] sm:$0xff] }
  0x62   :  { %6278 = vmatprep.subr.bf16.mxu1 %v8539_v16  ;;  %v682_v52 = vld [vmem:[#allocation9 + $0x120] sm:$0xff] }
  0x63   :  { %6107 = vmatmul.mubr.msk.f32.gmra.mrb[14].mxu0 %vm120_vm1, %v91_v61  ;;  %v651_v61 = vld [vmem:[#allocation9 + $0x28] sm:$0xff]  ;;  %10644 = vst [vmem:[#allocation17_spill] sm:$0xff] %v8633_v53  ;;  %10649 = vst [vmem:[#allocation22_spill] sm:$0xff] %v8647_v43  ;;  %v698_v28 = vld [vmem:[#allocation9 + $0x1a0] sm:$0xff] }
  0x64   :  { %774 = vmatprep.mubr.f32.mxu0 %v10428_v0  ;;  %v8583_v1 = vpack.c.bf16 %v651_v61, %v647_v60  ;;  %v668_v60 = vld [vmem:[#allocation9 + $0xb0] sm:$0xff] }
  0x65   :  { %6280 = vmatpush1.bf16.msra.mxu1 %v8544_v23  ;;  %v8614_v61 = vpack.c.bf16 %v668_v60, %v664_v58  ;;  %v8635_v58 = vpack.c.bf16 %v682_v52, %v678_v51  ;;  %v680_v60 = vld [vmem:[#allocation9 + $0x110] sm:$0xff] }
  0x66   :  { %6282 = vmatprep.subr.bf16.mxu1 %v8548_v24  ;;  %6302 = vmatprep.subr.bf16.mxu0 %v8583_v1  ;;  %v8638_v2 = vpack.c.bf16 %v684_v62, %v680_v60  ;;  %v692_v51 = vld [vmem:[#allocation9 + $0x170] sm:$0xff]  ;;  %v695_v60 = vld [vmem:[#allocation9 + $0x188] sm:$0xff] }
  0x67   :  { %6304 = vmatpush1.bf16.msra.mxu0 %v8589_v13  ;;  %10645 = vst [vmem:[#allocation18_spill] sm:$0xff] %v8635_v58  ;;  %v8650_v52 = vpack.c.bf16 %v692_v51, %v688_v45  ;;  %v699_v62 = vld [vmem:[#allocation9 + $0x1a8] sm:$0xff]  ;;  %v696_v45 = vld [vmem:[#allocation9 + $0x190] sm:$0xff] }
  0x68   :  { %6306 = vmatprep.subr.bf16.mxu0 %v8595_v22  ;;  %10646 = vst [vmem:[#allocation19_spill] sm:$0xff] %v8638_v2  ;;  %v700_v51 = vld [vmem:[#allocation9 + $0x1b0] sm:$0xff] }
  0x69   :  { %6284 = vmatpush1.bf16.msra.mxu1 %v8552_v31  ;;  %10650 = vst [vmem:[#allocation23_spill] sm:$0xff] %v8650_v52 }
  0x6a   :  { %6286 = vmatprep.subr.bf16.mxu1 %v8556_v32 }
  0x6b   :  { %6308 = vmatpush1.bf16.msra.mxu0 %v8599_v33 }
  0x6c   :  { %6310 = vmatprep.subr.bf16.mxu0 %v8607_v46 }
  0x6d   :  { %6288 = vmatpush1.bf16.msra.mxu1 %v8559_v39 }
  0x6e   :  { %6290 = vmatprep.subr.bf16.mxu1 %v8562_v40 }
  0x6f   :  { %6312 = vmatpush1.bf16.msra.mxu0 %v8611_v57 }
  0x70   :  { %6314 = vmatprep.subr.bf16.mxu0 %v8619_v10 }
  0x71   :  { %6292 = vmatpush1.bf16.msra.mxu1 %v8565_v47 }
  0x72   :  { %6294 = vmatprep.subr.bf16.mxu1 %v8568_v50 }
  0x75   :  { %6296 = vmatpush1.bf16.msra.mxu1 %v8571_v55 }
  0x76   :  { %6298 = vmatprep.subr.bf16.mxu1 %v8574_v56 }
  0x79   :  { %6300 = vmatpush1.bf16.msra.mxu1 %v8577_v59 }
  0x7a   :  { %6334 = vmatprep.subr.bf16.mxu1 %v8585_v3 }
  0x7c   :  { %640 = vmatmul.mubr.f32.vlgmr.msra.gmra.mrb[0].mxu1 %v8524_v5  ;;  %v652_v5 = vld [vmem:[#allocation9 + $0x30] sm:$0xff] }
  0x7d   :  { %845 = vmatprep.mubr.f32.mxu1 %v10428_v0  ;;  %v8591_v14 = vpack.c.bf16 %v652_v5, %v648_v11  ;;  %v677_v11 = vld [vmem:[#allocation9 + $0xf8] sm:$0xff]  ;;  %v670_v5 = vld [vmem:[#allocation9 + $0xc0] sm:$0xff] }
  0x7e   :  { %v8621_v20 = vpack.c.bf16 %v677_v11, %v673_v4  ;;  %v8623_v21 = vpack.c.bf16 %v674_v17, %v670_v5  ;;  %v687_v4 = vld [vmem:[#allocation9 + $0x148] sm:$0xff]  ;;  %v689_v5 = vld [vmem:[#allocation9 + $0x158] sm:$0xff] }
  0x7f   :  { %6336 = vmatpush1.bf16.msra.mxu1 %v8591_v14  ;;  %v691_v11 = vld [vmem:[#allocation9 + $0x168] sm:$0xff]  ;;  %v8645_v37 = vpack.c.bf16 %v693_v27, %v689_v5  ;;  %v701_v5 = vld [vmem:[#allocation9 + $0x1b8] sm:$0xff]  ;;  %v694_v27 = vld [vmem:[#allocation9 + $0x180] sm:$0xff] }
  0x80   :  { %6338 = vmatprep.subr.bf16.mxu1 %v8597_v30  ;;  %6316 = vmatpush1.bf16.msra.mxu0 %v8623_v21  ;;  %v8643_v17 = vpack.c.bf16 %v691_v11, %v687_v4  ;;  %v697_v4 = vld [vmem:[#allocation9 + $0x198] sm:$0xff]  ;;  %v8655_v11 = vpack.c.bf16 %v699_v62, %v695_v60  ;;  %v8659_v0 = vpack.c.bf16 %v698_v28, %v694_v27  ;;  %v707_v60 = vld [vmem:[#allocation9 + $0x1e8] sm:$0xff]  ;;  %v706_v27 = vld [vmem:[#allocation9 + $0x1e0] sm:$0xff] }
  0x81   :  { %6318 = vmatprep.subr.bf16.mxu0 %v8631_v44  ;;  %10648 = vst [vmem:[#allocation21_spill] sm:$0xff] %v8645_v37  ;;  %v8657_v36 = vpack.c.bf16 %v701_v5, %v697_v4  ;;  %v705_v62 = vld [vmem:[#allocation9 + $0x1d8] sm:$0xff]  ;;  %v702_v5 = vld [vmem:[#allocation9 + $0x1c0] sm:$0xff] }
  0x82   :  { %10647 = vst [vmem:[#allocation20_spill] sm:$0xff] %v8643_v17  ;;  %10651 = vst [vmem:[#allocation24_spill] sm:$0xff] %v8655_v11  ;;  %v709_v4 = vld [vmem:[#allocation9 + $0x1f8] sm:$0xff] }
  0x83   :  { %6340 = vmatpush1.bf16.msra.mxu1 %v8602_v38  ;;  %10652 = vst [vmem:[#allocation25_spill] sm:$0xff] %v8657_v36  ;;  %10653 = vst [vmem:[#allocation26_spill] sm:$0xff] %v8659_v0  ;;  %v8669_v28 = vpack.c.bf16 %v709_v4, %v705_v62  ;;  %v894_v62 = vld [vmem:[#allocation7 + $0x38] sm:$0xff]  ;;  %v887_v4 = vld [vmem:[#allocation7] sm:$0xff] }
  0x84   :  { %6342 = vmatprep.subr.bf16.mxu1 %v8609_v54  ;;  %6320 = vmatpush1.bf16.msra.mxu0 %v8635_v58  ;;  %v940_v58 = vld [vmem:[#allocation7 + $0x1a8] sm:$0xff] }
  0x85   :  { %6322 = vmatprep.subr.bf16.mxu0 %v8643_v17  ;;  %10656 = vst [vmem:[#allocation29_spill] sm:$0xff] %v8669_v28  ;;  %v8671_v17 = vpack.c.bf16 %v706_v27, %v702_v5  ;;  %v891_v5 = vld [vmem:[#allocation7 + $0x20] sm:$0xff] }
  0x87   :  { %6344 = vmatpush1.bf16.msra.mxu1 %v8614_v61  ;;  %10657 = vst [vmem:[#allocation30_spill] sm:$0xff] %v8671_v17 }
  0x88   :  { %6346 = vmatprep.subr.bf16.mxu1 %v8621_v20  ;;  %6324 = vmatpush1.bf16.msra.mxu0 %v8647_v43 }
  0x89   :  { %6326 = vmatprep.subr.bf16.mxu0 %v8655_v11  ;;  %v8683_v11 = vpack.c.bf16 %v891_v5, %v887_v4  ;;  %v895_v4 = vld [vmem:[#allocation7 + $0x40] sm:$0xff] }
  0x8a   :  { %v899_v5 = vld [vmem:[#allocation7 + $0x60] sm:$0xff] }
  0x8b   :  { %6348 = vmatpush1.bf16.msra.mxu1 %v8626_v29  ;;  %10661 = vst [vmem:[#allocation34_spill] sm:$0xff] %v8683_v11 }
  0x8c   :  { %6350 = vmatprep.subr.bf16.mxu1 %v8633_v53  ;;  %6328 = vmatpush1.bf16.msra.mxu0 %v8659_v0  ;;  %v935_v53 = vld [vmem:[#allocation7 + $0x180] sm:$0xff] }
  0x8f   :  { %6352 = vmatpush1.bf16.msra.mxu1 %v8638_v2 }
  0x90   :  { %6354 = vmatprep.subr.bf16.mxu1 %v8645_v37  ;;  %v8662_v37 = vpack.c.bf16 %v700_v51, %v696_v45  ;;  %v704_v45 = vld [vmem:[#allocation9 + $0x1d0] sm:$0xff] }
  0x91   :  { %v708_v51 = vld [vmem:[#allocation9 + $0x1f0] sm:$0xff] }
  0x92   :  { %10654 = vst [vmem:[#allocation27_spill] sm:$0xff] %v8662_v37 }
  0x93   :  { %6356 = vmatpush1.bf16.msra.mxu1 %v8650_v52  ;;  %v703_v52 = vld [vmem:[#allocation9 + $0x1c8] sm:$0xff] }
  0x94   :  { %6358 = vmatprep.subr.bf16.mxu1 %v8657_v36  ;;  %v8667_v43 = vpack.c.bf16 %v707_v60, %v703_v52  ;;  %v8674_v36 = vpack.c.bf16 %v708_v51, %v704_v45  ;;  %v892_v52 = vld [vmem:[#allocation7 + $0x28] sm:$0xff]  ;;  %v890_v60 = vld [vmem:[#allocation7 + $0x18] sm:$0xff]  ;;  %v889_v45 = vld [vmem:[#allocation7 + $0x10] sm:$0xff] }
  0x95   :  { %v8681_v27 = vpack.c.bf16 %v894_v62, %v890_v60  ;;  %v893_v51 = vld [vmem:[#allocation7 + $0x30] sm:$0xff]  ;;  %v902_v62 = vld [vmem:[#allocation7 + $0x78] sm:$0xff] }
  0x96   :  { %10655 = vst [vmem:[#allocation28_spill] sm:$0xff] %v8667_v43  ;;  %6330 = vmatprep.subr.bf16.mxu0 %v8667_v43  ;;  %10658 = vst [vmem:[#allocation31_spill] sm:$0xff] %v8674_v36  ;;  %v10666_v43 = vmov 0.0  }
  0x97   :  { %6360 = vmatpush1.bf16.msra.mxu1 %v8662_v37  ;;  %6332 = vmatpush1.bf16.msra.mxu0 %v8671_v17  ;;  %v888_v37 = vld [vmem:[#allocation7 + $0x8] sm:$0xff]  ;;  %10660 = vst [vmem:[#allocation33_spill] sm:$0xff] %v8681_v27 }
  0x98   :  { %6362 = vmatprep.subr.bf16.mxu1 %v8669_v28  ;;  %v8679_v0 = vpack.c.bf16 %v892_v52, %v888_v37  ;;  %v6118_v17 = vld [vmem:[%s10415_s1 + $0x8] sm:$0xff]  ;;  %v8689_v28 = vpack.c.bf16 %v893_v51, %v889_v45  ;;  %v8698_v45 = vpack.c.bf16 %v899_v5, %v895_v4  ;;  %v897_v51 = vld [vmem:[#allocation7 + $0x50] sm:$0xff]  ;;  %v903_v4 = vld [vmem:[#allocation7 + $0x80] sm:$0xff]  ;;  %s8293_s1 = smov [#allocation10]  }
  0x99   :  { %v896_v37 = vld [vmem:[#allocation7 + $0x48] sm:$0xff]  ;;  %v907_v5 = vld [vmem:[#allocation7 + $0xa0] sm:$0xff]  ;;  %s6060_s7 = sshll.u32 %s8293_s1, 4  ;;  %s6061_s7 = int_to_ptr.vmem [resolvable:$true] %s6060_s7 }
  0x9a   :  { %10659 = vst [vmem:[#allocation32_spill] sm:$0xff] %v8679_v0  ;;  %6366 = vmatprep.subr.bf16.mxu0 %v8679_v0  ;;  %10662 = vst [vmem:[#allocation35_spill] sm:$0xff] %v8689_v28  ;;  %775 = vmatmul.mubr.f32.vlgmr.msra.gmra.mrb[16].mxu0 %v6118_v17  ;;  %v900_v52 = vld [vmem:[#allocation7 + $0x68] sm:$0xff]  ;;  %s8235_s21 = scalar_lea.vmem %s6061_s7, 256  ;;  %p8240_p11 = scmp.lt.s32.totalorder %s6061_s7, %s6061_s7 }
  0x9b   :  { %6364 = vmatpush1.bf16.msra.mxu1 %v8674_v36  ;;  %v898_v36 = vld [vmem:[#allocation7 + $0x58] sm:$0xff]  ;;  %6368 = vmatpush1.bf16.msra.mxu0 %v8683_v11  ;;  %v8693_v60 = vpack.c.bf16 %v900_v52, %v896_v37  ;;  %10665 = vst [vmem:[#allocation38_spill] sm:$0xff] %v8698_v45  ;;  %v904_v37 = vld [vmem:[#allocation7 + $0x88] sm:$0xff]  ;;  %p8236_p10 = scmp.ne.s32.totalorder %s6061_s7, %s8235_s21  ;;  %p8241_p12 = scmp.lt.s32.totalorder %s8235_s21, %s8235_s21 }
  0x9c   :  { %6398 = vmatprep.subr.bf16.mxu1 %v8681_v27  ;;  %v8696_v0 = vpack.c.bf16 %v902_v62, %v898_v36  ;;  %v901_v27 = vld [vmem:[#allocation7 + $0x70] sm:$0xff]  ;;  %1015 = vmatprep.mubr.f32.mxu0 %v10666_v43  ;;  %v908_v52 = vld [vmem:[#allocation7 + $0xa8] sm:$0xff]  ;;  %v906_v11 = vld [vmem:[#allocation7 + $0x98] sm:$0xff] }
  0x9d   :  { %10663 = vst [vmem:[#allocation36_spill] sm:$0xff] %v8693_v60  ;;  %6370 = vmatprep.subr.bf16.mxu0 %v8693_v60  ;;  %v8707_v36 = vpack.c.bf16 %v908_v52, %v904_v37  ;;  %v910_v62 = vld [vmem:[#allocation7 + $0xb8] sm:$0xff]  ;;  %v909_v60 = vld [vmem:[#allocation7 + $0xb0] sm:$0xff]  ;;  %v916_v37 = vld [vmem:[#allocation7 + $0xe8] sm:$0xff]  ;;  %p8242_p13 = por %p8241_p12, %p8240_p11 }
  0x9e   :  { %846 = vmatmul.mubr.f32.vlgmr.msra.gmra.mrb[18].mxu1 %v6118_v17  ;;  %10664 = vst [vmem:[#allocation37_spill] sm:$0xff] %v8696_v0  ;;  %v8702_v17 = vpack.c.bf16 %v901_v27, %v897_v51  ;;  %v8712_v27 = vpack.c.bf16 %v907_v5, %v903_v4  ;;  %v905_v51 = vld [vmem:[#allocation7 + $0x90] sm:$0xff]  ;;  %v914_v52 = vld [vmem:[#allocation7 + $0xd8] sm:$0xff] }
  0x9f   :  { %6400 = vmatpush1.bf16.msra.mxu1 %v8689_v28  ;;  %1086 = vmatprep.mubr.f32.mxu1 %v10666_v43  ;;  %10668 = vst [vmem:[#allocation40_spill] sm:$0xff] %v8707_v36  ;;  %v8710_v28 = vpack.c.bf16 %v910_v62, %v906_v11  ;;  %v911_v11 = vld [vmem:[#allocation7 + $0xc0] sm:$0xff]  ;;  %p8243_p0 = pnand %p8242_p13, %p8236_p10 }
  0xa0   :  { %10667 = vst [vmem:[#allocation39_spill] sm:$0xff] %v8702_v17  ;;  %6402 = vmatprep.subr.bf16.mxu1 %v8696_v0  ;;  %6372 = vmatpush1.bf16.msra.mxu0 %v8698_v45  ;;  %10670 = vst [vmem:[#allocation42_spill] sm:$0xff] %v8712_v27  ;;  %v8715_v0 = vpack.c.bf16 %v909_v60, %v905_v51  ;;  %v912_v45 = vld [vmem:[#allocation7 + $0xc8] sm:$0xff]  ;;  %v915_v62 = vld [vmem:[#allocation7 + $0xe0] sm:$0xff] }
  0xa1   :  { %10669 = vst [vmem:[#allocation41_spill] sm:$0xff] %v8710_v28  ;;  %6374 = vmatprep.subr.bf16.mxu0 %v8707_v36  ;;  %v8719_v2 = vpack.c.bf16 %v916_v37, %v912_v45  ;;  %v8724_v5 = vpack.c.bf16 %v915_v62, %v911_v11  ;;  %v913_v60 = vld [vmem:[#allocation7 + $0xd0] sm:$0xff]  ;;  %v924_v45 = vld [vmem:[#allocation7 + $0x128] sm:$0xff]  ;;  %v922_v37 = vld [vmem:[#allocation7 + $0x118] sm:$0xff] }
  0xa2   :  { %10671 = vst [vmem:[#allocation43_spill] sm:$0xff] %v8715_v0  ;;  %v917_v51 = vld [vmem:[#allocation7 + $0xf0] sm:$0xff] }
  0xa3   :  { %6404 = vmatpush1.bf16.msra.mxu1 %v8702_v17  ;;  %10672 = vst [vmem:[#allocation44_spill] sm:$0xff] %v8719_v2  ;;  %v918_v17 = vld [vmem:[#allocation7 + $0xf8] sm:$0xff]  ;;  %10674 = vst [vmem:[#allocation46_spill] sm:$0xff] %v8724_v5 }
  0xa4   :  { %6406 = vmatprep.subr.bf16.mxu1 %v8710_v28  ;;  %6376 = vmatpush1.bf16.msra.mxu0 %v8712_v27  ;;  %v8722_v4 = vpack.c.bf16 %v918_v17, %v914_v52  ;;  %v8727_v28 = vpack.c.bf16 %v917_v51, %v913_v60  ;;  %v920_v27 = vld [vmem:[#allocation7 + $0x108] sm:$0xff]  ;;  %v919_v17 = vld [vmem:[#allocation7 + $0x100] sm:$0xff]  ;;  %v921_v60 = vld [vmem:[#allocation7 + $0x110] sm:$0xff] }
  0xa5   :  { %6378 = vmatprep.subr.bf16.mxu0 %v8719_v2  ;;  %v8731_v36 = vpack.c.bf16 %v924_v45, %v920_v27  ;;  %v923_v52 = vld [vmem:[#allocation7 + $0x120] sm:$0xff]  ;;  %v925_v51 = vld [vmem:[#allocation7 + $0x130] sm:$0xff]  ;;  %v932_v27 = vld [vmem:[#allocation7 + $0x168] sm:$0xff] }
  0xa6   :  { %10673 = vst [vmem:[#allocation45_spill] sm:$0xff] %v8722_v4  ;;  %10675 = vst [vmem:[#allocation47_spill] sm:$0xff] %v8727_v28  ;;  %v8736_v62 = vpack.c.bf16 %v923_v52, %v919_v17  ;;  %v930_v45 = vld [vmem:[#allocation7 + $0x158] sm:$0xff] }
  0xa7   :  { %6408 = vmatpush1.bf16.msra.mxu1 %v8715_v0  ;;  %10676 = vst [vmem:[#allocation48_spill] sm:$0xff] %v8731_v36  ;;  %v926_v0 = vld [vmem:[#allocation7 + $0x138] sm:$0xff] }
  0xa8   :  { %6410 = vmatprep.subr.bf16.mxu1 %v8722_v4  ;;  %6380 = vmatpush1.bf16.msra.mxu0 %v8724_v5  ;;  %v8734_v11 = vpack.c.bf16 %v926_v0, %v922_v37  ;;  %10678 = vst [vmem:[#allocation50_spill] sm:$0xff] %v8736_v62  ;;  %v8739_v4 = vpack.c.bf16 %v925_v51, %v921_v60  ;;  %v928_v5 = vld [vmem:[#allocation7 + $0x148] sm:$0xff]  ;;  %v927_v0 = vld [vmem:[#allocation7 + $0x140] sm:$0xff]  ;;  %v929_v60 = vld [vmem:[#allocation7 + $0x150] sm:$0xff] }
  0xa9   :  { %6382 = vmatprep.subr.bf16.mxu0 %v8731_v36  ;;  %v8743_v2 = vpack.c.bf16 %v932_v27, %v928_v5  ;;  %v931_v37 = vld [vmem:[#allocation7 + $0x160] sm:$0xff]  ;;  %v933_v51 = vld [vmem:[#allocation7 + $0x170] sm:$0xff]  ;;  %v936_v36 = vld [vmem:[#allocation7 + $0x188] sm:$0xff] }
  0xaa   :  { %10677 = vst [vmem:[#allocation49_spill] sm:$0xff] %v8734_v11  ;;  %10679 = vst [vmem:[#allocation51_spill] sm:$0xff] %v8739_v4  ;;  %v8748_v52 = vpack.c.bf16 %v931_v37, %v927_v0  ;;  %v8754_v5 = vpack.c.bf16 %v940_v58, %v936_v36  ;;  %v942_v27 = vld [vmem:[#allocation7 + $0x1b8] sm:$0xff]  ;;  %v937_v0 = vld [vmem:[#allocation7 + $0x190] sm:$0xff] }
  0xab   :  { %6412 = vmatpush1.bf16.msra.mxu1 %v8727_v28  ;;  %10680 = vst [vmem:[#allocation52_spill] sm:$0xff] %v8743_v2  ;;  %v934_v28 = vld [vmem:[#allocation7 + $0x178] sm:$0xff]  ;;  %v941_v37 = vld [vmem:[#allocation7 + $0x1b0] sm:$0xff]  ;;  %v948_v58 = vld [vmem:[#allocation7 + $0x1e8] sm:$0xff] }
  0xac   :  { %6414 = vmatprep.subr.bf16.mxu1 %v8734_v11  ;;  %6384 = vmatpush1.bf16.msra.mxu0 %v8736_v62  ;;  %v8746_v17 = vpack.c.bf16 %v934_v28, %v930_v45  ;;  %10682 = vst [vmem:[#allocation54_spill] sm:$0xff] %v8748_v52  ;;  %v8751_v11 = vpack.c.bf16 %v933_v51, %v929_v60  ;;  %v938_v62 = vld [vmem:[#allocation7 + $0x198] sm:$0xff]  ;;  %10684 = vst [vmem:[#allocation56_spill] sm:$0xff] %v8754_v5  ;;  %v944_v60 = vld [vmem:[#allocation7 + $0x1c8] sm:$0xff] }
  0xad   :  { %6386 = vmatprep.subr.bf16.mxu0 %v8743_v2  ;;  %v8757_v28 = vpack.c.bf16 %v942_v27, %v938_v62  ;;  %v8763_v51 = vpack.c.bf16 %v941_v37, %v937_v0  ;;  %v946_v36 = vld [vmem:[#allocation7 + $0x1d8] sm:$0xff]  ;;  %v8766_v2 = vpack.c.bf16 %v948_v58, %v944_v60  ;;  %v945_v27 = vld [vmem:[#allocation7 + $0x1d0] sm:$0xff]  ;;  %v96_v37 = vlaneseq }
  0xae   :  { %10681 = vst [vmem:[#allocation53_spill] sm:$0xff] %v8746_v17  ;;  %10683 = vst [vmem:[#allocation55_spill] sm:$0xff] %v8751_v11 }
  0xaf   :  { %6416 = vmatpush1.bf16.msra.mxu1 %v8739_v4  ;;  %v939_v4 = vld [vmem:[#allocation7 + $0x1a0] sm:$0xff]  ;;  %10685 = vst [vmem:[#allocation57_spill] sm:$0xff] %v8757_v28  ;;  %10687 = vst [vmem:[#allocation59_spill] sm:$0xff] %v8763_v51  ;;  %v8782_v58 = vshrl.u32 %v96_v37, 7 }
  0xb0   :  { %6418 = vmatprep.subr.bf16.mxu1 %v8746_v17  ;;  %6388 = vmatpush1.bf16.msra.mxu0 %v8748_v52  ;;  %v8759_v45 = vpack.c.bf16 %v939_v4, %v935_v53  ;;  %v950_v17 = vld [vmem:[#allocation7 + $0x1f8] sm:$0xff]  ;;  %10688 = vst [vmem:[#allocation60_spill] sm:$0xff] %v8766_v2  ;;  %v943_v53 = vld [vmem:[#allocation7 + $0x1c0] sm:$0xff]  ;;  %v949_v52 = vld [vmem:[#allocation7 + $0x1f0] sm:$0xff] }
  0xb1   :  { %6390 = vmatprep.subr.bf16.mxu0 %v8754_v5  ;;  %v8768_v62 = vpack.c.bf16 %v950_v17, %v946_v36  ;;  %v947_v4 = vld [vmem:[#allocation7 + $0x1e0] sm:$0xff]  ;;  %v8775_v0 = vpack.c.bf16 %v949_v52, %v945_v27  ;;  %v10475_v36 = vsub.s32 0, %v8782_v58 }
  0xb2   :  { %10686 = vst [vmem:[#allocation58_spill] sm:$0xff] %v8759_v45  ;;  %v94_v52 = vld [vmem:[%s10419_s5] sm:$0xf]  ;;  %s8294_s5 = smov [#allocation11]  }
  0xb3   :  { %6420 = vmatpush1.bf16.msra.mxu1 %v8751_v11  ;;  %10689 = vst [vmem:[#allocation61_spill] sm:$0xff] %v8768_v62  ;;  %v8771_v11 = vpack.c.bf16 %v947_v4, %v943_v53  ;;  %10691 = vst [vmem:[#allocation63_spill] sm:$0xff] %v8775_v0  ;;  %v10478_v53 = vsub.s32 1, %v8782_v58  ;;  %v8791_v4 = vrot.slane %v94_v52, %v10475_v36  ;;  %s6072_s20 = sshll.u32 %s8294_s5, 4  ;;  %s10373_s20 = int_to_ptr.vmem [resolvable:$true] %s6072_s20 }
  0xb4   :  { %6422 = vmatprep.subr.bf16.mxu1 %v8757_v28  ;;  %6392 = vmatpush1.bf16.msra.mxu0 %v8759_v45  ;;  %v10479_v45 = vsub.s32 2, %v8782_v58  ;;  %v10480_v28 = vsub.s32 3, %v8782_v58 }
  0xb5   :  { %10690 = vst [vmem:[#allocation62_spill] sm:$0xff] %v8771_v11  ;;  %6394 = vmatprep.subr.bf16.mxu0 %v8766_v2  ;;  %10692 = vst [vmem:[#allocation64_spill] sm:$0xff] %v8791_v4 }
  0xb7   :  { %6424 = vmatpush1.bf16.msra.mxu1 %v8763_v51 }
  0xb8   :  { %6426 = vmatprep.subr.bf16.mxu1 %v8768_v62  ;;  %6396 = vmatpush1.bf16.msra.mxu0 %v8771_v11 }
  0xb9   :  { %6430 = vmatprep.subr.bf16.mxu0 %v8427_v8  ;;  %v8795_v8 = vrot.slane %v94_v52, %v10478_v53 }
  0xbb   :  { %6428 = vmatpush1.bf16.msra.mxu1 %v8775_v0  ;;  %10693 = vst [vmem:[#allocation65_spill] sm:$0xff] %v8795_v8 }
  0xbc   :  { %6462 = vmatprep.subr.bf16.mxu1 %v8515_v63 }
 0x11a   :  { %v220_v17 = vpop.f32.mrb[0].mxu0 }
 0x11b   :  { %v222_v60 = vpop.f32.mrb[1].mxu0  ;;  %v221_v63 = vadd.f32 %v220_v17, %v8791_v4  ;;  %v8803_v17 = vrot.slane %v94_v52, %v10479_v45 }
 0x11c   :  { %v223_v27 = vadd.f32 %v222_v60, %v8795_v8 }
 0x12f   :  { %v570_v37 = vpop.f32.mrb[16].mxu1 }
 0x130   :  { %v859_v0 = vadd.f32 %v570_v37, %v221_v63  ;;  %v572_v11 = vpop.f32.mrb[17].mxu1  ;;  %v8807_v63 = vrot.slane %v94_v52, %v10480_v28 }
 0x131   :  { %v860_v62 = vadd.f32 %v572_v11, %v223_v27 }
 0x132   :  { %v6120_v51 = vmul.f32 -1.442695, %v859_v0  ;;  %10694 = vst [vmem:[#allocation66_spill] sm:$0xff] %v8807_v63 }
 0x133   :  { %v6121_v2 = vmul.f32 -1.442695, %v860_v62 }
 0x135   :  { %7913 = vpow2.f32 %v6121_v2 }
 0x136   :  { %7915 = vpow2.f32 %v6120_v51 }
 0x13f   :  { %v7914_v36 = vpop.eup %7913 }
 0x140   :  { %v7916_v5 = vpop.eup %7915  ;;  %v872_v53 = vadd.f32 1.0, %v7914_v36 }
 0x141   :  { %v866_v60 = vadd.f32 1.0, %v7916_v5  ;;  %v435_v5 = vld [vmem:[%s10416_s2] sm:$0xff] }
 0x142   :  { %7917 = vrcp.f32 %v872_v53 }
 0x143   :  { %7919 = vrcp.f32 %v866_v60 }
 0x14c   :  { %v7918_v36 = vpop.eup %7917 }
 0x14d   :  { %v7920_v27 = vpop.eup %7919  ;;  %v882_v52 = vmul.f32 %v7918_v36, %v435_v5 }
 0x14f   :  { %v641_v11 = vpop.f32.mrb[0].mxu1 }
 0x150   :  { %v7823_v2 = vadd.f32 %v641_v11, %v8803_v17  ;;  %v643_v51 = vpop.f32.mrb[1].mxu1 }
 0x151   :  { %v7824_v62 = vadd.f32 %v643_v51, %v8807_v63 }
 0x152   :  { %7921 = vtanh.f32 %v7823_v2 }
 0x153   :  { %v6122_v0 = vmul.f32 -1.442695, %v7824_v62 }
 0x155   :  { %7923 = vpow2.f32 %v6122_v0 }
 0x15c   :  { %v7922_v37 = vpop.eup %7921 }
 0x15d   :  { %v883_v45 = vmul.f32 %v7922_v37, %v7920_v27 }
 0x15f   :  { %v7924_v28 = vpop.eup %7923  ;;  %v8814_v53 = vadd.f32 %v883_v45, %v882_v52  ;;  %v6119_v52 = vld [vmem:[%s10416_s2 + $0x8] sm:$0xff] }
 0x160   :  { %v879_v11 = vadd.f32 1.0, %v7924_v28 }
 0x161   :  { %7925 = vtanh.f32 %v8814_v53 }
 0x162   :  { %7927 = vrcp.f32 %v879_v11 }
 0x16b   :  { %v7926_v60 = vpop.eup %7925 }
 0x16c   :  { %v7928_v2 = vpop.eup %7927 }
 0x16d   :  { %v886_v51 = vmul.f32 %v7928_v2, %v7926_v60 }
 0x16f   :  { %1016 = vmatmul.mubr.f32.vlgmr.msra.gmra.mrb[16].mxu0 %v886_v51  ;;  %1087 = vmatmul.mubr.f32.vlgmr.msra.gmra.mrb[18].mxu1 %v886_v51 }
 0x170   :  { %6432 = vmatpush1.bf16.msra.mxu0 %v8429_v9  ;;  %6464 = vmatpush1.bf16.msra.mxu1 %v8526_v6  ;;  %v1170_v9 = vld [vmem:[#allocation4 + $0x180] sm:$0xff]  ;;  %v10698_v6 = vld [vmem:[#allocation20_spill] sm:$0xff] }
 0x171   :  { %6434 = vmatprep.subr.bf16.mxu0 %v8432_v12  ;;  %6466 = vmatprep.subr.bf16.mxu1 %v8529_v7  ;;  %v1174_v12 = vld [vmem:[#allocation4 + $0x1a0] sm:$0xff] }
 0x172   :  { %1250 = vmatprep.mubr.f32.mxu0 %v10666_v43  ;;  %1321 = vmatprep.mubr.f32.mxu1 %v10666_v43  ;;  %v10699_v7 = vld [vmem:[#allocation21_spill] sm:$0xff] }
 0x174   :  { %6436 = vmatpush1.bf16.msra.mxu0 %v8442_v18  ;;  %6468 = vmatpush1.bf16.msra.mxu1 %v8535_v15  ;;  %v1179_v18 = vld [vmem:[#allocation4 + $0x1c8] sm:$0xff] }
 0x175   :  { %6438 = vmatprep.subr.bf16.mxu0 %v8445_v19  ;;  %6470 = vmatprep.subr.bf16.mxu1 %v8539_v16  ;;  %v1183_v19 = vld [vmem:[#allocation4 + $0x1e8] sm:$0xff]  ;;  %v10701_v16 = vld [vmem:[#allocation23_spill] sm:$0xff] }
 0x176   :  { %v10700_v15 = vld [vmem:[#allocation22_spill] sm:$0xff] }
 0x178   :  { %6440 = vmatpush1.bf16.msra.mxu0 %v8453_v25  ;;  %6472 = vmatpush1.bf16.msra.mxu1 %v8544_v23  ;;  %v8841_v25 = vpack.c.bf16 %v1174_v12, %v1170_v9  ;;  %v10702_v23 = vld [vmem:[#allocation24_spill] sm:$0xff] }
 0x179   :  { %6442 = vmatprep.subr.bf16.mxu0 %v8456_v26  ;;  %6474 = vmatprep.subr.bf16.mxu1 %v8548_v24  ;;  %v8845_v26 = vpack.c.bf16 %v1183_v19, %v1179_v18  ;;  %v10703_v24 = vld [vmem:[#allocation25_spill] sm:$0xff] }
 0x17c   :  { %6444 = vmatpush1.bf16.msra.mxu0 %v8467_v34  ;;  %6476 = vmatpush1.bf16.msra.mxu1 %v8552_v31  ;;  %v1178_v34 = vld [vmem:[#allocation4 + $0x1c0] sm:$0xff]  ;;  %v10704_v31 = vld [vmem:[#allocation26_spill] sm:$0xff] }
 0x17d   :  { %6446 = vmatprep.subr.bf16.mxu0 %v8470_v35  ;;  %6478 = vmatprep.subr.bf16.mxu1 %v8556_v32  ;;  %v1182_v35 = vld [vmem:[#allocation4 + $0x1e0] sm:$0xff]  ;;  %v10705_v32 = vld [vmem:[#allocation27_spill] sm:$0xff] }
 0x180   :  { %6448 = vmatpush1.bf16.msra.mxu0 %v8481_v41  ;;  %6480 = vmatpush1.bf16.msra.mxu1 %v8559_v39  ;;  %v8849_v41 = vpack.c.bf16 %v1182_v35, %v1178_v34  ;;  %v10706_v39 = vld [vmem:[#allocation28_spill] sm:$0xff] }
 0x181   :  { %6450 = vmatprep.subr.bf16.mxu0 %v8484_v42  ;;  %6482 = vmatprep.subr.bf16.mxu1 %v8562_v40  ;;  %v10695_v42 = vld [vmem:[#allocation17_spill] sm:$0xff] }
 0x182   :  { %v10707_v40 = vld [vmem:[#allocation29_spill] sm:$0xff] }
 0x184   :  { %6452 = vmatpush1.bf16.msra.mxu0 %v8494_v48  ;;  %6484 = vmatpush1.bf16.msra.mxu1 %v8565_v47  ;;  %v10696_v48 = vld [vmem:[#allocation18_spill] sm:$0xff] }
 0x185   :  { %6454 = vmatprep.subr.bf16.mxu0 %v8497_v49  ;;  %6486 = vmatprep.subr.bf16.mxu1 %v8568_v50  ;;  %v10697_v49 = vld [vmem:[#allocation19_spill] sm:$0xff]  ;;  %v10708_v47 = vld [vmem:[#allocation30_spill] sm:$0xff] }
 0x186   :  { %v10709_v50 = vld [vmem:[#allocation31_spill] sm:$0xff] }
 0x188   :  { %6456 = vmatpush1.bf16.msra.mxu0 %v8841_v25  ;;  %6488 = vmatpush1.bf16.msra.mxu1 %v8571_v55  ;;  %v10710_v55 = vld [vmem:[#allocation32_spill] sm:$0xff] }
 0x189   :  { %6458 = vmatprep.subr.bf16.mxu0 %v8845_v26  ;;  %6490 = vmatprep.subr.bf16.mxu1 %v8574_v56  ;;  %v10711_v56 = vld [vmem:[#allocation33_spill] sm:$0xff] }
 0x18c   :  { %6460 = vmatpush1.bf16.msra.mxu0 %v8849_v41  ;;  %6492 = vmatpush1.bf16.msra.mxu1 %v8577_v59  ;;  %v412_v59 = vld [vmem:[%s10422_s8] sm:$0xf] }
 0x18d   :  { %6494 = vmatprep.subr.bf16.mxu0 %v8583_v1  ;;  %6526 = vmatprep.subr.bf16.mxu1 %v8585_v3  ;;  %v10712_v1 = vsub.s32 0, %v8782_v58 }
 0x18f   :  { %1251 = vmatmul.mubr.f32.vlgmr.msra.gmra.mrb[2].mxu0 %v886_v51  ;;  %1322 = vmatmul.mubr.f32.vlgmr.msra.gmra.mrb[2].mxu1 %v886_v51  ;;  %v8896_v3 = vrot.slane %v412_v59, %v10712_v1  ;;  %v10726_v1 = vld [vmem:[#allocation39_spill] sm:$0xff] }
 0x190   :  { %6496 = vmatpush1.bf16.msra.mxu0 %v8589_v13  ;;  %6528 = vmatpush1.bf16.msra.mxu1 %v8591_v14  ;;  %v10714_v13 = vsub.s32 1, %v8782_v58 }
 0x191   :  { %6498 = vmatprep.subr.bf16.mxu0 %v8595_v22  ;;  %6530 = vmatprep.subr.bf16.mxu1 %v8597_v30  ;;  %10713 = vst [vmem:[#allocation17_spill] sm:$0xff] %v8896_v3 }
 0x192   :  { %1456 = vmatprep.mubr.f32.mxu0 %v10666_v43  ;;  %1527 = vmatprep.mubr.f32.mxu1 %v10666_v43  ;;  %v8900_v14 = vrot.slane %v412_v59, %v10714_v13  ;;  %v10727_v13 = vld [vmem:[#allocation40_spill] sm:$0xff] }
 0x194   :  { %6500 = vmatpush1.bf16.msra.mxu0 %v8599_v33  ;;  %6532 = vmatpush1.bf16.msra.mxu1 %v8602_v38  ;;  %10715 = vst [vmem:[#allocation18_spill] sm:$0xff] %v8900_v14 }
 0x195   :  { %6502 = vmatprep.subr.bf16.mxu0 %v8607_v46  ;;  %6534 = vmatprep.subr.bf16.mxu1 %v8609_v54 }
 0x198   :  { %6504 = vmatpush1.bf16.msra.mxu0 %v8611_v57  ;;  %6536 = vmatpush1.bf16.msra.mxu1 %v8614_v61 }
 0x199   :  { %6506 = vmatprep.subr.bf16.mxu0 %v8619_v10  ;;  %6538 = vmatprep.subr.bf16.mxu1 %v8621_v20  ;;  %v10716_v10 = vsub.s32 3, %v8782_v58 }
 0x19b   :  { %v8906_v20 = vrot.slane %v412_v59, %v10716_v10  ;;  %v10733_v10 = vld [vmem:[#allocation46_spill] sm:$0xff] }
 0x19c   :  { %6508 = vmatpush1.bf16.msra.mxu0 %v8623_v21  ;;  %6540 = vmatpush1.bf16.msra.mxu1 %v8626_v29  ;;  %v10718_v29 = vsub.s32 2, %v8782_v58 }
 0x19d   :  { %6510 = vmatprep.subr.bf16.mxu0 %v8631_v44  ;;  %6542 = vmatprep.subr.bf16.mxu1 %v10695_v42  ;;  %10717 = vst [vmem:[#allocation19_spill] sm:$0xff] %v8906_v20 }
 0x19e   :  { %v8911_v44 = vrot.slane %v412_v59, %v10718_v29  ;;  %v10725_v59 = vld [vmem:[#allocation38_spill] sm:$0xff] }
 0x1a0   :  { %6512 = vmatpush1.bf16.msra.mxu0 %v10696_v48  ;;  %6544 = vmatpush1.bf16.msra.mxu1 %v10697_v49  ;;  %10719 = vst [vmem:[#allocation20_spill] sm:$0xff] %v8911_v44 }
 0x1a1   :  { %6514 = vmatprep.subr.bf16.mxu0 %v10698_v6  ;;  %6546 = vmatprep.subr.bf16.mxu1 %v10699_v7 }
 0x1a4   :  { %6516 = vmatpush1.bf16.msra.mxu0 %v10700_v15  ;;  %6548 = vmatpush1.bf16.msra.mxu1 %v10701_v16 }
 0x1a5   :  { %6518 = vmatprep.subr.bf16.mxu0 %v10702_v23  ;;  %6550 = vmatprep.subr.bf16.mxu1 %v10703_v24 }
 0x1a8   :  { %6520 = vmatpush1.bf16.msra.mxu0 %v10704_v31  ;;  %6552 = vmatpush1.bf16.msra.mxu1 %v10705_v32 }
 0x1a9   :  { %6522 = vmatprep.subr.bf16.mxu0 %v10706_v39  ;;  %6554 = vmatprep.subr.bf16.mxu1 %v10707_v40  ;;  %v10721_v40 = vld [vmem:[#allocation34_spill] sm:$0xff] }
 0x1ac   :  { %6524 = vmatpush1.bf16.msra.mxu0 %v10708_v47  ;;  %6556 = vmatpush1.bf16.msra.mxu1 %v10709_v50  ;;  %v10722_v47 = vld [vmem:[#allocation35_spill] sm:$0xff] }
 0x1ad   :  { %6558 = vmatprep.subr.bf16.mxu0 %v10710_v55  ;;  %6590 = vmatprep.subr.bf16.mxu1 %v10711_v56  ;;  %v10723_v55 = vld [vmem:[#allocation36_spill] sm:$0xff]  ;;  %v10724_v56 = vld [vmem:[#allocation37_spill] sm:$0xff] }
 0x242   :  { %v1017_v22 = vpop.f32.mrb[16].mxu0  ;;  %v1088_v30 = vpop.f32.mrb[18].mxu1 }
 0x243   :  { %v1093_v33 = vadd.f32 %v1017_v22, %v8896_v3  ;;  %v1019_v38 = vpop.f32.mrb[17].mxu0  ;;  %v1090_v46 = vpop.f32.mrb[19].mxu1  ;;  %v1095_v45 = vadd.f32 %v1088_v30, %v8911_v44  ;;  %v10728_v22 = vld [vmem:[#allocation41_spill] sm:$0xff]  ;;  %v10729_v30 = vld [vmem:[#allocation42_spill] sm:$0xff] }
 0x244   :  { %v1094_v54 = vadd.f32 %v1019_v38, %v8900_v14  ;;  %v1096_v21 = vadd.f32 %v1090_v46, %v8906_v20  ;;  %v10731_v38 = vld [vmem:[#allocation44_spill] sm:$0xff]  ;;  %v10732_v46 = vld [vmem:[#allocation45_spill] sm:$0xff] }
 0x245   :  { %v6123_v57 = vmul.f32 -1.442695, %v1093_v33  ;;  %v10730_v33 = vld [vmem:[#allocation43_spill] sm:$0xff] }
 0x246   :  { %v6124_v61 = vmul.f32 -1.442695, %v1094_v54  ;;  %v6125_v28 = vmul.f32 -1.442695, %v1096_v21  ;;  %v10734_v21 = vld [vmem:[#allocation47_spill] sm:$0xff] }
 0x247   :  { %7929 = vpow2.f32 %v6123_v57 }
 0x248   :  { %7931 = vpow2.f32 %v6124_v61 }
 0x249   :  { %7933 = vpow2.f32 %v6125_v28 }
 0x24a   :  { %7935 = vtanh.f32 %v1095_v45 }
 0x251   :  { %v7930_v62 = vpop.eup %7929 }
 0x252   :  { %v7932_v0 = vpop.eup %7931  ;;  %v1100_v36 = vadd.f32 1.0, %v7930_v62  ;;  %v10735_v62 = vld [vmem:[#allocation48_spill] sm:$0xff] }
 0x253   :  { %v1106_v5 = vadd.f32 1.0, %v7932_v0  ;;  %v7934_v27 = vpop.eup %7933  ;;  %v10736_v0 = vld [vmem:[#allocation49_spill] sm:$0xff] }
 0x254   :  { %7937 = vrcp.f32 %v1100_v36  ;;  %v7936_v37 = vpop.eup %7935  ;;  %v1113_v2 = vadd.f32 1.0, %v7934_v27  ;;  %v10737_v27 = vld [vmem:[#allocation50_spill] sm:$0xff] }
 0x255   :  { %7939 = vrcp.f32 %v1106_v5 }
 0x256   :  { %7941 = vrcp.f32 %v1113_v2  ;;  %v10743_v2 = vld [vmem:[#allocation56_spill] sm:$0xff] }
 0x25e   :  { %v7938_v58 = vpop.eup %7937 }
 0x25f   :  { %v7940_v11 = vpop.eup %7939  ;;  %v1117_v60 = vmul.f32 %v7938_v58, %v7936_v37  ;;  %v10738_v37 = vld [vmem:[#allocation51_spill] sm:$0xff]  ;;  %v10740_v58 = vld [vmem:[#allocation53_spill] sm:$0xff] }
 0x260   :  { %v1116_v51 = vmul.f32 %v7940_v11, %v6119_v52  ;;  %v7942_v7 = vpop.eup %7941  ;;  %v10739_v52 = vld [vmem:[#allocation52_spill] sm:$0xff]  ;;  %v10741_v11 = vld [vmem:[#allocation54_spill] sm:$0xff] }
 0x262   :  { %v8917_v9 = vadd.f32 %v1117_v60, %v1116_v51  ;;  %v1252_v12 = vpop.f32.mrb[2].mxu0  ;;  %v1323_v18 = vpop.f32.mrb[2].mxu1  ;;  %v10742_v60 = vld [vmem:[#allocation55_spill] sm:$0xff]  ;;  %v1806_v51 = vld [vmem:[#allocation4 + $0x8] sm:$0xff] }
 0x263   :  { %v7809_v19 = vadd.f32 %v1252_v12, %v8791_v4  ;;  %v1254_v34 = vpop.f32.mrb[3].mxu0  ;;  %v1325_v35 = vpop.f32.mrb[3].mxu1  ;;  %v7825_v23 = vadd.f32 %v1323_v18, %v8803_v17  ;;  %v1810_v12 = vld [vmem:[#allocation4 + $0x28] sm:$0xff]  ;;  %v1808_v18 = vld [vmem:[#allocation4 + $0x18] sm:$0xff] }
 0x264   :  { %v7810_v42 = vadd.f32 %v1254_v34, %v8795_v8  ;;  %7943 = vtanh.f32 %v8917_v9  ;;  %v7826_v6 = vadd.f32 %v1325_v35, %v8807_v63  ;;  %v10745_v34 = vld [vmem:[#allocation58_spill] sm:$0xff]  ;;  %v10746_v35 = vld [vmem:[#allocation59_spill] sm:$0xff] }
 0x265   :  { %v6126_v48 = vmul.f32 -1.442695, %v7809_v19  ;;  %v1812_v19 = vld [vmem:[#allocation4 + $0x38] sm:$0xff] }
 0x266   :  { %v6127_v49 = vmul.f32 -1.442695, %v7810_v42  ;;  %v6128_v16 = vmul.f32 -1.442695, %v7826_v6  ;;  %v1805_v42 = vld [vmem:[#allocation4] sm:$0xff] }
 0x267   :  { %7945 = vpow2.f32 %v6126_v48  ;;  %v1809_v48 = vld [vmem:[#allocation4 + $0x20] sm:$0xff] }
 0x268   :  { %7947 = vpow2.f32 %v6127_v49  ;;  %v10747_v49 = vld [vmem:[#allocation60_spill] sm:$0xff]  ;;  %v10748_v6 = vld [vmem:[#allocation61_spill] sm:$0xff] }
 0x269   :  { %7949 = vpow2.f32 %v6128_v16  ;;  %v1807_v16 = vld [vmem:[#allocation4 + $0x10] sm:$0xff] }
 0x26a   :  { %7951 = vtanh.f32 %v7825_v23  ;;  %v1811_v23 = vld [vmem:[#allocation4 + $0x30] sm:$0xff] }
 0x26e   :  { %v7944_v15 = vpop.eup %7943 }
 0x26f   :  { %v8924_v24 = vmul.f32 %v7944_v15, %v7942_v7  ;;  %v8962_v7 = vpack.c.bf16 %v1810_v12, %v1806_v51  ;;  %v8964_v15 = vpack.c.bf16 %v1812_v19, %v1808_v18  ;;  %v1829_v51 = vld [vmem:[#allocation4 + $0xc0] sm:$0xff] }
 0x270   :  { %v1833_v12 = vld [vmem:[#allocation4 + $0xe0] sm:$0xff] }
 0x271   :  { %10720 = vst [vmem:[#allocation21_spill] sm:$0xff] %v8924_v24  ;;  %v7946_v31 = vpop.eup %7945  ;;  %1457 = vmatmul.mubr.f32.vlgmr.msra.gmra.mrb[18].mxu0 %v8924_v24  ;;  %1528 = vmatmul.mubr.f32.vlgmr.msra.gmra.mrb[20].mxu1 %v8924_v24 }
 0x272   :  { %v7948_v32 = vpop.eup %7947  ;;  %v1548_v39 = vadd.f32 1.0, %v7946_v31  ;;  %6560 = vmatpush1.bf16.msra.mxu0 %v10721_v40  ;;  %6592 = vmatpush1.bf16.msra.mxu1 %v10722_v47  ;;  %v1814_v31 = vld [vmem:[#allocation4 + $0x48] sm:$0xff]  ;;  %v1820_v40 = vld [vmem:[#allocation4 + $0x78] sm:$0xff] }
 0x273   :  { %v1554_v50 = vadd.f32 1.0, %v7948_v32  ;;  %6562 = vmatprep.subr.bf16.mxu0 %v10723_v55  ;;  %6594 = vmatprep.subr.bf16.mxu1 %v10724_v56  ;;  %v7950_v54 = vpop.eup %7949  ;;  %v1818_v32 = vld [vmem:[#allocation4 + $0x68] sm:$0xff]  ;;  %v10750_v56 = vld [vmem:[#allocation63_spill] sm:$0xff] }
 0x274   :  { %7953 = vrcp.f32 %v1548_v39  ;;  %1697 = vmatprep.mubr.f32.mxu0 %v10666_v43  ;;  %1768 = vmatprep.mubr.f32.mxu1 %v10666_v43  ;;  %v7952_v57 = vpop.eup %7951  ;;  %v1561_v45 = vadd.f32 1.0, %v7950_v54  ;;  %v1816_v39 = vld [vmem:[#allocation4 + $0x58] sm:$0xff]  ;;  %v10749_v55 = vld [vmem:[#allocation62_spill] sm:$0xff]  ;;  %v1819_v54 = vld [vmem:[#allocation4 + $0x70] sm:$0xff] }
 0x275   :  { %7955 = vrcp.f32 %v1554_v50 }
 0x276   :  { %6564 = vmatpush1.bf16.msra.mxu0 %v10725_v59  ;;  %6596 = vmatpush1.bf16.msra.mxu1 %v10726_v1  ;;  %7957 = vrcp.f32 %v1561_v45  ;;  %v8968_v59 = vpack.c.bf16 %v1809_v48, %v1805_v42  ;;  %v8970_v1 = vpack.c.bf16 %v1811_v23, %v1807_v16  ;;  %v1821_v45 = vld [vmem:[#allocation4 + $0x80] sm:$0xff]  ;;  %v1838_v42 = vld [vmem:[#allocation4 + $0x108] sm:$0xff]  ;;  %v9010_v16 = vpack.c.bf16 %v1833_v12, %v1829_v51 }
 0x277   :  { %6566 = vmatprep.subr.bf16.mxu0 %v10727_v13  ;;  %6598 = vmatprep.subr.bf16.mxu1 %v10728_v22  ;;  %v1813_v13 = vld [vmem:[#allocation4 + $0x40] sm:$0xff]  ;;  %v1842_v48 = vld [vmem:[#allocation4 + $0x128] sm:$0xff] }
 0x278   :  { %v1817_v22 = vld [vmem:[#allocation4 + $0x60] sm:$0xff] }
 0x27a   :  { %6568 = vmatpush1.bf16.msra.mxu0 %v10729_v30  ;;  %6600 = vmatpush1.bf16.msra.mxu1 %v10730_v33  ;;  %v8976_v33 = vpack.c.bf16 %v1818_v32, %v1814_v31  ;;  %v1837_v31 = vld [vmem:[#allocation4 + $0x100] sm:$0xff] }
 0x27b   :  { %6570 = vmatprep.subr.bf16.mxu0 %v10731_v38  ;;  %6602 = vmatprep.subr.bf16.mxu1 %v10732_v46  ;;  %v8978_v38 = vpack.c.bf16 %v1820_v40, %v1816_v39  ;;  %v1815_v46 = vld [vmem:[#allocation4 + $0x50] sm:$0xff]  ;;  %v1841_v32 = vld [vmem:[#allocation4 + $0x120] sm:$0xff]  ;;  %v9016_v39 = vpack.c.bf16 %v1842_v48, %v1838_v42  ;;  %v1864_v42 = vld [vmem:[#allocation4 + $0x1d8] sm:$0xff] }
 0x27c   :  { %v1868_v48 = vld [vmem:[#allocation4 + $0x1f8] sm:$0xff] }
 0x27e   :  { %v7954_v61 = vpop.eup %7953  ;;  %6572 = vmatpush1.bf16.msra.mxu0 %v10733_v10  ;;  %6604 = vmatpush1.bf16.msra.mxu1 %v10734_v21  ;;  %v1824_v10 = vld [vmem:[#allocation4 + $0x98] sm:$0xff] }
 0x27f   :  { %v7956_v29 = vpop.eup %7955  ;;  %v1565_v28 = vmul.f32 %v7954_v61, %v7952_v57  ;;  %6574 = vmatprep.subr.bf16.mxu0 %v10735_v62  ;;  %6606 = vmatprep.subr.bf16.mxu1 %v10736_v0  ;;  %v1822_v57 = vld [vmem:[#allocation4 + $0x88] sm:$0xff]  ;;  %v1828_v21 = vld [vmem:[#allocation4 + $0xb8] sm:$0xff]  ;;  %v1825_v62 = vld [vmem:[#allocation4 + $0xa0] sm:$0xff] }
 0x280   :  { %v1564_v36 = vmul.f32 %v7956_v29, %v8814_v53  ;;  %v10744_v53 = vld [vmem:[#allocation57_spill] sm:$0xff]  ;;  %v7958_v47 = vpop.eup %7957  ;;  %v1826_v61 = vld [vmem:[#allocation4 + $0xa8] sm:$0xff]  ;;  %v8984_v29 = vpack.c.bf16 %v1817_v22, %v1813_v13  ;;  %v1848_v13 = vld [vmem:[#allocation4 + $0x158] sm:$0xff] }
 0x281   :  { %v8990_v0 = vpack.c.bf16 %v1826_v61, %v1822_v57  ;;  %v1852_v22 = vld [vmem:[#allocation4 + $0x178] sm:$0xff]  ;;  %v1845_v57 = vld [vmem:[#allocation4 + $0x140] sm:$0xff] }
 0x282   :  { %v8947_v5 = vadd.f32 %v1565_v28, %v1564_v36  ;;  %6576 = vmatpush1.bf16.msra.mxu0 %v10737_v27  ;;  %6608 = vmatpush1.bf16.msra.mxu1 %v10738_v37  ;;  %v8986_v28 = vpack.c.bf16 %v1819_v54, %v1815_v46  ;;  %v8992_v36 = vpack.c.bf16 %v1828_v21, %v1824_v10  ;;  %v1823_v27 = vld [vmem:[#allocation4 + $0x90] sm:$0xff]  ;;  %v1849_v61 = vld [vmem:[#allocation4 + $0x160] sm:$0xff] }
 0x283   :  { %6578 = vmatprep.subr.bf16.mxu0 %v10739_v52  ;;  %6610 = vmatprep.subr.bf16.mxu1 %v10740_v58  ;;  %v1827_v37 = vld [vmem:[#allocation4 + $0xb0] sm:$0xff]  ;;  %v1830_v52 = vld [vmem:[#allocation4 + $0xc8] sm:$0xff]  ;;  %v9022_v46 = vpack.c.bf16 %v1841_v32, %v1837_v31  ;;  %v9030_v21 = vpack.c.bf16 %v1852_v22, %v1848_v13  ;;  %v2011_v13 = vld [vmem:[#allocation9] sm:$0xff] }
 0x284   :  { %7959 = vtanh.f32 %v8947_v5  ;;  %v1834_v58 = vld [vmem:[#allocation4 + $0xe8] sm:$0xff]  ;;  %v1863_v31 = vld [vmem:[#allocation4 + $0x1d0] sm:$0xff]  ;;  %v2015_v22 = vld [vmem:[#allocation9 + $0x20] sm:$0xff] }
 0x285   :  { %v9004_v18 = vpack.c.bf16 %v1834_v58, %v1830_v52  ;;  %v1856_v52 = vld [vmem:[#allocation4 + $0x198] sm:$0xff]  ;;  %v1867_v32 = vld [vmem:[#allocation4 + $0x1f0] sm:$0xff] }
 0x286   :  { %6580 = vmatpush1.bf16.msra.mxu0 %v10741_v11  ;;  %6612 = vmatpush1.bf16.msra.mxu1 %v10742_v60  ;;  %v1832_v11 = vld [vmem:[#allocation4 + $0xd8] sm:$0xff] }
 0x287   :  { %6582 = vmatprep.subr.bf16.mxu0 %v10743_v2  ;;  %6614 = vmatprep.subr.bf16.mxu1 %v10744_v53  ;;  %v1836_v60 = vld [vmem:[#allocation4 + $0xf8] sm:$0xff]  ;;  %v8998_v2 = vpack.c.bf16 %v1825_v62, %v1821_v45  ;;  %v9000_v53 = vpack.c.bf16 %v1827_v37, %v1823_v27  ;;  %v1847_v45 = vld [vmem:[#allocation4 + $0x150] sm:$0xff]  ;;  %v1854_v27 = vld [vmem:[#allocation4 + $0x188] sm:$0xff] }
 0x288   :  { %v9006_v19 = vpack.c.bf16 %v1836_v60, %v1832_v11  ;;  %v1851_v62 = vld [vmem:[#allocation4 + $0x170] sm:$0xff]  ;;  %v1858_v37 = vld [vmem:[#allocation4 + $0x1a8] sm:$0xff]  ;;  %v1860_v58 = vld [vmem:[#allocation4 + $0x1b8] sm:$0xff]  ;;  %v9034_v11 = vpack.c.bf16 %v1849_v61, %v1845_v57 }
 0x289   :  { %v9036_v60 = vpack.c.bf16 %v1851_v62, %v1847_v45  ;;  %v9040_v51 = vpack.c.bf16 %v1858_v37, %v1854_v27  ;;  %v9042_v12 = vpack.c.bf16 %v1860_v58, %v1856_v52  ;;  %v2013_v61 = vld [vmem:[#allocation9 + $0x10] sm:$0xff]  ;;  %v2020_v62 = vld [vmem:[#allocation9 + $0x48] sm:$0xff]  ;;  %v2022_v37 = vld [vmem:[#allocation9 + $0x58] sm:$0xff] }
 0x28a   :  { %6584 = vmatpush1.bf16.msra.mxu0 %v10745_v34  ;;  %6616 = vmatpush1.bf16.msra.mxu1 %v10746_v35  ;;  %v1831_v34 = vld [vmem:[#allocation4 + $0xd0] sm:$0xff]  ;;  %v2024_v27 = vld [vmem:[#allocation9 + $0x68] sm:$0xff]  ;;  %v2026_v58 = vld [vmem:[#allocation9 + $0x78] sm:$0xff] }
 0x28b   :  { %6586 = vmatprep.subr.bf16.mxu0 %v10747_v49  ;;  %6618 = vmatprep.subr.bf16.mxu1 %v10748_v6  ;;  %v1835_v35 = vld [vmem:[#allocation4 + $0xf0] sm:$0xff]  ;;  %v1840_v49 = vld [vmem:[#allocation4 + $0x118] sm:$0xff]  ;;  %v9076_v52 = vpack.c.bf16 %v2024_v27, %v2020_v62 }
 0x28c   :  { %v1844_v6 = vld [vmem:[#allocation4 + $0x138] sm:$0xff]  ;;  %v9012_v23 = vpack.c.bf16 %v1835_v35, %v1831_v34  ;;  %v1855_v34 = vld [vmem:[#allocation4 + $0x190] sm:$0xff] }
 0x28d   :  { %v9018_v40 = vpack.c.bf16 %v1844_v6, %v1840_v49  ;;  %v1859_v35 = vld [vmem:[#allocation4 + $0x1b0] sm:$0xff]  ;;  %v9050_v6 = vpack.c.bf16 %v1868_v48, %v1864_v42  ;;  %v9078_v42 = vpack.c.bf16 %v2026_v58, %v2022_v37 }
 0x28e   :  { %v7960_v50 = vpop.eup %7959  ;;  %6588 = vmatpush1.bf16.msra.mxu0 %v10749_v55  ;;  %6620 = vmatpush1.bf16.msra.mxu1 %v10750_v56  ;;  %v1846_v55 = vld [vmem:[#allocation4 + $0x148] sm:$0xff]  ;;  %v9046_v49 = vpack.c.bf16 %v1859_v35, %v1855_v34  ;;  %v2017_v45 = vld [vmem:[#allocation9 + $0x30] sm:$0xff]  ;;  %v2019_v34 = vld [vmem:[#allocation9 + $0x40] sm:$0xff] }
 0x28f   :  { %v8972_v30 = vmul.f32 %v7960_v50, %v7958_v47  ;;  %6622 = vmatprep.subr.bf16.mxu0 %v8962_v7  ;;  %6654 = vmatprep.subr.bf16.mxu1 %v8964_v15  ;;  %v1839_v47 = vld [vmem:[#allocation4 + $0x110] sm:$0xff]  ;;  %v1850_v56 = vld [vmem:[#allocation4 + $0x168] sm:$0xff]  ;;  %v2023_v35 = vld [vmem:[#allocation9 + $0x60] sm:$0xff] }
 0x290   :  { %v1843_v50 = vld [vmem:[#allocation4 + $0x130] sm:$0xff]  ;;  %v9028_v10 = vpack.c.bf16 %v1850_v56, %v1846_v55  ;;  %v2014_v55 = vld [vmem:[#allocation9 + $0x18] sm:$0xff]  ;;  %v9080_v48 = vpack.c.bf16 %v2023_v35, %v2019_v34  ;;  %v2036_v35 = vld [vmem:[#allocation9 + $0xc8] sm:$0xff] }
 0x291   :  { %1698 = vmatmul.mubr.f32.vlgmr.msra.gmra.mrb[18].mxu0 %v8972_v30  ;;  %1769 = vmatmul.mubr.f32.vlgmr.msra.gmra.mrb[20].mxu1 %v8972_v30  ;;  %v9024_v54 = vpack.c.bf16 %v1843_v50, %v1839_v47  ;;  %v9054_v47 = vpack.c.bf16 %v1867_v32, %v1863_v31  ;;  %v2016_v50 = vld [vmem:[#allocation9 + $0x28] sm:$0xff]  ;;  %v2021_v31 = vld [vmem:[#allocation9 + $0x50] sm:$0xff] }
 0x292   :  { %6624 = vmatpush1.bf16.msra.mxu0 %v8968_v59  ;;  %6656 = vmatpush1.bf16.msra.mxu1 %v8970_v1  ;;  %10751 = vst [vmem:[#allocation22_spill] sm:$0xff] %v9080_v48  ;;  %v2025_v32 = vld [vmem:[#allocation9 + $0x70] sm:$0xff] }
 0x293   :  { %6626 = vmatprep.subr.bf16.mxu0 %v8976_v33  ;;  %6658 = vmatprep.subr.bf16.mxu1 %v8978_v38  ;;  %v2029_v37 = vld [vmem:[#allocation9 + $0x90] sm:$0xff] }
 0x294   :  { %1933 = vmatprep.mubr.f32.mxu0 %v10666_v43  ;;  %2004 = vmatprep.mubr.f32.mxu1 %v10666_v43  ;;  %v2033_v58 = vld [vmem:[#allocation9 + $0xb0] sm:$0xff] }
 0x295   :  { %v9095_v34 = vpack.c.bf16 %v2033_v58, %v2029_v37  ;;  %v2037_v37 = vld [vmem:[#allocation9 + $0xd0] sm:$0xff] }
 0x296   :  { %6628 = vmatpush1.bf16.msra.mxu0 %v8984_v29  ;;  %6660 = vmatpush1.bf16.msra.mxu1 %v8986_v28  ;;  %v2041_v58 = vld [vmem:[#allocation9 + $0xf0] sm:$0xff] }
 0x297   :  { %6630 = vmatprep.subr.bf16.mxu0 %v8990_v0  ;;  %6662 = vmatprep.subr.bf16.mxu1 %v8992_v36  ;;  %10756 = vst [vmem:[#allocation27_spill] sm:$0xff] %v9095_v34  ;;  %v9107_v24 = vpack.c.bf16 %v2041_v58, %v2037_v37  ;;  %v2045_v37 = vld [vmem:[#allocation9 + $0x110] sm:$0xff] }
 0x298   :  { %v2049_v58 = vld [vmem:[#allocation9 + $0x130] sm:$0xff] }
 0x299   :  { %10760 = vst [vmem:[#allocation31_spill] sm:$0xff] %v9107_v24 }
 0x29a   :  { %6632 = vmatpush1.bf16.msra.mxu0 %v8998_v2  ;;  %6664 = vmatpush1.bf16.msra.mxu1 %v9000_v53 }
 0x29b   :  { %6634 = vmatprep.subr.bf16.mxu0 %v9004_v18  ;;  %6666 = vmatprep.subr.bf16.mxu1 %v9006_v19 }
 0x29e   :  { %6636 = vmatpush1.bf16.msra.mxu0 %v9010_v16  ;;  %6668 = vmatpush1.bf16.msra.mxu1 %v9012_v23 }
 0x29f   :  { %6638 = vmatprep.subr.bf16.mxu0 %v9016_v39  ;;  %6670 = vmatprep.subr.bf16.mxu1 %v9018_v40 }
 0x2a2   :  { %6640 = vmatpush1.bf16.msra.mxu0 %v9022_v46  ;;  %6672 = vmatpush1.bf16.msra.mxu1 %v9024_v54 }
 0x2a3   :  { %6642 = vmatprep.subr.bf16.mxu0 %v9028_v10  ;;  %6674 = vmatprep.subr.bf16.mxu1 %v9030_v21 }
 0x2a6   :  { %6644 = vmatpush1.bf16.msra.mxu0 %v9034_v11  ;;  %6676 = vmatpush1.bf16.msra.mxu1 %v9036_v60 }
 0x2a7   :  { %6646 = vmatprep.subr.bf16.mxu0 %v9040_v51  ;;  %6678 = vmatprep.subr.bf16.mxu1 %v9042_v12 }
 0x2aa   :  { %6648 = vmatpush1.bf16.msra.mxu0 %v8841_v25  ;;  %6680 = vmatpush1.bf16.msra.mxu1 %v9046_v49  ;;  %v2012_v25 = vld [vmem:[#allocation9 + $0x8] sm:$0xff] }
 0x2ab   :  { %6650 = vmatprep.subr.bf16.mxu0 %v8845_v26  ;;  %6682 = vmatprep.subr.bf16.mxu1 %v9050_v6  ;;  %v9064_v56 = vpack.c.bf16 %v2016_v50, %v2012_v25  ;;  %v2018_v26 = vld [vmem:[#allocation9 + $0x38] sm:$0xff]  ;;  %v9083_v25 = vpack.c.bf16 %v2025_v32, %v2021_v31  ;;  %v2028_v50 = vld [vmem:[#allocation9 + $0x88] sm:$0xff] }
 0x2ac   :  { %v9066_v57 = vpack.c.bf16 %v2018_v26, %v2014_v55  ;;  %v2032_v55 = vld [vmem:[#allocation9 + $0xa8] sm:$0xff]  ;;  %v2030_v26 = vld [vmem:[#allocation9 + $0x98] sm:$0xff] }
 0x2ad   :  { %10752 = vst [vmem:[#allocation23_spill] sm:$0xff] %v9083_v25  ;;  %v2040_v31 = vld [vmem:[#allocation9 + $0xe8] sm:$0xff]  ;;  %v2038_v32 = vld [vmem:[#allocation9 + $0xd8] sm:$0xff] }
 0x2ae   :  { %6652 = vmatpush1.bf16.msra.mxu0 %v8849_v41  ;;  %6684 = vmatpush1.bf16.msra.mxu1 %v9054_v47  ;;  %v9068_v41 = vpack.c.bf16 %v2015_v22, %v2011_v13  ;;  %v9088_v13 = vpack.c.bf16 %v2032_v55, %v2028_v50  ;;  %v2034_v22 = vld [vmem:[#allocation9 + $0xb8] sm:$0xff]  ;;  %v9100_v50 = vpack.c.bf16 %v2040_v31, %v2036_v35  ;;  %v2048_v35 = vld [vmem:[#allocation9 + $0x128] sm:$0xff] }
 0x2af   :  { %6686 = vmatprep.subr.bf16.mxu0 %v9064_v56  ;;  %6718 = vmatprep.subr.bf16.mxu1 %v9066_v57  ;;  %v9090_v62 = vpack.c.bf16 %v2034_v22, %v2030_v26  ;;  %v2042_v55 = vld [vmem:[#allocation9 + $0xf8] sm:$0xff]  ;;  %v2035_v26 = vld [vmem:[#allocation9 + $0xc0] sm:$0xff] }
 0x2b0   :  { %10753 = vst [vmem:[#allocation24_spill] sm:$0xff] %v9088_v13  ;;  %10757 = vst [vmem:[#allocation28_spill] sm:$0xff] %v9100_v50  ;;  %v2039_v22 = vld [vmem:[#allocation9 + $0xe0] sm:$0xff]  ;;  %v2046_v31 = vld [vmem:[#allocation9 + $0x118] sm:$0xff] }
 0x2b1   :  { %1934 = vmatmul.mubr.f32.vlgmr.msra.gmra.mrb[4].mxu0 %v8972_v30  ;;  %2005 = vmatmul.mubr.f32.vlgmr.msra.gmra.mrb[4].mxu1 %v8972_v30  ;;  %v9071_v30 = vpack.c.bf16 %v2017_v45, %v2013_v61  ;;  %v2027_v61 = vld [vmem:[#allocation9 + $0x80] sm:$0xff]  ;;  %10754 = vst [vmem:[#allocation25_spill] sm:$0xff] %v9090_v62 }
 0x2b2   :  { %2139 = vmatprep.mubr.f32.mxu0 %v10666_v43  ;;  %2210 = vmatprep.mubr.f32.mxu1 %v10666_v43  ;;  %v2031_v45 = vld [vmem:[#allocation9 + $0xa0] sm:$0xff] }
 0x2b3   :  { %6688 = vmatpush1.bf16.msra.mxu0 %v9068_v41  ;;  %6720 = vmatpush1.bf16.msra.mxu1 %v9071_v30  ;;  %v9092_v27 = vpack.c.bf16 %v2031_v45, %v2027_v61  ;;  %v9102_v61 = vpack.c.bf16 %v2042_v55, %v2038_v32  ;;  %v9104_v45 = vpack.c.bf16 %v2039_v22, %v2035_v26  ;;  %v2050_v32 = vld [vmem:[#allocation9 + $0x138] sm:$0xff]  ;;  %v2043_v55 = vld [vmem:[#allocation9 + $0x100] sm:$0xff] }
 0x2b4   :  { %6690 = vmatprep.subr.bf16.mxu0 %v9076_v52  ;;  %6722 = vmatprep.subr.bf16.mxu1 %v9078_v42  ;;  %v2047_v26 = vld [vmem:[#allocation9 + $0x120] sm:$0xff]  ;;  %v9114_v22 = vpack.c.bf16 %v2050_v32, %v2046_v31  ;;  %v2058_v31 = vld [vmem:[#allocation9 + $0x178] sm:$0xff] }
 0x2b5   :  { %10755 = vst [vmem:[#allocation26_spill] sm:$0xff] %v9092_v27  ;;  %10758 = vst [vmem:[#allocation29_spill] sm:$0xff] %v9102_v61  ;;  %v2051_v32 = vld [vmem:[#allocation9 + $0x140] sm:$0xff] }
 0x2b6   :  { %10759 = vst [vmem:[#allocation30_spill] sm:$0xff] %v9104_v45  ;;  %10762 = vst [vmem:[#allocation33_spill] sm:$0xff] %v9114_v22 }
 0x2b7   :  { %6692 = vmatpush1.bf16.msra.mxu0 %v9080_v48  ;;  %6724 = vmatpush1.bf16.msra.mxu1 %v9083_v25  ;;  %v2273_v25 = vld [vmem:[#allocation7 + $0xa8] sm:$0xff]  ;;  %v2271_v48 = vld [vmem:[#allocation7 + $0x98] sm:$0xff] }
 0x2b8   :  { %6694 = vmatprep.subr.bf16.mxu0 %v9088_v13  ;;  %6726 = vmatprep.subr.bf16.mxu1 %v9090_v62  ;;  %v9116_v62 = vpack.c.bf16 %v2047_v26, %v2043_v55  ;;  %v2055_v55 = vld [vmem:[#allocation9 + $0x160] sm:$0xff]  ;;  %v2269_v13 = vld [vmem:[#allocation7 + $0x88] sm:$0xff] }
 0x2ba   :  { %10763 = vst [vmem:[#allocation34_spill] sm:$0xff] %v9116_v62 }
 0x2bb   :  { %6696 = vmatpush1.bf16.msra.mxu0 %v9092_v27  ;;  %6728 = vmatpush1.bf16.msra.mxu1 %v9095_v34  ;;  %v2044_v34 = vld [vmem:[#allocation9 + $0x108] sm:$0xff] }
 0x2bc   :  { %6698 = vmatprep.subr.bf16.mxu0 %v9100_v50  ;;  %6730 = vmatprep.subr.bf16.mxu1 %v9102_v61  ;;  %v9112_v27 = vpack.c.bf16 %v2048_v35, %v2044_v34  ;;  %v9119_v61 = vpack.c.bf16 %v2049_v58, %v2045_v37  ;;  %v2056_v34 = vld [vmem:[#allocation9 + $0x168] sm:$0xff]  ;;  %v2054_v35 = vld [vmem:[#allocation9 + $0x158] sm:$0xff]  ;;  %v9128_v50 = vpack.c.bf16 %v2055_v55, %v2051_v32  ;;  %v2053_v37 = vld [vmem:[#allocation9 + $0x150] sm:$0xff] }
 0x2bd   :  { %v9126_v26 = vpack.c.bf16 %v2058_v31, %v2054_v35  ;;  %v2057_v58 = vld [vmem:[#allocation9 + $0x170] sm:$0xff]  ;;  %v2066_v35 = vld [vmem:[#allocation9 + $0x1b8] sm:$0xff]  ;;  %v2059_v31 = vld [vmem:[#allocation9 + $0x180] sm:$0xff] }
 0x2be   :  { %10761 = vst [vmem:[#allocation32_spill] sm:$0xff] %v9112_v27  ;;  %10764 = vst [vmem:[#allocation35_spill] sm:$0xff] %v9119_v61  ;;  %v2063_v32 = vld [vmem:[#allocation9 + $0x1a0] sm:$0xff] }
 0x2bf   :  { %6700 = vmatpush1.bf16.msra.mxu0 %v9104_v45  ;;  %6732 = vmatpush1.bf16.msra.mxu1 %v9107_v24  ;;  %v2052_v24 = vld [vmem:[#allocation9 + $0x148] sm:$0xff]  ;;  %10766 = vst [vmem:[#allocation37_spill] sm:$0xff] %v9126_v26  ;;  %10767 = vst [vmem:[#allocation38_spill] sm:$0xff] %v9128_v50 }
 0x2c0   :  { %6702 = vmatprep.subr.bf16.mxu0 %v9112_v27  ;;  %6734 = vmatprep.subr.bf16.mxu1 %v9114_v22  ;;  %v9124_v45 = vpack.c.bf16 %v2056_v34, %v2052_v24  ;;  %v9131_v22 = vpack.c.bf16 %v2057_v58, %v2053_v37  ;;  %v2064_v24 = vld [vmem:[#allocation9 + $0x1a8] sm:$0xff]  ;;  %v2062_v34 = vld [vmem:[#allocation9 + $0x198] sm:$0xff]  ;;  %v9140_v27 = vpack.c.bf16 %v2063_v32, %v2059_v31  ;;  %v2061_v37 = vld [vmem:[#allocation9 + $0x190] sm:$0xff] }
 0x2c1   :  { %v9138_v55 = vpack.c.bf16 %v2066_v35, %v2062_v34  ;;  %v2065_v58 = vld [vmem:[#allocation9 + $0x1b0] sm:$0xff]  ;;  %v2074_v34 = vld [vmem:[#allocation9 + $0x1f8] sm:$0xff]  ;;  %v2067_v35 = vld [vmem:[#allocation9 + $0x1c0] sm:$0xff] }
 0x2c2   :  { %10765 = vst [vmem:[#allocation36_spill] sm:$0xff] %v9124_v45  ;;  %10768 = vst [vmem:[#allocation39_spill] sm:$0xff] %v9131_v22  ;;  %v2071_v31 = vld [vmem:[#allocation9 + $0x1e0] sm:$0xff] }
 0x2c3   :  { %6704 = vmatpush1.bf16.msra.mxu0 %v9116_v62  ;;  %6736 = vmatpush1.bf16.msra.mxu1 %v9119_v61  ;;  %v2060_v61 = vld [vmem:[#allocation9 + $0x188] sm:$0xff]  ;;  %10770 = vst [vmem:[#allocation41_spill] sm:$0xff] %v9138_v55  ;;  %10771 = vst [vmem:[#allocation42_spill] sm:$0xff] %v9140_v27 }
 0x2c4   :  { %6706 = vmatprep.subr.bf16.mxu0 %v9124_v45  ;;  %6738 = vmatprep.subr.bf16.mxu1 %v9126_v26  ;;  %v9136_v62 = vpack.c.bf16 %v2064_v24, %v2060_v61  ;;  %v9143_v26 = vpack.c.bf16 %v2065_v58, %v2061_v37  ;;  %v2072_v61 = vld [vmem:[#allocation9 + $0x1e8] sm:$0xff]  ;;  %v2070_v24 = vld [vmem:[#allocation9 + $0x1d8] sm:$0xff]  ;;  %v9152_v45 = vpack.c.bf16 %v2071_v31, %v2067_v35  ;;  %v2069_v37 = vld [vmem:[#allocation9 + $0x1d0] sm:$0xff] }
 0x2c5   :  { %v9150_v32 = vpack.c.bf16 %v2074_v34, %v2070_v24  ;;  %v2073_v58 = vld [vmem:[#allocation9 + $0x1f0] sm:$0xff]  ;;  %v2259_v24 = vld [vmem:[#allocation7 + $0x38] sm:$0xff] }
 0x2c6   :  { %10769 = vst [vmem:[#allocation40_spill] sm:$0xff] %v9136_v62  ;;  %10772 = vst [vmem:[#allocation43_spill] sm:$0xff] %v9143_v26 }
 0x2c7   :  { %6708 = vmatpush1.bf16.msra.mxu0 %v9128_v50  ;;  %6740 = vmatpush1.bf16.msra.mxu1 %v9131_v22  ;;  %v2068_v22 = vld [vmem:[#allocation9 + $0x1c8] sm:$0xff]  ;;  %10774 = vst [vmem:[#allocation45_spill] sm:$0xff] %v9150_v32  ;;  %10775 = vst [vmem:[#allocation46_spill] sm:$0xff] %v9152_v45 }
 0x2c8   :  { %6710 = vmatprep.subr.bf16.mxu0 %v9136_v62  ;;  %6742 = vmatprep.subr.bf16.mxu1 %v9138_v55  ;;  %v9148_v50 = vpack.c.bf16 %v2072_v61, %v2068_v22  ;;  %v9155_v55 = vpack.c.bf16 %v2073_v58, %v2069_v37  ;;  %v2257_v22 = vld [vmem:[#allocation7 + $0x28] sm:$0xff]  ;;  %v2255_v61 = vld [vmem:[#allocation7 + $0x18] sm:$0xff] }
 0x2c9   :  { %v9162_v34 = vpack.c.bf16 %v2259_v24, %v2255_v61 }
 0x2ca   :  { %10773 = vst [vmem:[#allocation44_spill] sm:$0xff] %v9148_v50  ;;  %10776 = vst [vmem:[#allocation47_spill] sm:$0xff] %v9155_v55 }
 0x2cb   :  { %6712 = vmatpush1.bf16.msra.mxu0 %v9140_v27  ;;  %6744 = vmatpush1.bf16.msra.mxu1 %v9143_v26  ;;  %v2253_v26 = vld [vmem:[#allocation7 + $0x8] sm:$0xff]  ;;  %10778 = vst [vmem:[#allocation49_spill] sm:$0xff] %v9162_v34 }
 0x2cc   :  { %6714 = vmatprep.subr.bf16.mxu0 %v9148_v50  ;;  %6746 = vmatprep.subr.bf16.mxu1 %v9150_v32  ;;  %v9160_v27 = vpack.c.bf16 %v2257_v22, %v2253_v26 }
 0x2ce   :  { %10777 = vst [vmem:[#allocation48_spill] sm:$0xff] %v9160_v27 }
 0x2cf   :  { %6716 = vmatpush1.bf16.msra.mxu0 %v9152_v45  ;;  %6748 = vmatpush1.bf16.msra.mxu1 %v9155_v55 }
 0x2d0   :  { %6750 = vmatprep.subr.bf16.mxu0 %v9160_v27  ;;  %6782 = vmatprep.subr.bf16.mxu1 %v9162_v34 }
 0x364   :  { %v1699_v35 = vpop.f32.mrb[18].mxu0  ;;  %v1770_v31 = vpop.f32.mrb[20].mxu1 }
 0x365   :  { %v1775_v37 = vadd.f32 %v1699_v35, %v8896_v3  ;;  %v1701_v58 = vpop.f32.mrb[19].mxu0  ;;  %v1772_v45 = vpop.f32.mrb[21].mxu1  ;;  %v1777_v61 = vadd.f32 %v1770_v31, %v8911_v44 }
 0x366   :  { %v1776_v32 = vadd.f32 %v1701_v58, %v8900_v14  ;;  %v1778_v26 = vadd.f32 %v1772_v45, %v8906_v20  ;;  %v2266_v14 = vld [vmem:[#allocation7 + $0x70] sm:$0xff] }
 0x367   :  { %v6129_v50 = vmul.f32 -1.442695, %v1775_v37 }
 0x368   :  { %v6130_v62 = vmul.f32 -1.442695, %v1776_v32  ;;  %v6131_v22 = vmul.f32 -1.442695, %v1778_v26 }
 0x369   :  { %7961 = vpow2.f32 %v6129_v50 }
 0x36a   :  { %7963 = vpow2.f32 %v6130_v62 }
 0x36b   :  { %7965 = vpow2.f32 %v6131_v22 }
 0x36c   :  { %7967 = vtanh.f32 %v1777_v61 }
 0x373   :  { %v7962_v24 = vpop.eup %7961 }
 0x374   :  { %v7964_v27 = vpop.eup %7963  ;;  %v1782_v34 = vadd.f32 1.0, %v7962_v24 }
 0x375   :  { %v1788_v55 = vadd.f32 1.0, %v7964_v27  ;;  %v7966_v35 = vpop.eup %7965 }
 0x376   :  { %7969 = vrcp.f32 %v1782_v34  ;;  %v7968_v3 = vpop.eup %7967  ;;  %v1795_v50 = vadd.f32 1.0, %v7966_v35  ;;  %v2256_v35 = vld [vmem:[#allocation7 + $0x20] sm:$0xff] }
 0x377   :  { %7971 = vrcp.f32 %v1788_v55 }
 0x378   :  { %7973 = vrcp.f32 %v1795_v50  ;;  %v2265_v50 = vld [vmem:[#allocation7 + $0x68] sm:$0xff] }
 0x380   :  { %v7970_v58 = vpop.eup %7969 }
 0x381   :  { %v7972_v37 = vpop.eup %7971  ;;  %v1799_v32 = vmul.f32 %v7970_v58, %v7968_v3  ;;  %v2254_v58 = vld [vmem:[#allocation7 + $0x10] sm:$0xff] }
 0x382   :  { %v1798_v62 = vmul.f32 %v7972_v37, %v8917_v9  ;;  %v2252_v9 = vld [vmem:[#allocation7] sm:$0xff]  ;;  %v2258_v37 = vld [vmem:[#allocation7 + $0x30] sm:$0xff] }
 0x384   :  { %v9171_v45 = vadd.f32 %v1799_v32, %v1798_v62  ;;  %v1935_v26 = vpop.f32.mrb[4].mxu0  ;;  %v2006_v31 = vpop.f32.mrb[4].mxu1  ;;  %v2261_v32 = vld [vmem:[#allocation7 + $0x48] sm:$0xff]  ;;  %v2263_v62 = vld [vmem:[#allocation7 + $0x58] sm:$0xff] }
 0x385   :  { %v7811_v24 = vadd.f32 %v1935_v26, %v8791_v4  ;;  %v1937_v22 = vpop.f32.mrb[5].mxu0  ;;  %v2008_v61 = vpop.f32.mrb[5].mxu1  ;;  %v2267_v26 = vld [vmem:[#allocation7 + $0x78] sm:$0xff] }
 0x386   :  { %10779 = vst [vmem:[#allocation50_spill] sm:$0xff] %v9171_v45  ;;  %v7812_v27 = vadd.f32 %v1937_v22, %v8795_v8  ;;  %7975 = vtanh.f32 %v9171_v45  ;;  %v7828_v3 = vadd.f32 %v2008_v61, %v8807_v63  ;;  %v7974_v4 = vpop.eup %7973  ;;  %v9177_v22 = vpack.c.bf16 %v2256_v35, %v2252_v9  ;;  %v2262_v45 = vld [vmem:[#allocation7 + $0x50] sm:$0xff] }
 0x387   :  { %v6132_v55 = vmul.f32 -1.442695, %v7811_v24  ;;  %v9179_v8 = vpack.c.bf16 %v2258_v37, %v2254_v58  ;;  %v2260_v24 = vld [vmem:[#allocation7 + $0x40] sm:$0xff]  ;;  %v9186_v63 = vpack.c.bf16 %v2267_v26, %v2263_v62  ;;  %v2274_v26 = vld [vmem:[#allocation7 + $0xb0] sm:$0xff] }
 0x388   :  { %v6133_v34 = vmul.f32 -1.442695, %v7812_v27  ;;  %v6134_v20 = vmul.f32 -1.442695, %v7828_v3  ;;  %10780 = vst [vmem:[#allocation51_spill] sm:$0xff] %v9177_v22  ;;  %v2264_v27 = vld [vmem:[#allocation7 + $0x60] sm:$0xff] }
 0x389   :  { %7977 = vpow2.f32 %v6132_v55  ;;  %10781 = vst [vmem:[#allocation52_spill] sm:$0xff] %v9179_v8  ;;  %v7827_v55 = vadd.f32 %v2006_v31, %v8803_v17  ;;  %10784 = vst [vmem:[#allocation55_spill] sm:$0xff] %v9186_v63  ;;  %v2275_v3 = vld [vmem:[#allocation7 + $0xb8] sm:$0xff]  ;;  %v2268_v31 = vld [vmem:[#allocation7 + $0x80] sm:$0xff] }
 0x38a   :  { %7979 = vpow2.f32 %v6133_v34  ;;  %v9184_v34 = vpack.c.bf16 %v2265_v50, %v2261_v32  ;;  %v2272_v37 = vld [vmem:[#allocation7 + $0xa0] sm:$0xff]  ;;  %v9198_v50 = vpack.c.bf16 %v2273_v25, %v2269_v13  ;;  %v9200_v62 = vpack.c.bf16 %v2275_v3, %v2271_v48 }
 0x38b   :  { %7981 = vpow2.f32 %v6134_v20  ;;  %v2270_v20 = vld [vmem:[#allocation7 + $0x90] sm:$0xff]  ;;  %v9206_v25 = vpack.c.bf16 %v2272_v37, %v2268_v31  ;;  %v2276_v13 = vld [vmem:[#allocation7 + $0xc0] sm:$0xff] }
 0x38c   :  { %10783 = vst [vmem:[#allocation54_spill] sm:$0xff] %v9184_v34  ;;  %7983 = vtanh.f32 %v7827_v55  ;;  %10787 = vst [vmem:[#allocation58_spill] sm:$0xff] %v9198_v50  ;;  %v9208_v48 = vpack.c.bf16 %v2274_v26, %v2270_v20  ;;  %v2284_v20 = vld [vmem:[#allocation7 + $0x100] sm:$0xff] }
 0x38d   :  { %10788 = vst [vmem:[#allocation59_spill] sm:$0xff] %v9200_v62  ;;  %10789 = vst [vmem:[#allocation60_spill] sm:$0xff] %v9206_v25  ;;  %v2288_v26 = vld [vmem:[#allocation7 + $0x120] sm:$0xff] }
 0x38e   :  { %10790 = vst [vmem:[#allocation61_spill] sm:$0xff] %v9208_v48 }
 0x390   :  { %v7976_v44 = vpop.eup %7975 }
 0x391   :  { %v9182_v61 = vmul.f32 %v7976_v44, %v7974_v4  ;;  %v9192_v4 = vpack.c.bf16 %v2264_v27, %v2260_v24  ;;  %v9194_v44 = vpack.c.bf16 %v2266_v14, %v2262_v45  ;;  %v2281_v24 = vld [vmem:[#allocation7 + $0xe8] sm:$0xff]  ;;  %v2279_v27 = vld [vmem:[#allocation7 + $0xd8] sm:$0xff]  ;;  %v2280_v45 = vld [vmem:[#allocation7 + $0xe0] sm:$0xff] }
 0x392   :  { %v2283_v14 = vld [vmem:[#allocation7 + $0xf8] sm:$0xff]  ;;  %v9218_v31 = vpack.c.bf16 %v2280_v45, %v2276_v13 }
 0x393   :  { %10782 = vst [vmem:[#allocation53_spill] sm:$0xff] %v9182_v61  ;;  %v7978_v9 = vpop.eup %7977  ;;  %2140 = vmatmul.mubr.f32.vlgmr.msra.gmra.mrb[20].mxu0 %v9182_v61  ;;  %2211 = vmatmul.mubr.f32.vlgmr.msra.gmra.mrb[22].mxu1 %v9182_v61  ;;  %10785 = vst [vmem:[#allocation56_spill] sm:$0xff] %v9192_v4  ;;  %v9214_v3 = vpack.c.bf16 %v2283_v14, %v2279_v27  ;;  %v2289_v61 = vld [vmem:[#allocation7 + $0x128] sm:$0xff]  ;;  %v2286_v27 = vld [vmem:[#allocation7 + $0x110] sm:$0xff] }
 0x394   :  { %v7980_v35 = vpop.eup %7979  ;;  %v2231_v58 = vadd.f32 1.0, %v7978_v9  ;;  %6752 = vmatpush1.bf16.msra.mxu0 %v9177_v22  ;;  %6784 = vmatpush1.bf16.msra.mxu1 %v9179_v8  ;;  %10786 = vst [vmem:[#allocation57_spill] sm:$0xff] %v9194_v44  ;;  %v2277_v9 = vld [vmem:[#allocation7 + $0xc8] sm:$0xff]  ;;  %10793 = vst [vmem:[#allocation67_spill] sm:$0xff] %v9218_v31  ;;  %v2290_v14 = vld [vmem:[#allocation7 + $0x130] sm:$0xff] }
 0x395   :  { %v2237_v32 = vadd.f32 1.0, %v7980_v35  ;;  %6754 = vmatprep.subr.bf16.mxu0 %v9184_v34  ;;  %6786 = vmatprep.subr.bf16.mxu1 %v9186_v63  ;;  %v9212_v55 = vpack.c.bf16 %v2281_v24, %v2277_v9  ;;  %10792 = vst [vmem:[#allocation63_spill] sm:$0xff] %v9214_v3  ;;  %v2278_v35 = vld [vmem:[#allocation7 + $0xd0] sm:$0xff]  ;;  %v2299_v13 = vld [vmem:[#allocation7 + $0x178] sm:$0xff] }
 0x396   :  { %7985 = vrcp.f32 %v2231_v58  ;;  %2380 = vmatprep.mubr.f32.mxu0 %v10666_v43  ;;  %2451 = vmatprep.mubr.f32.mxu1 %v10666_v43  ;;  %v2282_v58 = vld [vmem:[#allocation7 + $0xf0] sm:$0xff] }
 0x397   :  { %7987 = vrcp.f32 %v2237_v32  ;;  %10791 = vst [vmem:[#allocation62_spill] sm:$0xff] %v9212_v55  ;;  %v2285_v32 = vld [vmem:[#allocation7 + $0x108] sm:$0xff]  ;;  %v9220_v37 = vpack.c.bf16 %v2282_v58, %v2278_v35  ;;  %v9230_v58 = vpack.c.bf16 %v2288_v26, %v2284_v20  ;;  %v2298_v8 = vld [vmem:[#allocation7 + $0x170] sm:$0xff] }
 0x398   :  { %6756 = vmatpush1.bf16.msra.mxu0 %v9192_v4  ;;  %6788 = vmatpush1.bf16.msra.mxu1 %v9194_v44  ;;  %v2287_v4 = vld [vmem:[#allocation7 + $0x118] sm:$0xff]  ;;  %v9224_v9 = vpack.c.bf16 %v2289_v61, %v2285_v32  ;;  %v2292_v61 = vld [vmem:[#allocation7 + $0x140] sm:$0xff]  ;;  %v2305_v26 = vld [vmem:[#allocation7 + $0x1a8] sm:$0xff] }
 0x399   :  { %6758 = vmatprep.subr.bf16.mxu0 %v9198_v50  ;;  %6790 = vmatprep.subr.bf16.mxu1 %v9200_v62  ;;  %v2291_v44 = vld [vmem:[#allocation7 + $0x138] sm:$0xff]  ;;  %10794 = vst [vmem:[#allocation68_spill] sm:$0xff] %v9220_v37  ;;  %v2293_v62 = vld [vmem:[#allocation7 + $0x148] sm:$0xff] }
 0x39a   :  { %v9226_v24 = vpack.c.bf16 %v2291_v44, %v2287_v4  ;;  %v2297_v50 = vld [vmem:[#allocation7 + $0x168] sm:$0xff]  ;;  %v2296_v4 = vld [vmem:[#allocation7 + $0x160] sm:$0xff] }
 0x39b   :  { %v9236_v63 = vpack.c.bf16 %v2297_v50, %v2293_v62  ;;  %v2300_v62 = vld [vmem:[#allocation7 + $0x180] sm:$0xff] }
 0x39c   :  { %6760 = vmatpush1.bf16.msra.mxu0 %v9206_v25  ;;  %6792 = vmatpush1.bf16.msra.mxu1 %v9208_v48  ;;  %v7982_v25 = vpop.eup %7981  ;;  %v2295_v48 = vld [vmem:[#allocation7 + $0x158] sm:$0xff] }
 0x39d   :  { %6762 = vmatprep.subr.bf16.mxu0 %v9212_v55  ;;  %6794 = vmatprep.subr.bf16.mxu1 %v9214_v3  ;;  %v7984_v45 = vpop.eup %7983  ;;  %v9232_v3 = vpack.c.bf16 %v2290_v14, %v2286_v27  ;;  %v2244_v55 = vadd.f32 1.0, %v7982_v25  ;;  %v9238_v34 = vpack.c.bf16 %v2299_v13, %v2295_v48  ;;  %v2303_v27 = vld [vmem:[#allocation7 + $0x198] sm:$0xff]  ;;  %v9245_v25 = vpack.c.bf16 %v2296_v4, %v2292_v61  ;;  %v2304_v48 = vld [vmem:[#allocation7 + $0x1a0] sm:$0xff] }
 0x39e   :  { %v2307_v14 = vld [vmem:[#allocation7 + $0x1b8] sm:$0xff] }
 0x39f   :  { %7989 = vrcp.f32 %v2244_v55  ;;  %v9253_v13 = vpack.c.bf16 %v2307_v14, %v2303_v27  ;;  %v2315_v61 = vld [vmem:[#allocation7 + $0x1f8] sm:$0xff]  ;;  %v2310_v27 = vld [vmem:[#allocation7 + $0x1d0] sm:$0xff] }
 0x3a0   :  { %v7986_v35 = vpop.eup %7985  ;;  %6764 = vmatpush1.bf16.msra.mxu0 %v9218_v31  ;;  %6796 = vmatpush1.bf16.msra.mxu1 %v9220_v37  ;;  %v2294_v31 = vld [vmem:[#allocation7 + $0x150] sm:$0xff]  ;;  %v2301_v37 = vld [vmem:[#allocation7 + $0x188] sm:$0xff] }
 0x3a1   :  { %v7988_v44 = vpop.eup %7987  ;;  %v2248_v32 = vmul.f32 %v7986_v35, %v7984_v45  ;;  %6766 = vmatprep.subr.bf16.mxu0 %v9224_v9  ;;  %6798 = vmatprep.subr.bf16.mxu1 %v9226_v24  ;;  %v9247_v50 = vpack.c.bf16 %v2298_v8, %v2294_v31  ;;  %v2302_v45 = vld [vmem:[#allocation7 + $0x190] sm:$0xff]  ;;  %v9258_v8 = vpack.c.bf16 %v2304_v48, %v2300_v62  ;;  %v2308_v31 = vld [vmem:[#allocation7 + $0x1c0] sm:$0xff] }
 0x3a2   :  { %v2247_v20 = vmul.f32 %v7988_v44, %v8947_v5  ;;  %v9251_v5 = vpack.c.bf16 %v2305_v26, %v2301_v37  ;;  %v2306_v35 = vld [vmem:[#allocation7 + $0x1b0] sm:$0xff]  ;;  %v2309_v44 = vld [vmem:[#allocation7 + $0x1c8] sm:$0xff]  ;;  %v2312_v26 = vld [vmem:[#allocation7 + $0x1e0] sm:$0xff] }
 0x3a3   :  { %v9260_v55 = vpack.c.bf16 %v2306_v35, %v2302_v45  ;;  %v2314_v14 = vld [vmem:[#allocation7 + $0x1f0] sm:$0xff]  ;;  %v9270_v62 = vpack.c.bf16 %v2312_v26, %v2308_v31  ;;  %v10823_v26 = vld [vmem:[#allocation17_spill] sm:$0xff] }
 0x3a4   :  { %v9241_v22 = vadd.f32 %v2248_v32, %v2247_v20  ;;  %6768 = vmatpush1.bf16.msra.mxu0 %v9230_v58  ;;  %6800 = vmatpush1.bf16.msra.mxu1 %v9232_v3  ;;  %v2313_v32 = vld [vmem:[#allocation7 + $0x1e8] sm:$0xff]  ;;  %v2311_v20 = vld [vmem:[#allocation7 + $0x1d8] sm:$0xff]  ;;  %v9272_v48 = vpack.c.bf16 %v2314_v14, %v2310_v27 }
 0x3a5   :  { %6770 = vmatprep.subr.bf16.mxu0 %v9236_v63  ;;  %6802 = vmatprep.subr.bf16.mxu1 %v9238_v34  ;;  %v9264_v37 = vpack.c.bf16 %v2313_v32, %v2309_v44  ;;  %v9266_v4 = vpack.c.bf16 %v2315_v61, %v2311_v20  ;;  %v10821_v32 = vld [vmem:[#allocation48_spill] sm:$0xff]  ;;  %v10822_v20 = vld [vmem:[#allocation49_spill] sm:$0xff] }
 0x3a6   :  { %7991 = vtanh.f32 %v9241_v22 }
 0x3a8   :  { %6772 = vmatpush1.bf16.msra.mxu0 %v9245_v25  ;;  %6804 = vmatpush1.bf16.msra.mxu1 %v9247_v50 }
 0x3a9   :  { %6774 = vmatprep.subr.bf16.mxu0 %v9251_v5  ;;  %6806 = vmatprep.subr.bf16.mxu1 %v9253_v13  ;;  %v7990_v45 = vpop.eup %7989 }
 0x3ac   :  { %6776 = vmatpush1.bf16.msra.mxu0 %v9258_v8  ;;  %6808 = vmatpush1.bf16.msra.mxu1 %v9260_v55 }
 0x3ad   :  { %6778 = vmatprep.subr.bf16.mxu0 %v9264_v37  ;;  %6810 = vmatprep.subr.bf16.mxu1 %v9266_v4 }
 0x3b0   :  { %v7992_v35 = vpop.eup %7991  ;;  %6780 = vmatpush1.bf16.msra.mxu0 %v9270_v62  ;;  %6812 = vmatpush1.bf16.msra.mxu1 %v9272_v48 }
 0x3b1   :  { %6814 = vmatprep.subr.bf16.mxu0 %v8962_v7  ;;  %6846 = vmatprep.subr.bf16.mxu1 %v8964_v15  ;;  %v2251_v44 = vmul.f32 %v7992_v35, %v7990_v45  ;;  %v2536_v7 = vld [vmem:[#allocation4 + $0x180] sm:$0xff]  ;;  %v10824_v35 = vld [vmem:[#allocation18_spill] sm:$0xff] }
 0x3b2   :  { %v2540_v15 = vld [vmem:[#allocation4 + $0x1a0] sm:$0xff] }
 0x3b3   :  { %2381 = vmatmul.mubr.f32.vlgmr.msra.gmra.mrb[20].mxu0 %v2251_v44  ;;  %2452 = vmatmul.mubr.f32.vlgmr.msra.gmra.mrb[22].mxu1 %v2251_v44 }
 0x3b4   :  { %6816 = vmatpush1.bf16.msra.mxu0 %v8968_v59  ;;  %6848 = vmatpush1.bf16.msra.mxu1 %v8970_v1  ;;  %v2545_v59 = vld [vmem:[#allocation4 + $0x1c8] sm:$0xff] }
 0x3b5   :  { %6818 = vmatprep.subr.bf16.mxu0 %v8976_v33  ;;  %6850 = vmatprep.subr.bf16.mxu1 %v8978_v38  ;;  %v2549_v1 = vld [vmem:[#allocation4 + $0x1e8] sm:$0xff]  ;;  %v9304_v33 = vpack.c.bf16 %v2540_v15, %v2536_v7 }
 0x3b6   :  { %2616 = vmatprep.mubr.f32.mxu0 %v10666_v43  ;;  %2687 = vmatprep.mubr.f32.mxu1 %v10666_v43  ;;  %v9308_v38 = vpack.c.bf16 %v2549_v1, %v2545_v59  ;;  %v10825_v59 = vld [vmem:[#allocation19_spill] sm:$0xff] }
 0x3b8   :  { %6820 = vmatpush1.bf16.msra.mxu0 %v8984_v29  ;;  %6852 = vmatpush1.bf16.msra.mxu1 %v8986_v28  ;;  %v2544_v29 = vld [vmem:[#allocation4 + $0x1c0] sm:$0xff] }
 0x3b9   :  { %6822 = vmatprep.subr.bf16.mxu0 %v8990_v0  ;;  %6854 = vmatprep.subr.bf16.mxu1 %v8992_v36  ;;  %v2548_v28 = vld [vmem:[#allocation4 + $0x1e0] sm:$0xff]  ;;  %v10795_v36 = vld [vmem:[#allocation22_spill] sm:$0xff] }
 0x3ba   :  { %v9312_v0 = vpack.c.bf16 %v2548_v28, %v2544_v29  ;;  %v10826_v28 = vld [vmem:[#allocation20_spill] sm:$0xff] }
 0x3bc   :  { %6824 = vmatpush1.bf16.msra.mxu0 %v8998_v2  ;;  %6856 = vmatpush1.bf16.msra.mxu1 %v9000_v53  ;;  %v10796_v2 = vld [vmem:[#allocation23_spill] sm:$0xff]  ;;  %v10797_v53 = vld [vmem:[#allocation24_spill] sm:$0xff] }
 0x3bd   :  { %6826 = vmatprep.subr.bf16.mxu0 %v9004_v18  ;;  %6858 = vmatprep.subr.bf16.mxu1 %v9006_v19  ;;  %v10798_v18 = vld [vmem:[#allocation25_spill] sm:$0xff]  ;;  %v10799_v19 = vld [vmem:[#allocation26_spill] sm:$0xff] }
 0x3c0   :  { %6828 = vmatpush1.bf16.msra.mxu0 %v9010_v16  ;;  %6860 = vmatpush1.bf16.msra.mxu1 %v9012_v23  ;;  %v10800_v16 = vld [vmem:[#allocation27_spill] sm:$0xff]  ;;  %v10801_v23 = vld [vmem:[#allocation28_spill] sm:$0xff] }
 0x3c1   :  { %6830 = vmatprep.subr.bf16.mxu0 %v9016_v39  ;;  %6862 = vmatprep.subr.bf16.mxu1 %v9018_v40  ;;  %v10802_v39 = vld [vmem:[#allocation29_spill] sm:$0xff]  ;;  %v10803_v40 = vld [vmem:[#allocation30_spill] sm:$0xff] }
 0x3c4   :  { %6832 = vmatpush1.bf16.msra.mxu0 %v9022_v46  ;;  %6864 = vmatpush1.bf16.msra.mxu1 %v9024_v54  ;;  %v10804_v46 = vld [vmem:[#allocation31_spill] sm:$0xff]  ;;  %v10805_v54 = vld [vmem:[#allocation32_spill] sm:$0xff] }
 0x3c5   :  { %6834 = vmatprep.subr.bf16.mxu0 %v9028_v10  ;;  %6866 = vmatprep.subr.bf16.mxu1 %v9030_v21  ;;  %v10806_v10 = vld [vmem:[#allocation33_spill] sm:$0xff]  ;;  %v10807_v21 = vld [vmem:[#allocation34_spill] sm:$0xff] }
 0x3c8   :  { %6836 = vmatpush1.bf16.msra.mxu0 %v9034_v11  ;;  %6868 = vmatpush1.bf16.msra.mxu1 %v9036_v60  ;;  %v10808_v11 = vld [vmem:[#allocation35_spill] sm:$0xff]  ;;  %v10809_v60 = vld [vmem:[#allocation36_spill] sm:$0xff] }
 0x3c9   :  { %6838 = vmatprep.subr.bf16.mxu0 %v9040_v51  ;;  %6870 = vmatprep.subr.bf16.mxu1 %v9042_v12  ;;  %v10810_v51 = vld [vmem:[#allocation37_spill] sm:$0xff]  ;;  %v10811_v12 = vld [vmem:[#allocation38_spill] sm:$0xff] }
 0x3cc   :  { %6840 = vmatpush1.bf16.msra.mxu0 %v9304_v33  ;;  %6872 = vmatpush1.bf16.msra.mxu1 %v9046_v49  ;;  %v10812_v49 = vld [vmem:[#allocation39_spill] sm:$0xff] }
 0x3cd   :  { %6842 = vmatprep.subr.bf16.mxu0 %v9308_v38  ;;  %6874 = vmatprep.subr.bf16.mxu1 %v9050_v6  ;;  %v10813_v6 = vld [vmem:[#allocation40_spill] sm:$0xff] }
 0x3d0   :  { %6844 = vmatpush1.bf16.msra.mxu0 %v9312_v0  ;;  %6876 = vmatpush1.bf16.msra.mxu1 %v9054_v47  ;;  %v10814_v47 = vld [vmem:[#allocation41_spill] sm:$0xff] }
 0x3d1   :  { %6878 = vmatprep.subr.bf16.mxu0 %v9064_v56  ;;  %6910 = vmatprep.subr.bf16.mxu1 %v9066_v57  ;;  %v10815_v56 = vld [vmem:[#allocation42_spill] sm:$0xff]  ;;  %v10816_v57 = vld [vmem:[#allocation43_spill] sm:$0xff] }
 0x3d3   :  { %2617 = vmatmul.mubr.f32.vlgmr.msra.gmra.mrb[6].mxu0 %v2251_v44  ;;  %2688 = vmatmul.mubr.f32.vlgmr.msra.gmra.mrb[6].mxu1 %v2251_v44 }
 0x3d4   :  { %6880 = vmatpush1.bf16.msra.mxu0 %v9068_v41  ;;  %6912 = vmatpush1.bf16.msra.mxu1 %v9071_v30  ;;  %v10817_v41 = vld [vmem:[#allocation44_spill] sm:$0xff]  ;;  %v10818_v30 = vld [vmem:[#allocation45_spill] sm:$0xff] }
 0x3d5   :  { %6882 = vmatprep.subr.bf16.mxu0 %v9076_v52  ;;  %6914 = vmatprep.subr.bf16.mxu1 %v9078_v42  ;;  %v10819_v52 = vld [vmem:[#allocation46_spill] sm:$0xff]  ;;  %v10820_v42 = vld [vmem:[#allocation47_spill] sm:$0xff] }
 0x3d6   :  { %2822 = vmatprep.mubr.f32.mxu0 %v10666_v43  ;;  %2893 = vmatprep.mubr.f32.mxu1 %v10666_v43 }
 0x3d8   :  { %6884 = vmatpush1.bf16.msra.mxu0 %v10795_v36  ;;  %6916 = vmatpush1.bf16.msra.mxu1 %v10796_v2 }
 0x3d9   :  { %6886 = vmatprep.subr.bf16.mxu0 %v10797_v53  ;;  %6918 = vmatprep.subr.bf16.mxu1 %v10798_v18 }
 0x3dc   :  { %6888 = vmatpush1.bf16.msra.mxu0 %v10799_v19  ;;  %6920 = vmatpush1.bf16.msra.mxu1 %v10800_v16 }
 0x3dd   :  { %6890 = vmatprep.subr.bf16.mxu0 %v10801_v23  ;;  %6922 = vmatprep.subr.bf16.mxu1 %v10802_v39 }
 0x3e0   :  { %6892 = vmatpush1.bf16.msra.mxu0 %v10803_v40  ;;  %6924 = vmatpush1.bf16.msra.mxu1 %v10804_v46 }
 0x3e1   :  { %6894 = vmatprep.subr.bf16.mxu0 %v10805_v54  ;;  %6926 = vmatprep.subr.bf16.mxu1 %v10806_v10  ;;  %v10827_v10 = vld [vmem:[#allocation50_spill] sm:$0xff] }
 0x3e4   :  { %6896 = vmatpush1.bf16.msra.mxu0 %v10807_v21  ;;  %6928 = vmatpush1.bf16.msra.mxu1 %v10808_v11 }
 0x3e5   :  { %6898 = vmatprep.subr.bf16.mxu0 %v10809_v60  ;;  %6930 = vmatprep.subr.bf16.mxu1 %v10810_v51 }
 0x3e8   :  { %6900 = vmatpush1.bf16.msra.mxu0 %v10811_v12  ;;  %6932 = vmatpush1.bf16.msra.mxu1 %v10812_v49  ;;  %v10828_v12 = vld [vmem:[#allocation64_spill] sm:$0xff] }
 0x3e9   :  { %6902 = vmatprep.subr.bf16.mxu0 %v10813_v6  ;;  %6934 = vmatprep.subr.bf16.mxu1 %v10814_v47 }
 0x3ec   :  { %6904 = vmatpush1.bf16.msra.mxu0 %v10815_v56  ;;  %6936 = vmatpush1.bf16.msra.mxu1 %v10816_v57  ;;  %v10829_v56 = vld [vmem:[#allocation65_spill] sm:$0xff] }
 0x3ed   :  { %6906 = vmatprep.subr.bf16.mxu0 %v10817_v41  ;;  %6938 = vmatprep.subr.bf16.mxu1 %v10818_v30 }
 0x3f0   :  { %6908 = vmatpush1.bf16.msra.mxu0 %v10819_v52  ;;  %6940 = vmatpush1.bf16.msra.mxu1 %v10820_v42  ;;  %v10830_v52 = vld [vmem:[#allocation66_spill] sm:$0xff] }
 0x3f1   :  { %6942 = vmatprep.subr.bf16.mxu0 %v10821_v32  ;;  %6974 = vmatprep.subr.bf16.mxu1 %v10822_v20 }
 0x486   :  { %v2382_v61 = vpop.f32.mrb[20].mxu0  ;;  %v2453_v31 = vpop.f32.mrb[22].mxu1 }
 0x487   :  { %v2458_v27 = vadd.f32 %v2382_v61, %v10823_v26  ;;  %v2384_v14 = vpop.f32.mrb[21].mxu0  ;;  %v2455_v45 = vpop.f32.mrb[23].mxu1  ;;  %v2460_v36 = vadd.f32 %v2453_v31, %v10826_v28 }
 0x488   :  { %v2459_v44 = vadd.f32 %v2384_v14, %v10824_v35  ;;  %v2461_v1 = vadd.f32 %v2455_v45, %v10825_v59 }
 0x489   :  { %v6135_v7 = vmul.f32 -1.442695, %v2458_v27 }
 0x48a   :  { %v6136_v15 = vmul.f32 -1.442695, %v2459_v44  ;;  %v6137_v29 = vmul.f32 -1.442695, %v2461_v1 }
 0x48b   :  { %7993 = vpow2.f32 %v6135_v7  ;;  %v10832_v7 = vld [vmem:[#allocation51_spill] sm:$0xff] }
 0x48c   :  { %7995 = vpow2.f32 %v6136_v15  ;;  %v10833_v15 = vld [vmem:[#allocation52_spill] sm:$0xff] }
 0x48d   :  { %7997 = vpow2.f32 %v6137_v29  ;;  %v10834_v29 = vld [vmem:[#allocation54_spill] sm:$0xff] }
 0x48e   :  { %7999 = vtanh.f32 %v2460_v36  ;;  %v10835_v36 = vld [vmem:[#allocation55_spill] sm:$0xff] }
 0x495   :  { %v7994_v2 = vpop.eup %7993 }
 0x496   :  { %v7996_v53 = vpop.eup %7995  ;;  %v2465_v18 = vadd.f32 1.0, %v7994_v2  ;;  %v10836_v2 = vld [vmem:[#allocation56_spill] sm:$0xff] }
 0x497   :  { %v2471_v19 = vadd.f32 1.0, %v7996_v53  ;;  %v7998_v16 = vpop.eup %7997  ;;  %v10837_v53 = vld [vmem:[#allocation57_spill] sm:$0xff] }
 0x498   :  { %8001 = vrcp.f32 %v2465_v18  ;;  %v8000_v23 = vpop.eup %7999  ;;  %v2478_v54 = vadd.f32 1.0, %v7998_v16  ;;  %v10838_v18 = vld [vmem:[#allocation58_spill] sm:$0xff]  ;;  %v10840_v16 = vld [vmem:[#allocation60_spill] sm:$0xff] }
 0x499   :  { %8003 = vrcp.f32 %v2471_v19  ;;  %v10839_v19 = vld [vmem:[#allocation59_spill] sm:$0xff] }
 0x49a   :  { %8005 = vrcp.f32 %v2478_v54 }
 0x4a2   :  { %v8002_v39 = vpop.eup %8001 }
 0x4a3   :  { %v8004_v40 = vpop.eup %8003  ;;  %v2482_v46 = vmul.f32 %v8002_v39, %v8000_v23  ;;  %v10841_v23 = vld [vmem:[#allocation61_spill] sm:$0xff]  ;;  %v10842_v39 = vld [vmem:[#allocation62_spill] sm:$0xff] }
 0x4a4   :  { %v2481_v21 = vmul.f32 %v8004_v40, %v10827_v10  ;;  %v8006_v32 = vpop.eup %8005  ;;  %v10843_v40 = vld [vmem:[#allocation63_spill] sm:$0xff] }
 0x4a6   :  { %v9359_v11 = vadd.f32 %v2482_v46, %v2481_v21  ;;  %v2618_v60 = vpop.f32.mrb[6].mxu0  ;;  %v2689_v51 = vpop.f32.mrb[6].mxu1  ;;  %v10844_v21 = vld [vmem:[#allocation67_spill] sm:$0xff] }
 0x4a7   :  { %v7813_v49 = vadd.f32 %v2618_v60, %v10828_v12  ;;  %v2620_v6 = vpop.f32.mrb[7].mxu0  ;;  %v2691_v47 = vpop.f32.mrb[7].mxu1  ;;  %v7829_v31 = vadd.f32 %v2689_v51, %v8803_v17  ;;  %v10845_v60 = vld [vmem:[#allocation68_spill] sm:$0xff] }
 0x4a8   :  { %v7814_v57 = vadd.f32 %v2620_v6, %v10829_v56  ;;  %8007 = vtanh.f32 %v9359_v11  ;;  %v7830_v42 = vadd.f32 %v2691_v47, %v10830_v52 }
 0x4a9   :  { %v6138_v41 = vmul.f32 -1.442695, %v7813_v49 }
 0x4aa   :  { %v6139_v30 = vmul.f32 -1.442695, %v7814_v57  ;;  %v6140_v61 = vmul.f32 -1.442695, %v7830_v42  ;;  %v3186_v42 = vld [vmem:[#allocation4 + $0x78] sm:$0xff] }
 0x4ab   :  { %8009 = vpow2.f32 %v6138_v41  ;;  %v3184_v41 = vld [vmem:[#allocation4 + $0x68] sm:$0xff] }
 0x4ac   :  { %8011 = vpow2.f32 %v6139_v30  ;;  %v3182_v30 = vld [vmem:[#allocation4 + $0x58] sm:$0xff] }
 0x4ad   :  { %8013 = vpow2.f32 %v6140_v61 }
 0x4ae   :  { %8015 = vtanh.f32 %v7829_v31 }
 0x4b2   :  { %v8008_v20 = vpop.eup %8007 }
 0x4b3   :  { %v9366_v27 = vmul.f32 %v8008_v20, %v8006_v32  ;;  %v3183_v20 = vld [vmem:[#allocation4 + $0x60] sm:$0xff] }
 0x4b5   :  { %10831 = vst [vmem:[#allocation22_spill] sm:$0xff] %v9366_v27  ;;  %v8010_v14 = vpop.eup %8009  ;;  %2823 = vmatmul.mubr.f32.vlgmr.msra.gmra.mrb[22].mxu0 %v9366_v27  ;;  %2894 = vmatmul.mubr.f32.vlgmr.msra.gmra.mrb[24].mxu1 %v9366_v27 }
 0x4b6   :  { %v8012_v45 = vpop.eup %8011  ;;  %v2914_v44 = vadd.f32 1.0, %v8010_v14  ;;  %6944 = vmatpush1.bf16.msra.mxu0 %v10832_v7  ;;  %6976 = vmatpush1.bf16.msra.mxu1 %v10833_v15  ;;  %v9420_v14 = vpack.c.bf16 %v3186_v42, %v3182_v30  ;;  %v3190_v7 = vld [vmem:[#allocation4 + $0x98] sm:$0xff]  ;;  %v3205_v30 = vld [vmem:[#allocation4 + $0x110] sm:$0xff] }
 0x4b7   :  { %v2920_v1 = vadd.f32 1.0, %v8012_v45  ;;  %6946 = vmatprep.subr.bf16.mxu0 %v10834_v29  ;;  %6978 = vmatprep.subr.bf16.mxu1 %v10835_v36  ;;  %v8014_v46 = vpop.eup %8013  ;;  %v3181_v45 = vld [vmem:[#allocation4 + $0x50] sm:$0xff]  ;;  %v3194_v15 = vld [vmem:[#allocation4 + $0xb8] sm:$0xff]  ;;  %v3187_v36 = vld [vmem:[#allocation4 + $0x80] sm:$0xff] }
 0x4b8   :  { %8017 = vrcp.f32 %v2914_v44  ;;  %3063 = vmatprep.mubr.f32.mxu0 %v10666_v43  ;;  %3134 = vmatprep.mubr.f32.mxu1 %v10666_v43  ;;  %v8016_v54 = vpop.eup %8015  ;;  %v2927_v6 = vadd.f32 1.0, %v8014_v46  ;;  %v3188_v44 = vld [vmem:[#allocation4 + $0x88] sm:$0xff]  ;;  %v3202_v46 = vld [vmem:[#allocation4 + $0xf8] sm:$0xff]  ;;  %v3209_v42 = vld [vmem:[#allocation4 + $0x130] sm:$0xff] }
 0x4b9   :  { %8019 = vrcp.f32 %v2920_v1 }
 0x4ba   :  { %6948 = vmatpush1.bf16.msra.mxu0 %v10836_v2  ;;  %6980 = vmatpush1.bf16.msra.mxu1 %v10837_v53  ;;  %8021 = vrcp.f32 %v2927_v6  ;;  %v3191_v2 = vld [vmem:[#allocation4 + $0xa0] sm:$0xff]  ;;  %v3197_v6 = vld [vmem:[#allocation4 + $0xd0] sm:$0xff] }
 0x4bb   :  { %6950 = vmatprep.subr.bf16.mxu0 %v10838_v18  ;;  %6982 = vmatprep.subr.bf16.mxu1 %v10839_v19  ;;  %v9434_v18 = vpack.c.bf16 %v3194_v15, %v3190_v7  ;;  %v3189_v19 = vld [vmem:[#allocation4 + $0x90] sm:$0xff] }
 0x4be   :  { %6952 = vmatpush1.bf16.msra.mxu0 %v10840_v16  ;;  %6984 = vmatpush1.bf16.msra.mxu1 %v10841_v23  ;;  %v3193_v16 = vld [vmem:[#allocation4 + $0xb0] sm:$0xff]  ;;  %v3196_v23 = vld [vmem:[#allocation4 + $0xc8] sm:$0xff] }
 0x4bf   :  { %6954 = vmatprep.subr.bf16.mxu0 %v10842_v39  ;;  %6986 = vmatprep.subr.bf16.mxu1 %v10843_v40  ;;  %v3200_v39 = vld [vmem:[#allocation4 + $0xe8] sm:$0xff]  ;;  %v3198_v40 = vld [vmem:[#allocation4 + $0xd8] sm:$0xff] }
 0x4c2   :  { %v8018_v10 = vpop.eup %8017  ;;  %6956 = vmatpush1.bf16.msra.mxu0 %v10844_v21  ;;  %6988 = vmatpush1.bf16.msra.mxu1 %v10845_v60  ;;  %v3195_v21 = vld [vmem:[#allocation4 + $0xc0] sm:$0xff] }
 0x4c3   :  { %v8020_v51 = vpop.eup %8019  ;;  %v2931_v49 = vmul.f32 %v8018_v10, %v8016_v54  ;;  %6958 = vmatprep.subr.bf16.mxu0 %v9224_v9  ;;  %6990 = vmatprep.subr.bf16.mxu1 %v9226_v24  ;;  %v3176_v9 = vld [vmem:[#allocation4 + $0x28] sm:$0xff]  ;;  %v3174_v24 = vld [vmem:[#allocation4 + $0x18] sm:$0xff]  ;;  %v9440_v54 = vpack.c.bf16 %v3191_v2, %v3187_v36  ;;  %v9442_v10 = vpack.c.bf16 %v3193_v16, %v3189_v19  ;;  %v3199_v60 = vld [vmem:[#allocation4 + $0xe0] sm:$0xff] }
 0x4c4   :  { %v2930_v47 = vmul.f32 %v8020_v51, %v9241_v22  ;;  %v3172_v22 = vld [vmem:[#allocation4 + $0x8] sm:$0xff]  ;;  %v8022_v32 = vpop.eup %8021  ;;  %v9446_v51 = vpack.c.bf16 %v3200_v39, %v3196_v23  ;;  %v3213_v36 = vld [vmem:[#allocation4 + $0x150] sm:$0xff]  ;;  %v3222_v23 = vld [vmem:[#allocation4 + $0x198] sm:$0xff] }
 0x4c5   :  { %v3217_v2 = vld [vmem:[#allocation4 + $0x170] sm:$0xff]  ;;  %v3220_v19 = vld [vmem:[#allocation4 + $0x188] sm:$0xff]  ;;  %v3226_v39 = vld [vmem:[#allocation4 + $0x1b8] sm:$0xff] }
 0x4c6   :  { %v9389_v57 = vadd.f32 %v2931_v49, %v2930_v47  ;;  %6960 = vmatpush1.bf16.msra.mxu0 %v9230_v58  ;;  %6992 = vmatpush1.bf16.msra.mxu1 %v9232_v3  ;;  %v3178_v58 = vld [vmem:[#allocation4 + $0x38] sm:$0xff]  ;;  %v9404_v3 = vpack.c.bf16 %v3176_v9, %v3172_v22  ;;  %v9448_v49 = vpack.c.bf16 %v3202_v46, %v3198_v40  ;;  %v3201_v47 = vld [vmem:[#allocation4 + $0xf0] sm:$0xff]  ;;  %v3204_v22 = vld [vmem:[#allocation4 + $0x108] sm:$0xff] }
 0x4c7   :  { %6962 = vmatprep.subr.bf16.mxu0 %v9236_v63  ;;  %6994 = vmatprep.subr.bf16.mxu1 %v9238_v34  ;;  %v3171_v63 = vld [vmem:[#allocation4] sm:$0xff]  ;;  %v3208_v9 = vld [vmem:[#allocation4 + $0x128] sm:$0xff]  ;;  %v9478_v46 = vpack.c.bf16 %v3217_v2, %v3213_v36  ;;  %v3383_v36 = vld [vmem:[#allocation9 + $0x30] sm:$0xff] }
 0x4c8   :  { %8023 = vtanh.f32 %v9389_v57  ;;  %v3175_v34 = vld [vmem:[#allocation4 + $0x20] sm:$0xff]  ;;  %v3224_v16 = vld [vmem:[#allocation4 + $0x1a8] sm:$0xff] }
 0x4c9   :  { %v3386_v2 = vld [vmem:[#allocation9 + $0x48] sm:$0xff] }
 0x4ca   :  { %6964 = vmatpush1.bf16.msra.mxu0 %v9245_v25  ;;  %6996 = vmatpush1.bf16.msra.mxu1 %v9247_v50  ;;  %v9406_v25 = vpack.c.bf16 %v3178_v58, %v3174_v24  ;;  %v3173_v50 = vld [vmem:[#allocation4 + $0x10] sm:$0xff]  ;;  %v3206_v24 = vld [vmem:[#allocation4 + $0x118] sm:$0xff] }
 0x4cb   :  { %6966 = vmatprep.subr.bf16.mxu0 %v9251_v5  ;;  %6998 = vmatprep.subr.bf16.mxu1 %v9253_v13  ;;  %v3177_v5 = vld [vmem:[#allocation4 + $0x30] sm:$0xff]  ;;  %v3180_v13 = vld [vmem:[#allocation4 + $0x48] sm:$0xff]  ;;  %v3210_v58 = vld [vmem:[#allocation4 + $0x138] sm:$0xff] }
 0x4cc   :  { %v9418_v31 = vpack.c.bf16 %v3184_v41, %v3180_v13  ;;  %v9458_v13 = vpack.c.bf16 %v3208_v9, %v3204_v22  ;;  %v9460_v41 = vpack.c.bf16 %v3210_v58, %v3206_v24  ;;  %v3230_v22 = vld [vmem:[#allocation4 + $0x1d8] sm:$0xff] }
 0x4cd   :  { %v3234_v9 = vld [vmem:[#allocation4 + $0x1f8] sm:$0xff] }
 0x4ce   :  { %6968 = vmatpush1.bf16.msra.mxu0 %v9258_v8  ;;  %7000 = vmatpush1.bf16.msra.mxu1 %v9260_v55  ;;  %v9410_v55 = vpack.c.bf16 %v3175_v34, %v3171_v63  ;;  %v9452_v63 = vpack.c.bf16 %v3199_v60, %v3195_v21  ;;  %v9454_v34 = vpack.c.bf16 %v3201_v47, %v3197_v6  ;;  %v3221_v6 = vld [vmem:[#allocation4 + $0x190] sm:$0xff] }
 0x4cf   :  { %6970 = vmatprep.subr.bf16.mxu0 %v9264_v37  ;;  %7002 = vmatprep.subr.bf16.mxu1 %v9266_v4  ;;  %v9412_v37 = vpack.c.bf16 %v3177_v5, %v3173_v50  ;;  %v3179_v4 = vld [vmem:[#allocation4 + $0x40] sm:$0xff]  ;;  %v9482_v21 = vpack.c.bf16 %v3224_v16, %v3220_v19  ;;  %v9484_v60 = vpack.c.bf16 %v3226_v39, %v3222_v23  ;;  %v3225_v47 = vld [vmem:[#allocation4 + $0x1b0] sm:$0xff]  ;;  %v3390_v19 = vld [vmem:[#allocation9 + $0x68] sm:$0xff] }
 0x4d0   :  { %v9426_v1 = vpack.c.bf16 %v3183_v20, %v3179_v4  ;;  %v3203_v50 = vld [vmem:[#allocation4 + $0x100] sm:$0xff]  ;;  %v3214_v4 = vld [vmem:[#allocation4 + $0x158] sm:$0xff]  ;;  %v9488_v24 = vpack.c.bf16 %v3225_v47, %v3221_v6  ;;  %v9492_v58 = vpack.c.bf16 %v3234_v9, %v3230_v22  ;;  %v9518_v23 = vpack.c.bf16 %v3390_v19, %v3386_v2 }
 0x4d1   :  { %v3207_v5 = vld [vmem:[#allocation4 + $0x120] sm:$0xff]  ;;  %v3218_v20 = vld [vmem:[#allocation4 + $0x178] sm:$0xff] }
 0x4d2   :  { %v8024_v8 = vpop.eup %8023  ;;  %6972 = vmatpush1.bf16.msra.mxu0 %v9270_v62  ;;  %7004 = vmatpush1.bf16.msra.mxu1 %v9272_v48  ;;  %v3185_v62 = vld [vmem:[#allocation4 + $0x70] sm:$0xff]  ;;  %v3192_v48 = vld [vmem:[#allocation4 + $0xa8] sm:$0xff]  ;;  %v9472_v15 = vpack.c.bf16 %v3218_v20, %v3214_v4  ;;  %v3377_v4 = vld [vmem:[#allocation9] sm:$0xff] }
 0x4d3   :  { %v9414_v61 = vmul.f32 %v8024_v8, %v8022_v32  ;;  %7006 = vmatprep.subr.bf16.mxu0 %v9404_v3  ;;  %7038 = vmatprep.subr.bf16.mxu1 %v9406_v25  ;;  %v9428_v29 = vpack.c.bf16 %v3185_v62, %v3181_v45  ;;  %v9432_v53 = vpack.c.bf16 %v3192_v48, %v3188_v44  ;;  %v3212_v32 = vld [vmem:[#allocation4 + $0x148] sm:$0xff]  ;;  %v3211_v44 = vld [vmem:[#allocation4 + $0x140] sm:$0xff]  ;;  %v3388_v16 = vld [vmem:[#allocation9 + $0x58] sm:$0xff] }
 0x4d4   :  { %v3216_v8 = vld [vmem:[#allocation4 + $0x168] sm:$0xff]  ;;  %v9464_v45 = vpack.c.bf16 %v3207_v5, %v3203_v50  ;;  %v9466_v62 = vpack.c.bf16 %v3209_v42, %v3205_v30  ;;  %v3215_v48 = vld [vmem:[#allocation4 + $0x160] sm:$0xff]  ;;  %v3229_v50 = vld [vmem:[#allocation4 + $0x1d0] sm:$0xff] }
 0x4d5   :  { %3064 = vmatmul.mubr.f32.vlgmr.msra.gmra.mrb[22].mxu0 %v9414_v61  ;;  %3135 = vmatmul.mubr.f32.vlgmr.msra.gmra.mrb[24].mxu1 %v9414_v61  ;;  %v9470_v7 = vpack.c.bf16 %v3216_v8, %v3212_v32  ;;  %v9476_v40 = vpack.c.bf16 %v3215_v48, %v3211_v44  ;;  %v3233_v5 = vld [vmem:[#allocation4 + $0x1f0] sm:$0xff]  ;;  %v3382_v42 = vld [vmem:[#allocation9 + $0x28] sm:$0xff]  ;;  %v3380_v32 = vld [vmem:[#allocation9 + $0x18] sm:$0xff] }
 0x4d6   :  { %7008 = vmatpush1.bf16.msra.mxu0 %v9410_v55  ;;  %7040 = vmatpush1.bf16.msra.mxu1 %v9412_v37  ;;  %v9496_v30 = vpack.c.bf16 %v3233_v5, %v3229_v50  ;;  %v3381_v20 = vld [vmem:[#allocation9 + $0x20] sm:$0xff]  ;;  %v3379_v48 = vld [vmem:[#allocation9 + $0x10] sm:$0xff]  ;;  %v3392_v39 = vld [vmem:[#allocation9 + $0x78] sm:$0xff] }
 0x4d7   :  { %7010 = vmatprep.subr.bf16.mxu0 %v9418_v31  ;;  %7042 = vmatprep.subr.bf16.mxu1 %v9420_v14  ;;  %v3385_v6 = vld [vmem:[#allocation9 + $0x40] sm:$0xff]  ;;  %v9520_v22 = vpack.c.bf16 %v3392_v39, %v3388_v16  ;;  %v3387_v50 = vld [vmem:[#allocation9 + $0x50] sm:$0xff] }
 0x4d8   :  { %3299 = vmatprep.mubr.f32.mxu0 %v10666_v43  ;;  %3370 = vmatprep.mubr.f32.mxu1 %v10666_v43  ;;  %v3389_v47 = vld [vmem:[#allocation9 + $0x60] sm:$0xff]  ;;  %v3391_v5 = vld [vmem:[#allocation9 + $0x70] sm:$0xff] }
 0x4d9   :  { %v9522_v9 = vpack.c.bf16 %v3389_v47, %v3385_v6  ;;  %v3395_v16 = vld [vmem:[#allocation9 + $0x90] sm:$0xff]  ;;  %v3402_v47 = vld [vmem:[#allocation9 + $0xc8] sm:$0xff] }
 0x4da   :  { %7012 = vmatpush1.bf16.msra.mxu0 %v9426_v1  ;;  %7044 = vmatpush1.bf16.msra.mxu1 %v9428_v29  ;;  %v3399_v39 = vld [vmem:[#allocation9 + $0xb0] sm:$0xff] }
 0x4db   :  { %7014 = vmatprep.subr.bf16.mxu0 %v9432_v53  ;;  %7046 = vmatprep.subr.bf16.mxu1 %v9434_v18  ;;  %10846 = vst [vmem:[#allocation23_spill] sm:$0xff] %v9522_v9  ;;  %v9537_v6 = vpack.c.bf16 %v3399_v39, %v3395_v16  ;;  %v3403_v16 = vld [vmem:[#allocation9 + $0xd0] sm:$0xff] }
 0x4dc   :  { %v3407_v39 = vld [vmem:[#allocation9 + $0xf0] sm:$0xff] }
 0x4dd   :  { %10851 = vst [vmem:[#allocation28_spill] sm:$0xff] %v9537_v6  ;;  %v9549_v27 = vpack.c.bf16 %v3407_v39, %v3403_v16  ;;  %v3411_v16 = vld [vmem:[#allocation9 + $0x110] sm:$0xff] }
 0x4de   :  { %7016 = vmatpush1.bf16.msra.mxu0 %v9440_v54  ;;  %7048 = vmatpush1.bf16.msra.mxu1 %v9442_v10  ;;  %v3415_v39 = vld [vmem:[#allocation9 + $0x130] sm:$0xff] }
 0x4df   :  { %7018 = vmatprep.subr.bf16.mxu0 %v9446_v51  ;;  %7050 = vmatprep.subr.bf16.mxu1 %v9448_v49  ;;  %10855 = vst [vmem:[#allocation32_spill] sm:$0xff] %v9549_v27 }
 0x4e2   :  { %7020 = vmatpush1.bf16.msra.mxu0 %v9452_v63  ;;  %7052 = vmatpush1.bf16.msra.mxu1 %v9454_v34 }
 0x4e3   :  { %7022 = vmatprep.subr.bf16.mxu0 %v9458_v13  ;;  %7054 = vmatprep.subr.bf16.mxu1 %v9460_v41 }
 0x4e6   :  { %7024 = vmatpush1.bf16.msra.mxu0 %v9464_v45  ;;  %7056 = vmatpush1.bf16.msra.mxu1 %v9466_v62 }
 0x4e7   :  { %7026 = vmatprep.subr.bf16.mxu0 %v9470_v7  ;;  %7058 = vmatprep.subr.bf16.mxu1 %v9472_v15 }
 0x4ea   :  { %7028 = vmatpush1.bf16.msra.mxu0 %v9476_v40  ;;  %7060 = vmatpush1.bf16.msra.mxu1 %v9478_v46 }
 0x4eb   :  { %7030 = vmatprep.subr.bf16.mxu0 %v9482_v21  ;;  %7062 = vmatprep.subr.bf16.mxu1 %v9484_v60 }
 0x4ee   :  { %7032 = vmatpush1.bf16.msra.mxu0 %v9304_v33  ;;  %7064 = vmatpush1.bf16.msra.mxu1 %v9488_v24  ;;  %v3378_v33 = vld [vmem:[#allocation9 + $0x8] sm:$0xff] }
 0x4ef   :  { %7034 = vmatprep.subr.bf16.mxu0 %v9308_v38  ;;  %7066 = vmatprep.subr.bf16.mxu1 %v9492_v58  ;;  %v9506_v8 = vpack.c.bf16 %v3382_v42, %v3378_v33  ;;  %v3384_v38 = vld [vmem:[#allocation9 + $0x38] sm:$0xff]  ;;  %v9525_v33 = vpack.c.bf16 %v3391_v5, %v3387_v50  ;;  %v3394_v42 = vld [vmem:[#allocation9 + $0x88] sm:$0xff] }
 0x4f0   :  { %v9508_v44 = vpack.c.bf16 %v3384_v38, %v3380_v32  ;;  %v3398_v32 = vld [vmem:[#allocation9 + $0xa8] sm:$0xff]  ;;  %v3396_v38 = vld [vmem:[#allocation9 + $0x98] sm:$0xff] }
 0x4f1   :  { %10847 = vst [vmem:[#allocation24_spill] sm:$0xff] %v9525_v33  ;;  %v3406_v50 = vld [vmem:[#allocation9 + $0xe8] sm:$0xff]  ;;  %v3404_v5 = vld [vmem:[#allocation9 + $0xd8] sm:$0xff] }
 0x4f2   :  { %7036 = vmatpush1.bf16.msra.mxu0 %v9312_v0  ;;  %7068 = vmatpush1.bf16.msra.mxu1 %v9496_v30  ;;  %v9510_v0 = vpack.c.bf16 %v3381_v20, %v3377_v4  ;;  %v9530_v4 = vpack.c.bf16 %v3398_v32, %v3394_v42  ;;  %v3400_v20 = vld [vmem:[#allocation9 + $0xb8] sm:$0xff]  ;;  %v9542_v42 = vpack.c.bf16 %v3406_v50, %v3402_v47  ;;  %v3414_v47 = vld [vmem:[#allocation9 + $0x128] sm:$0xff] }
 0x4f3   :  { %7070 = vmatprep.subr.bf16.mxu0 %v9506_v8  ;;  %7102 = vmatprep.subr.bf16.mxu1 %v9508_v44  ;;  %v9532_v2 = vpack.c.bf16 %v3400_v20, %v3396_v38  ;;  %v3408_v32 = vld [vmem:[#allocation9 + $0xf8] sm:$0xff]  ;;  %v3401_v38 = vld [vmem:[#allocation9 + $0xc0] sm:$0xff] }
 0x4f4   :  { %10848 = vst [vmem:[#allocation25_spill] sm:$0xff] %v9530_v4  ;;  %10852 = vst [vmem:[#allocation29_spill] sm:$0xff] %v9542_v42  ;;  %v3405_v20 = vld [vmem:[#allocation9 + $0xe0] sm:$0xff]  ;;  %v3412_v50 = vld [vmem:[#allocation9 + $0x118] sm:$0xff] }
 0x4f5   :  { %3300 = vmatmul.mubr.f32.vlgmr.msra.gmra.mrb[8].mxu0 %v9414_v61  ;;  %3371 = vmatmul.mubr.f32.vlgmr.msra.gmra.mrb[8].mxu1 %v9414_v61  ;;  %v9513_v61 = vpack.c.bf16 %v3383_v36, %v3379_v48  ;;  %v3393_v48 = vld [vmem:[#allocation9 + $0x80] sm:$0xff]  ;;  %10849 = vst [vmem:[#allocation26_spill] sm:$0xff] %v9532_v2 }
 0x4f6   :  { %3505 = vmatprep.mubr.f32.mxu0 %v10666_v43  ;;  %3576 = vmatprep.mubr.f32.mxu1 %v10666_v43  ;;  %v3397_v36 = vld [vmem:[#allocation9 + $0xa0] sm:$0xff] }
 0x4f7   :  { %7072 = vmatpush1.bf16.msra.mxu0 %v9510_v0  ;;  %7104 = vmatpush1.bf16.msra.mxu1 %v9513_v61  ;;  %v9534_v19 = vpack.c.bf16 %v3397_v36, %v3393_v48  ;;  %v9544_v48 = vpack.c.bf16 %v3408_v32, %v3404_v5  ;;  %v9546_v36 = vpack.c.bf16 %v3405_v20, %v3401_v38  ;;  %v3416_v5 = vld [vmem:[#allocation9 + $0x138] sm:$0xff]  ;;  %v3409_v32 = vld [vmem:[#allocation9 + $0x100] sm:$0xff] }
 0x4f8   :  { %7074 = vmatprep.subr.bf16.mxu0 %v9518_v23  ;;  %7106 = vmatprep.subr.bf16.mxu1 %v9520_v22  ;;  %v3413_v38 = vld [vmem:[#allocation9 + $0x120] sm:$0xff]  ;;  %v9556_v20 = vpack.c.bf16 %v3416_v5, %v3412_v50  ;;  %v3424_v50 = vld [vmem:[#allocation9 + $0x178] sm:$0xff] }
 0x4f9   :  { %10850 = vst [vmem:[#allocation27_spill] sm:$0xff] %v9534_v19  ;;  %10853 = vst [vmem:[#allocation30_spill] sm:$0xff] %v9544_v48  ;;  %v3417_v5 = vld [vmem:[#allocation9 + $0x140] sm:$0xff] }
 0x4fa   :  { %10854 = vst [vmem:[#allocation31_spill] sm:$0xff] %v9546_v36  ;;  %10857 = vst [vmem:[#allocation34_spill] sm:$0xff] %v9556_v20 }
 0x4fb   :  { %7076 = vmatpush1.bf16.msra.mxu0 %v9522_v9  ;;  %7108 = vmatpush1.bf16.msra.mxu1 %v9525_v33  ;;  %v3639_v33 = vld [vmem:[#allocation7 + $0xa8] sm:$0xff]  ;;  %v3637_v9 = vld [vmem:[#allocation7 + $0x98] sm:$0xff] }
 0x4fc   :  { %7078 = vmatprep.subr.bf16.mxu0 %v9530_v4  ;;  %7110 = vmatprep.subr.bf16.mxu1 %v9532_v2  ;;  %v9558_v2 = vpack.c.bf16 %v3413_v38, %v3409_v32  ;;  %v3421_v32 = vld [vmem:[#allocation9 + $0x160] sm:$0xff]  ;;  %v3635_v4 = vld [vmem:[#allocation7 + $0x88] sm:$0xff] }
 0x4fe   :  { %10858 = vst [vmem:[#allocation35_spill] sm:$0xff] %v9558_v2 }
 0x4ff   :  { %7080 = vmatpush1.bf16.msra.mxu0 %v9534_v19  ;;  %7112 = vmatpush1.bf16.msra.mxu1 %v9537_v6  ;;  %v3410_v6 = vld [vmem:[#allocation9 + $0x108] sm:$0xff] }
 0x500   :  { %7082 = vmatprep.subr.bf16.mxu0 %v9542_v42  ;;  %7114 = vmatprep.subr.bf16.mxu1 %v9544_v48  ;;  %v9554_v19 = vpack.c.bf16 %v3414_v47, %v3410_v6  ;;  %v9561_v48 = vpack.c.bf16 %v3415_v39, %v3411_v16  ;;  %v3422_v6 = vld [vmem:[#allocation9 + $0x168] sm:$0xff]  ;;  %v3420_v47 = vld [vmem:[#allocation9 + $0x158] sm:$0xff]  ;;  %v9570_v42 = vpack.c.bf16 %v3421_v32, %v3417_v5  ;;  %v3419_v16 = vld [vmem:[#allocation9 + $0x150] sm:$0xff] }
 0x501   :  { %v9568_v38 = vpack.c.bf16 %v3424_v50, %v3420_v47  ;;  %v3423_v39 = vld [vmem:[#allocation9 + $0x170] sm:$0xff]  ;;  %v3432_v47 = vld [vmem:[#allocation9 + $0x1b8] sm:$0xff]  ;;  %v3425_v50 = vld [vmem:[#allocation9 + $0x180] sm:$0xff] }
 0x502   :  { %10856 = vst [vmem:[#allocation33_spill] sm:$0xff] %v9554_v19  ;;  %10859 = vst [vmem:[#allocation36_spill] sm:$0xff] %v9561_v48  ;;  %v3429_v5 = vld [vmem:[#allocation9 + $0x1a0] sm:$0xff] }
 0x503   :  { %7084 = vmatpush1.bf16.msra.mxu0 %v9546_v36  ;;  %7116 = vmatpush1.bf16.msra.mxu1 %v9549_v27  ;;  %v3418_v27 = vld [vmem:[#allocation9 + $0x148] sm:$0xff]  ;;  %10861 = vst [vmem:[#allocation38_spill] sm:$0xff] %v9568_v38  ;;  %10862 = vst [vmem:[#allocation39_spill] sm:$0xff] %v9570_v42 }
 0x504   :  { %7086 = vmatprep.subr.bf16.mxu0 %v9554_v19  ;;  %7118 = vmatprep.subr.bf16.mxu1 %v9556_v20  ;;  %v9566_v36 = vpack.c.bf16 %v3422_v6, %v3418_v27  ;;  %v9573_v20 = vpack.c.bf16 %v3423_v39, %v3419_v16  ;;  %v3430_v27 = vld [vmem:[#allocation9 + $0x1a8] sm:$0xff]  ;;  %v3428_v6 = vld [vmem:[#allocation9 + $0x198] sm:$0xff]  ;;  %v9582_v19 = vpack.c.bf16 %v3429_v5, %v3425_v50  ;;  %v3427_v16 = vld [vmem:[#allocation9 + $0x190] sm:$0xff] }
 0x505   :  { %v9580_v32 = vpack.c.bf16 %v3432_v47, %v3428_v6  ;;  %v3431_v39 = vld [vmem:[#allocation9 + $0x1b0] sm:$0xff]  ;;  %v3440_v6 = vld [vmem:[#allocation9 + $0x1f8] sm:$0xff]  ;;  %v3433_v47 = vld [vmem:[#allocation9 + $0x1c0] sm:$0xff] }
 0x506   :  { %10860 = vst [vmem:[#allocation37_spill] sm:$0xff] %v9566_v36  ;;  %10863 = vst [vmem:[#allocation40_spill] sm:$0xff] %v9573_v20  ;;  %v3437_v50 = vld [vmem:[#allocation9 + $0x1e0] sm:$0xff] }
 0x507   :  { %7088 = vmatpush1.bf16.msra.mxu0 %v9558_v2  ;;  %7120 = vmatpush1.bf16.msra.mxu1 %v9561_v48  ;;  %v3426_v48 = vld [vmem:[#allocation9 + $0x188] sm:$0xff]  ;;  %10865 = vst [vmem:[#allocation42_spill] sm:$0xff] %v9580_v32  ;;  %10866 = vst [vmem:[#allocation43_spill] sm:$0xff] %v9582_v19 }
 0x508   :  { %7090 = vmatprep.subr.bf16.mxu0 %v9566_v36  ;;  %7122 = vmatprep.subr.bf16.mxu1 %v9568_v38  ;;  %v9578_v2 = vpack.c.bf16 %v3430_v27, %v3426_v48  ;;  %v9585_v38 = vpack.c.bf16 %v3431_v39, %v3427_v16  ;;  %v3438_v48 = vld [vmem:[#allocation9 + $0x1e8] sm:$0xff]  ;;  %v3436_v27 = vld [vmem:[#allocation9 + $0x1d8] sm:$0xff]  ;;  %v9594_v36 = vpack.c.bf16 %v3437_v50, %v3433_v47  ;;  %v3435_v16 = vld [vmem:[#allocation9 + $0x1d0] sm:$0xff] }
 0x509   :  { %v9592_v5 = vpack.c.bf16 %v3440_v6, %v3436_v27  ;;  %v3439_v39 = vld [vmem:[#allocation9 + $0x1f0] sm:$0xff]  ;;  %v3625_v27 = vld [vmem:[#allocation7 + $0x38] sm:$0xff] }
 0x50a   :  { %10864 = vst [vmem:[#allocation41_spill] sm:$0xff] %v9578_v2  ;;  %10867 = vst [vmem:[#allocation44_spill] sm:$0xff] %v9585_v38 }
 0x50b   :  { %7092 = vmatpush1.bf16.msra.mxu0 %v9570_v42  ;;  %7124 = vmatpush1.bf16.msra.mxu1 %v9573_v20  ;;  %v3434_v20 = vld [vmem:[#allocation9 + $0x1c8] sm:$0xff]  ;;  %10869 = vst [vmem:[#allocation46_spill] sm:$0xff] %v9592_v5  ;;  %10870 = vst [vmem:[#allocation47_spill] sm:$0xff] %v9594_v36 }
 0x50c   :  { %7094 = vmatprep.subr.bf16.mxu0 %v9578_v2  ;;  %7126 = vmatprep.subr.bf16.mxu1 %v9580_v32  ;;  %v9590_v42 = vpack.c.bf16 %v3438_v48, %v3434_v20  ;;  %v9597_v32 = vpack.c.bf16 %v3439_v39, %v3435_v16  ;;  %v3623_v20 = vld [vmem:[#allocation7 + $0x28] sm:$0xff]  ;;  %v3621_v48 = vld [vmem:[#allocation7 + $0x18] sm:$0xff] }
 0x50d   :  { %v9604_v6 = vpack.c.bf16 %v3625_v27, %v3621_v48 }
 0x50e   :  { %10868 = vst [vmem:[#allocation45_spill] sm:$0xff] %v9590_v42  ;;  %10871 = vst [vmem:[#allocation48_spill] sm:$0xff] %v9597_v32 }
 0x50f   :  { %7096 = vmatpush1.bf16.msra.mxu0 %v9582_v19  ;;  %7128 = vmatpush1.bf16.msra.mxu1 %v9585_v38  ;;  %v3619_v38 = vld [vmem:[#allocation7 + $0x8] sm:$0xff]  ;;  %10873 = vst [vmem:[#allocation50_spill] sm:$0xff] %v9604_v6 }
 0x510   :  { %7098 = vmatprep.subr.bf16.mxu0 %v9590_v42  ;;  %7130 = vmatprep.subr.bf16.mxu1 %v9592_v5  ;;  %v9602_v19 = vpack.c.bf16 %v3623_v20, %v3619_v38 }
 0x512   :  { %10872 = vst [vmem:[#allocation49_spill] sm:$0xff] %v9602_v19 }
 0x513   :  { %7100 = vmatpush1.bf16.msra.mxu0 %v9594_v36  ;;  %7132 = vmatpush1.bf16.msra.mxu1 %v9597_v32 }
 0x514   :  { %7134 = vmatprep.subr.bf16.mxu0 %v9602_v19  ;;  %7166 = vmatprep.subr.bf16.mxu1 %v9604_v6 }
 0x5a8   :  { %v3065_v47 = vpop.f32.mrb[22].mxu0  ;;  %v3136_v50 = vpop.f32.mrb[24].mxu1 }
 0x5a9   :  { %v3141_v16 = vadd.f32 %v3065_v47, %v10823_v26  ;;  %v3067_v39 = vpop.f32.mrb[23].mxu0  ;;  %v3138_v36 = vpop.f32.mrb[25].mxu1  ;;  %v3143_v48 = vadd.f32 %v3136_v50, %v10826_v28 }
 0x5aa   :  { %v3142_v5 = vadd.f32 %v3067_v39, %v10824_v35  ;;  %v3144_v38 = vadd.f32 %v3138_v36, %v10825_v59  ;;  %v3632_v35 = vld [vmem:[#allocation7 + $0x70] sm:$0xff] }
 0x5ab   :  { %v6141_v42 = vmul.f32 -1.442695, %v3141_v16 }
 0x5ac   :  { %v6142_v2 = vmul.f32 -1.442695, %v3142_v5  ;;  %v6143_v20 = vmul.f32 -1.442695, %v3144_v38 }
 0x5ad   :  { %8025 = vpow2.f32 %v6141_v42 }
 0x5ae   :  { %8027 = vpow2.f32 %v6142_v2 }
 0x5af   :  { %8029 = vpow2.f32 %v6143_v20 }
 0x5b0   :  { %8031 = vtanh.f32 %v3143_v48 }
 0x5b7   :  { %v8026_v27 = vpop.eup %8025 }
 0x5b8   :  { %v8028_v19 = vpop.eup %8027  ;;  %v3148_v6 = vadd.f32 1.0, %v8026_v27 }
 0x5b9   :  { %v3154_v32 = vadd.f32 1.0, %v8028_v19  ;;  %v8030_v47 = vpop.eup %8029 }
 0x5ba   :  { %8033 = vrcp.f32 %v3148_v6  ;;  %v8032_v26 = vpop.eup %8031  ;;  %v3161_v42 = vadd.f32 1.0, %v8030_v47  ;;  %v3622_v47 = vld [vmem:[#allocation7 + $0x20] sm:$0xff] }
 0x5bb   :  { %8035 = vrcp.f32 %v3154_v32 }
 0x5bc   :  { %8037 = vrcp.f32 %v3161_v42  ;;  %v3631_v42 = vld [vmem:[#allocation7 + $0x68] sm:$0xff] }
 0x5c4   :  { %v8034_v39 = vpop.eup %8033 }
 0x5c5   :  { %v8036_v16 = vpop.eup %8035  ;;  %v3165_v5 = vmul.f32 %v8034_v39, %v8032_v26  ;;  %v3620_v39 = vld [vmem:[#allocation7 + $0x10] sm:$0xff] }
 0x5c6   :  { %v3164_v2 = vmul.f32 %v8036_v16, %v9359_v11  ;;  %v3618_v11 = vld [vmem:[#allocation7] sm:$0xff]  ;;  %v3624_v16 = vld [vmem:[#allocation7 + $0x30] sm:$0xff] }
 0x5c8   :  { %v9613_v36 = vadd.f32 %v3165_v5, %v3164_v2  ;;  %v3301_v38 = vpop.f32.mrb[8].mxu0  ;;  %v3372_v50 = vpop.f32.mrb[8].mxu1  ;;  %v3627_v5 = vld [vmem:[#allocation7 + $0x48] sm:$0xff]  ;;  %v3629_v2 = vld [vmem:[#allocation7 + $0x58] sm:$0xff] }
 0x5c9   :  { %v7815_v27 = vadd.f32 %v3301_v38, %v10828_v12  ;;  %v3303_v20 = vpop.f32.mrb[9].mxu0  ;;  %v3374_v48 = vpop.f32.mrb[9].mxu1  ;;  %v3633_v38 = vld [vmem:[#allocation7 + $0x78] sm:$0xff] }
 0x5ca   :  { %10874 = vst [vmem:[#allocation51_spill] sm:$0xff] %v9613_v36  ;;  %v7816_v19 = vadd.f32 %v3303_v20, %v10829_v56  ;;  %8039 = vtanh.f32 %v9613_v36  ;;  %v7832_v26 = vadd.f32 %v3374_v48, %v10830_v52  ;;  %v8038_v12 = vpop.eup %8037  ;;  %v9619_v20 = vpack.c.bf16 %v3622_v47, %v3618_v11  ;;  %v3628_v36 = vld [vmem:[#allocation7 + $0x50] sm:$0xff] }
 0x5cb   :  { %v6144_v32 = vmul.f32 -1.442695, %v7815_v27  ;;  %v9621_v56 = vpack.c.bf16 %v3624_v16, %v3620_v39  ;;  %v3626_v27 = vld [vmem:[#allocation7 + $0x40] sm:$0xff]  ;;  %v9628_v52 = vpack.c.bf16 %v3633_v38, %v3629_v2  ;;  %v3640_v38 = vld [vmem:[#allocation7 + $0xb0] sm:$0xff] }
 0x5cc   :  { %v6145_v6 = vmul.f32 -1.442695, %v7816_v19  ;;  %v6146_v59 = vmul.f32 -1.442695, %v7832_v26  ;;  %10875 = vst [vmem:[#allocation52_spill] sm:$0xff] %v9619_v20  ;;  %v3630_v19 = vld [vmem:[#allocation7 + $0x60] sm:$0xff] }
 0x5cd   :  { %8041 = vpow2.f32 %v6144_v32  ;;  %10876 = vst [vmem:[#allocation54_spill] sm:$0xff] %v9621_v56  ;;  %v7831_v32 = vadd.f32 %v3372_v50, %v8803_v17  ;;  %10879 = vst [vmem:[#allocation57_spill] sm:$0xff] %v9628_v52  ;;  %v3641_v26 = vld [vmem:[#allocation7 + $0xb8] sm:$0xff]  ;;  %v3634_v50 = vld [vmem:[#allocation7 + $0x80] sm:$0xff] }
 0x5ce   :  { %8043 = vpow2.f32 %v6145_v6  ;;  %v9626_v6 = vpack.c.bf16 %v3631_v42, %v3627_v5  ;;  %v3638_v16 = vld [vmem:[#allocation7 + $0xa0] sm:$0xff]  ;;  %v9640_v42 = vpack.c.bf16 %v3639_v33, %v3635_v4  ;;  %v9642_v2 = vpack.c.bf16 %v3641_v26, %v3637_v9 }
 0x5cf   :  { %8045 = vpow2.f32 %v6146_v59  ;;  %v3636_v59 = vld [vmem:[#allocation7 + $0x90] sm:$0xff]  ;;  %v9648_v33 = vpack.c.bf16 %v3638_v16, %v3634_v50  ;;  %v3642_v4 = vld [vmem:[#allocation7 + $0xc0] sm:$0xff] }
 0x5d0   :  { %10878 = vst [vmem:[#allocation56_spill] sm:$0xff] %v9626_v6  ;;  %8047 = vtanh.f32 %v7831_v32  ;;  %10882 = vst [vmem:[#allocation60_spill] sm:$0xff] %v9640_v42  ;;  %v9650_v9 = vpack.c.bf16 %v3640_v38, %v3636_v59  ;;  %v3650_v59 = vld [vmem:[#allocation7 + $0x100] sm:$0xff] }
 0x5d1   :  { %10883 = vst [vmem:[#allocation61_spill] sm:$0xff] %v9642_v2  ;;  %10884 = vst [vmem:[#allocation62_spill] sm:$0xff] %v9648_v33  ;;  %v3654_v38 = vld [vmem:[#allocation7 + $0x120] sm:$0xff] }
 0x5d2   :  { %10885 = vst [vmem:[#allocation63_spill] sm:$0xff] %v9650_v9 }
 0x5d4   :  { %v8040_v28 = vpop.eup %8039 }
 0x5d5   :  { %v9624_v48 = vmul.f32 %v8040_v28, %v8038_v12  ;;  %v9634_v28 = vpack.c.bf16 %v3630_v19, %v3626_v27  ;;  %v9636_v12 = vpack.c.bf16 %v3632_v35, %v3628_v36  ;;  %v3647_v27 = vld [vmem:[#allocation7 + $0xe8] sm:$0xff]  ;;  %v3645_v19 = vld [vmem:[#allocation7 + $0xd8] sm:$0xff]  ;;  %v3646_v36 = vld [vmem:[#allocation7 + $0xe0] sm:$0xff] }
 0x5d6   :  { %v3649_v35 = vld [vmem:[#allocation7 + $0xf8] sm:$0xff]  ;;  %v9660_v50 = vpack.c.bf16 %v3646_v36, %v3642_v4 }
 0x5d7   :  { %10877 = vst [vmem:[#allocation55_spill] sm:$0xff] %v9624_v48  ;;  %v8042_v11 = vpop.eup %8041  ;;  %3506 = vmatmul.mubr.f32.vlgmr.msra.gmra.mrb[24].mxu0 %v9624_v48  ;;  %3577 = vmatmul.mubr.f32.vlgmr.msra.gmra.mrb[26].mxu1 %v9624_v48  ;;  %10880 = vst [vmem:[#allocation58_spill] sm:$0xff] %v9634_v28  ;;  %v9656_v26 = vpack.c.bf16 %v3649_v35, %v3645_v19  ;;  %v3655_v48 = vld [vmem:[#allocation7 + $0x128] sm:$0xff]  ;;  %v3652_v19 = vld [vmem:[#allocation7 + $0x110] sm:$0xff] }
 0x5d8   :  { %v8044_v47 = vpop.eup %8043  ;;  %v3597_v39 = vadd.f32 1.0, %v8042_v11  ;;  %7136 = vmatpush1.bf16.msra.mxu0 %v9619_v20  ;;  %7168 = vmatpush1.bf16.msra.mxu1 %v9621_v56  ;;  %10881 = vst [vmem:[#allocation59_spill] sm:$0xff] %v9636_v12  ;;  %v3643_v11 = vld [vmem:[#allocation7 + $0xc8] sm:$0xff]  ;;  %10888 = vst [vmem:[#allocation69_spill] sm:$0xff] %v9660_v50  ;;  %v3656_v35 = vld [vmem:[#allocation7 + $0x130] sm:$0xff] }
 0x5d9   :  { %v3603_v5 = vadd.f32 1.0, %v8044_v47  ;;  %7138 = vmatprep.subr.bf16.mxu0 %v9626_v6  ;;  %7170 = vmatprep.subr.bf16.mxu1 %v9628_v52  ;;  %v9654_v32 = vpack.c.bf16 %v3647_v27, %v3643_v11  ;;  %10887 = vst [vmem:[#allocation68_spill] sm:$0xff] %v9656_v26  ;;  %v3644_v47 = vld [vmem:[#allocation7 + $0xd0] sm:$0xff]  ;;  %v3665_v4 = vld [vmem:[#allocation7 + $0x178] sm:$0xff] }
 0x5da   :  { %8049 = vrcp.f32 %v3597_v39  ;;  %3746 = vmatprep.mubr.f32.mxu0 %v10666_v43  ;;  %3817 = vmatprep.mubr.f32.mxu1 %v10666_v43  ;;  %v3648_v39 = vld [vmem:[#allocation7 + $0xf0] sm:$0xff] }
 0x5db   :  { %8051 = vrcp.f32 %v3603_v5  ;;  %10886 = vst [vmem:[#allocation67_spill] sm:$0xff] %v9654_v32  ;;  %v3651_v5 = vld [vmem:[#allocation7 + $0x108] sm:$0xff]  ;;  %v9662_v16 = vpack.c.bf16 %v3648_v39, %v3644_v47  ;;  %v9672_v39 = vpack.c.bf16 %v3654_v38, %v3650_v59  ;;  %v3664_v56 = vld [vmem:[#allocation7 + $0x170] sm:$0xff] }
 0x5dc   :  { %7140 = vmatpush1.bf16.msra.mxu0 %v9634_v28  ;;  %7172 = vmatpush1.bf16.msra.mxu1 %v9636_v12  ;;  %v3653_v28 = vld [vmem:[#allocation7 + $0x118] sm:$0xff]  ;;  %v9666_v11 = vpack.c.bf16 %v3655_v48, %v3651_v5  ;;  %v3658_v48 = vld [vmem:[#allocation7 + $0x140] sm:$0xff]  ;;  %v3671_v38 = vld [vmem:[#allocation7 + $0x1a8] sm:$0xff] }
 0x5dd   :  { %7142 = vmatprep.subr.bf16.mxu0 %v9640_v42  ;;  %7174 = vmatprep.subr.bf16.mxu1 %v9642_v2  ;;  %v3657_v12 = vld [vmem:[#allocation7 + $0x138] sm:$0xff]  ;;  %10889 = vst [vmem:[#allocation70_spill] sm:$0xff] %v9662_v16  ;;  %v3659_v2 = vld [vmem:[#allocation7 + $0x148] sm:$0xff] }
 0x5de   :  { %v9668_v27 = vpack.c.bf16 %v3657_v12, %v3653_v28  ;;  %v3663_v42 = vld [vmem:[#allocation7 + $0x168] sm:$0xff]  ;;  %v3662_v28 = vld [vmem:[#allocation7 + $0x160] sm:$0xff] }
 0x5df   :  { %v9678_v52 = vpack.c.bf16 %v3663_v42, %v3659_v2  ;;  %v3666_v2 = vld [vmem:[#allocation7 + $0x180] sm:$0xff] }
 0x5e0   :  { %7144 = vmatpush1.bf16.msra.mxu0 %v9648_v33  ;;  %7176 = vmatpush1.bf16.msra.mxu1 %v9650_v9  ;;  %v8046_v33 = vpop.eup %8045  ;;  %v3661_v9 = vld [vmem:[#allocation7 + $0x158] sm:$0xff] }
 0x5e1   :  { %7146 = vmatprep.subr.bf16.mxu0 %v9654_v32  ;;  %7178 = vmatprep.subr.bf16.mxu1 %v9656_v26  ;;  %v8048_v36 = vpop.eup %8047  ;;  %v9674_v26 = vpack.c.bf16 %v3656_v35, %v3652_v19  ;;  %v3610_v32 = vadd.f32 1.0, %v8046_v33  ;;  %v9680_v6 = vpack.c.bf16 %v3665_v4, %v3661_v9  ;;  %v3669_v19 = vld [vmem:[#allocation7 + $0x198] sm:$0xff]  ;;  %v9687_v33 = vpack.c.bf16 %v3662_v28, %v3658_v48  ;;  %v3670_v9 = vld [vmem:[#allocation7 + $0x1a0] sm:$0xff] }
 0x5e2   :  { %v3673_v35 = vld [vmem:[#allocation7 + $0x1b8] sm:$0xff] }
 0x5e3   :  { %8053 = vrcp.f32 %v3610_v32  ;;  %v9695_v4 = vpack.c.bf16 %v3673_v35, %v3669_v19  ;;  %v3681_v48 = vld [vmem:[#allocation7 + $0x1f8] sm:$0xff]  ;;  %v3676_v19 = vld [vmem:[#allocation7 + $0x1d0] sm:$0xff] }
 0x5e4   :  { %v8050_v47 = vpop.eup %8049  ;;  %7148 = vmatpush1.bf16.msra.mxu0 %v9660_v50  ;;  %7180 = vmatpush1.bf16.msra.mxu1 %v9662_v16  ;;  %v3660_v50 = vld [vmem:[#allocation7 + $0x150] sm:$0xff]  ;;  %v3667_v16 = vld [vmem:[#allocation7 + $0x188] sm:$0xff] }
 0x5e5   :  { %v8052_v12 = vpop.eup %8051  ;;  %v3614_v5 = vmul.f32 %v8050_v47, %v8048_v36  ;;  %7150 = vmatprep.subr.bf16.mxu0 %v9666_v11  ;;  %7182 = vmatprep.subr.bf16.mxu1 %v9668_v27  ;;  %v9689_v42 = vpack.c.bf16 %v3664_v56, %v3660_v50  ;;  %v3668_v36 = vld [vmem:[#allocation7 + $0x190] sm:$0xff]  ;;  %v9700_v56 = vpack.c.bf16 %v3670_v9, %v3666_v2  ;;  %v3674_v50 = vld [vmem:[#allocation7 + $0x1c0] sm:$0xff] }
 0x5e6   :  { %v3613_v59 = vmul.f32 %v8052_v12, %v9389_v57  ;;  %v9693_v57 = vpack.c.bf16 %v3671_v38, %v3667_v16  ;;  %v3672_v47 = vld [vmem:[#allocation7 + $0x1b0] sm:$0xff]  ;;  %v3675_v12 = vld [vmem:[#allocation7 + $0x1c8] sm:$0xff]  ;;  %v3678_v38 = vld [vmem:[#allocation7 + $0x1e0] sm:$0xff] }
 0x5e7   :  { %v9702_v32 = vpack.c.bf16 %v3672_v47, %v3668_v36  ;;  %v3680_v35 = vld [vmem:[#allocation7 + $0x1f0] sm:$0xff]  ;;  %v9712_v2 = vpack.c.bf16 %v3678_v38, %v3674_v50  ;;  %v10918_v38 = vld [vmem:[#allocation17_spill] sm:$0xff] }
 0x5e8   :  { %v9683_v20 = vadd.f32 %v3614_v5, %v3613_v59  ;;  %7152 = vmatpush1.bf16.msra.mxu0 %v9672_v39  ;;  %7184 = vmatpush1.bf16.msra.mxu1 %v9674_v26  ;;  %v3679_v5 = vld [vmem:[#allocation7 + $0x1e8] sm:$0xff]  ;;  %v3677_v59 = vld [vmem:[#allocation7 + $0x1d8] sm:$0xff]  ;;  %v9714_v9 = vpack.c.bf16 %v3680_v35, %v3676_v19 }
 0x5e9   :  { %7154 = vmatprep.subr.bf16.mxu0 %v9678_v52  ;;  %7186 = vmatprep.subr.bf16.mxu1 %v9680_v6  ;;  %v9706_v16 = vpack.c.bf16 %v3679_v5, %v3675_v12  ;;  %v9708_v28 = vpack.c.bf16 %v3681_v48, %v3677_v59  ;;  %v10916_v5 = vld [vmem:[#allocation49_spill] sm:$0xff]  ;;  %v10917_v59 = vld [vmem:[#allocation50_spill] sm:$0xff] }
 0x5ea   :  { %8055 = vtanh.f32 %v9683_v20 }
 0x5ec   :  { %7156 = vmatpush1.bf16.msra.mxu0 %v9687_v33  ;;  %7188 = vmatpush1.bf16.msra.mxu1 %v9689_v42 }
 0x5ed   :  { %7158 = vmatprep.subr.bf16.mxu0 %v9693_v57  ;;  %7190 = vmatprep.subr.bf16.mxu1 %v9695_v4  ;;  %v8054_v36 = vpop.eup %8053 }
 0x5f0   :  { %7160 = vmatpush1.bf16.msra.mxu0 %v9700_v56  ;;  %7192 = vmatpush1.bf16.msra.mxu1 %v9702_v32 }
 0x5f1   :  { %7162 = vmatprep.subr.bf16.mxu0 %v9706_v16  ;;  %7194 = vmatprep.subr.bf16.mxu1 %v9708_v28 }
 0x5f4   :  { %v8056_v47 = vpop.eup %8055  ;;  %7164 = vmatpush1.bf16.msra.mxu0 %v9712_v2  ;;  %7196 = vmatpush1.bf16.msra.mxu1 %v9714_v9 }
 0x5f5   :  { %7198 = vmatprep.subr.bf16.mxu0 %v9404_v3  ;;  %7230 = vmatprep.subr.bf16.mxu1 %v9406_v25  ;;  %v3617_v12 = vmul.f32 %v8056_v47, %v8054_v36  ;;  %v3902_v3 = vld [vmem:[#allocation4 + $0x180] sm:$0xff]  ;;  %v10919_v47 = vld [vmem:[#allocation18_spill] sm:$0xff] }
 0x5f6   :  { %v3906_v25 = vld [vmem:[#allocation4 + $0x1a0] sm:$0xff] }
 0x5f7   :  { %3747 = vmatmul.mubr.f32.vlgmr.msra.gmra.mrb[24].mxu0 %v3617_v12  ;;  %3818 = vmatmul.mubr.f32.vlgmr.msra.gmra.mrb[26].mxu1 %v3617_v12 }
 0x5f8   :  { %7200 = vmatpush1.bf16.msra.mxu0 %v9410_v55  ;;  %7232 = vmatpush1.bf16.msra.mxu1 %v9412_v37  ;;  %v3911_v55 = vld [vmem:[#allocation4 + $0x1c8] sm:$0xff] }
 0x5f9   :  { %7202 = vmatprep.subr.bf16.mxu0 %v9418_v31  ;;  %7234 = vmatprep.subr.bf16.mxu1 %v9420_v14  ;;  %v3915_v37 = vld [vmem:[#allocation4 + $0x1e8] sm:$0xff]  ;;  %v9746_v31 = vpack.c.bf16 %v3906_v25, %v3902_v3 }
 0x5fa   :  { %3982 = vmatprep.mubr.f32.mxu0 %v10666_v43  ;;  %4053 = vmatprep.mubr.f32.mxu1 %v10666_v43  ;;  %v9750_v14 = vpack.c.bf16 %v3915_v37, %v3911_v55  ;;  %v10920_v55 = vld [vmem:[#allocation19_spill] sm:$0xff] }
 0x5fc   :  { %7204 = vmatpush1.bf16.msra.mxu0 %v9426_v1  ;;  %7236 = vmatpush1.bf16.msra.mxu1 %v9428_v29  ;;  %v3910_v1 = vld [vmem:[#allocation4 + $0x1c0] sm:$0xff] }
 0x5fd   :  { %7206 = vmatprep.subr.bf16.mxu0 %v9432_v53  ;;  %7238 = vmatprep.subr.bf16.mxu1 %v9434_v18  ;;  %v3914_v29 = vld [vmem:[#allocation4 + $0x1e0] sm:$0xff]  ;;  %v10890_v18 = vld [vmem:[#allocation23_spill] sm:$0xff] }
 0x5fe   :  { %v9754_v53 = vpack.c.bf16 %v3914_v29, %v3910_v1  ;;  %v10921_v29 = vld [vmem:[#allocation20_spill] sm:$0xff] }
 0x600   :  { %7208 = vmatpush1.bf16.msra.mxu0 %v9440_v54  ;;  %7240 = vmatpush1.bf16.msra.mxu1 %v9442_v10  ;;  %v10891_v54 = vld [vmem:[#allocation24_spill] sm:$0xff]  ;;  %v10892_v10 = vld [vmem:[#allocation25_spill] sm:$0xff] }
 0x601   :  { %7210 = vmatprep.subr.bf16.mxu0 %v9446_v51  ;;  %7242 = vmatprep.subr.bf16.mxu1 %v9448_v49  ;;  %v10893_v51 = vld [vmem:[#allocation26_spill] sm:$0xff]  ;;  %v10894_v49 = vld [vmem:[#allocation27_spill] sm:$0xff] }
 0x604   :  { %7212 = vmatpush1.bf16.msra.mxu0 %v9452_v63  ;;  %7244 = vmatpush1.bf16.msra.mxu1 %v9454_v34  ;;  %v10895_v63 = vld [vmem:[#allocation28_spill] sm:$0xff]  ;;  %v10896_v34 = vld [vmem:[#allocation29_spill] sm:$0xff] }
 0x605   :  { %7214 = vmatprep.subr.bf16.mxu0 %v9458_v13  ;;  %7246 = vmatprep.subr.bf16.mxu1 %v9460_v41  ;;  %v10897_v13 = vld [vmem:[#allocation30_spill] sm:$0xff]  ;;  %v10898_v41 = vld [vmem:[#allocation31_spill] sm:$0xff] }
 0x608   :  { %7216 = vmatpush1.bf16.msra.mxu0 %v9464_v45  ;;  %7248 = vmatpush1.bf16.msra.mxu1 %v9466_v62  ;;  %v10899_v45 = vld [vmem:[#allocation32_spill] sm:$0xff]  ;;  %v10900_v62 = vld [vmem:[#allocation33_spill] sm:$0xff] }
 0x609   :  { %7218 = vmatprep.subr.bf16.mxu0 %v9470_v7  ;;  %7250 = vmatprep.subr.bf16.mxu1 %v9472_v15  ;;  %v10901_v7 = vld [vmem:[#allocation34_spill] sm:$0xff]  ;;  %v10902_v15 = vld [vmem:[#allocation35_spill] sm:$0xff] }
 0x60c   :  { %7220 = vmatpush1.bf16.msra.mxu0 %v9476_v40  ;;  %7252 = vmatpush1.bf16.msra.mxu1 %v9478_v46  ;;  %v10903_v40 = vld [vmem:[#allocation36_spill] sm:$0xff]  ;;  %v10904_v46 = vld [vmem:[#allocation37_spill] sm:$0xff] }
 0x60d   :  { %7222 = vmatprep.subr.bf16.mxu0 %v9482_v21  ;;  %7254 = vmatprep.subr.bf16.mxu1 %v9484_v60  ;;  %v10905_v21 = vld [vmem:[#allocation38_spill] sm:$0xff]  ;;  %v10906_v60 = vld [vmem:[#allocation39_spill] sm:$0xff] }
 0x610   :  { %7224 = vmatpush1.bf16.msra.mxu0 %v9746_v31  ;;  %7256 = vmatpush1.bf16.msra.mxu1 %v9488_v24  ;;  %v10907_v24 = vld [vmem:[#allocation40_spill] sm:$0xff] }
 0x611   :  { %7226 = vmatprep.subr.bf16.mxu0 %v9750_v14  ;;  %7258 = vmatprep.subr.bf16.mxu1 %v9492_v58  ;;  %v10908_v58 = vld [vmem:[#allocation41_spill] sm:$0xff] }
 0x614   :  { %7228 = vmatpush1.bf16.msra.mxu0 %v9754_v53  ;;  %7260 = vmatpush1.bf16.msra.mxu1 %v9496_v30  ;;  %v10909_v30 = vld [vmem:[#allocation42_spill] sm:$0xff] }
 0x615   :  { %7262 = vmatprep.subr.bf16.mxu0 %v9506_v8  ;;  %7294 = vmatprep.subr.bf16.mxu1 %v9508_v44  ;;  %v10910_v8 = vld [vmem:[#allocation43_spill] sm:$0xff]  ;;  %v10911_v44 = vld [vmem:[#allocation44_spill] sm:$0xff] }
 0x617   :  { %3983 = vmatmul.mubr.f32.vlgmr.msra.gmra.mrb[10].mxu0 %v3617_v12  ;;  %4054 = vmatmul.mubr.f32.vlgmr.msra.gmra.mrb[10].mxu1 %v3617_v12 }
 0x618   :  { %7264 = vmatpush1.bf16.msra.mxu0 %v9510_v0  ;;  %7296 = vmatpush1.bf16.msra.mxu1 %v9513_v61  ;;  %v10912_v0 = vld [vmem:[#allocation45_spill] sm:$0xff]  ;;  %v10913_v61 = vld [vmem:[#allocation46_spill] sm:$0xff] }
 0x619   :  { %7266 = vmatprep.subr.bf16.mxu0 %v9518_v23  ;;  %7298 = vmatprep.subr.bf16.mxu1 %v9520_v22  ;;  %v10914_v23 = vld [vmem:[#allocation47_spill] sm:$0xff]  ;;  %v10915_v22 = vld [vmem:[#allocation48_spill] sm:$0xff] }
 0x61a   :  { %4188 = vmatprep.mubr.f32.mxu0 %v10666_v43  ;;  %4259 = vmatprep.mubr.f32.mxu1 %v10666_v43 }
 0x61c   :  { %7268 = vmatpush1.bf16.msra.mxu0 %v10890_v18  ;;  %7300 = vmatpush1.bf16.msra.mxu1 %v10891_v54 }
 0x61d   :  { %7270 = vmatprep.subr.bf16.mxu0 %v10892_v10  ;;  %7302 = vmatprep.subr.bf16.mxu1 %v10893_v51 }
 0x620   :  { %7272 = vmatpush1.bf16.msra.mxu0 %v10894_v49  ;;  %7304 = vmatpush1.bf16.msra.mxu1 %v10895_v63 }
 0x621   :  { %7274 = vmatprep.subr.bf16.mxu0 %v10896_v34  ;;  %7306 = vmatprep.subr.bf16.mxu1 %v10897_v13 }
 0x624   :  { %7276 = vmatpush1.bf16.msra.mxu0 %v10898_v41  ;;  %7308 = vmatpush1.bf16.msra.mxu1 %v10899_v45 }
 0x625   :  { %7278 = vmatprep.subr.bf16.mxu0 %v10900_v62  ;;  %7310 = vmatprep.subr.bf16.mxu1 %v10901_v7  ;;  %v10922_v7 = vld [vmem:[#allocation51_spill] sm:$0xff] }
 0x628   :  { %7280 = vmatpush1.bf16.msra.mxu0 %v10902_v15  ;;  %7312 = vmatpush1.bf16.msra.mxu1 %v10903_v40 }
 0x629   :  { %7282 = vmatprep.subr.bf16.mxu0 %v10904_v46  ;;  %7314 = vmatprep.subr.bf16.mxu1 %v10905_v21 }
 0x62c   :  { %7284 = vmatpush1.bf16.msra.mxu0 %v10906_v60  ;;  %7316 = vmatpush1.bf16.msra.mxu1 %v10907_v24  ;;  %v10923_v60 = vld [vmem:[#allocation64_spill] sm:$0xff] }
 0x62d   :  { %7286 = vmatprep.subr.bf16.mxu0 %v10908_v58  ;;  %7318 = vmatprep.subr.bf16.mxu1 %v10909_v30 }
 0x630   :  { %7288 = vmatpush1.bf16.msra.mxu0 %v10910_v8  ;;  %7320 = vmatpush1.bf16.msra.mxu1 %v10911_v44  ;;  %v10924_v8 = vld [vmem:[#allocation65_spill] sm:$0xff] }
 0x631   :  { %7290 = vmatprep.subr.bf16.mxu0 %v10912_v0  ;;  %7322 = vmatprep.subr.bf16.mxu1 %v10913_v61 }
 0x634   :  { %7292 = vmatpush1.bf16.msra.mxu0 %v10914_v23  ;;  %7324 = vmatpush1.bf16.msra.mxu1 %v10915_v22  ;;  %v10925_v23 = vld [vmem:[#allocation66_spill] sm:$0xff] }
 0x635   :  { %7326 = vmatprep.subr.bf16.mxu0 %v10916_v5  ;;  %7358 = vmatprep.subr.bf16.mxu1 %v10917_v59 }
 0x6ca   :  { %v3748_v48 = vpop.f32.mrb[24].mxu0  ;;  %v3819_v50 = vpop.f32.mrb[26].mxu1 }
 0x6cb   :  { %v3824_v19 = vadd.f32 %v3748_v48, %v10918_v38  ;;  %v3750_v35 = vpop.f32.mrb[25].mxu0  ;;  %v3821_v36 = vpop.f32.mrb[27].mxu1  ;;  %v3826_v18 = vadd.f32 %v3819_v50, %v10921_v29 }
 0x6cc   :  { %v3825_v12 = vadd.f32 %v3750_v35, %v10919_v47  ;;  %v3827_v37 = vadd.f32 %v3821_v36, %v10920_v55 }
 0x6cd   :  { %v6147_v3 = vmul.f32 -1.442695, %v3824_v19 }
 0x6ce   :  { %v6148_v25 = vmul.f32 -1.442695, %v3825_v12  ;;  %v6149_v1 = vmul.f32 -1.442695, %v3827_v37 }
 0x6cf   :  { %8057 = vpow2.f32 %v6147_v3  ;;  %v10927_v3 = vld [vmem:[#allocation52_spill] sm:$0xff] }
 0x6d0   :  { %8059 = vpow2.f32 %v6148_v25  ;;  %v10928_v25 = vld [vmem:[#allocation54_spill] sm:$0xff] }
 0x6d1   :  { %8061 = vpow2.f32 %v6149_v1  ;;  %v10929_v1 = vld [vmem:[#allocation56_spill] sm:$0xff] }
 0x6d2   :  { %8063 = vtanh.f32 %v3826_v18  ;;  %v10930_v18 = vld [vmem:[#allocation57_spill] sm:$0xff] }
 0x6d9   :  { %v8058_v54 = vpop.eup %8057 }
 0x6da   :  { %v8060_v10 = vpop.eup %8059  ;;  %v3831_v51 = vadd.f32 1.0, %v8058_v54  ;;  %v10931_v54 = vld [vmem:[#allocation58_spill] sm:$0xff] }
 0x6db   :  { %v3837_v49 = vadd.f32 1.0, %v8060_v10  ;;  %v8062_v63 = vpop.eup %8061  ;;  %v10932_v10 = vld [vmem:[#allocation59_spill] sm:$0xff] }
 0x6dc   :  { %8065 = vrcp.f32 %v3831_v51  ;;  %v8064_v34 = vpop.eup %8063  ;;  %v3844_v62 = vadd.f32 1.0, %v8062_v63  ;;  %v10933_v51 = vld [vmem:[#allocation60_spill] sm:$0xff]  ;;  %v10935_v63 = vld [vmem:[#allocation62_spill] sm:$0xff] }
 0x6dd   :  { %8067 = vrcp.f32 %v3837_v49  ;;  %v10934_v49 = vld [vmem:[#allocation61_spill] sm:$0xff] }
 0x6de   :  { %8069 = vrcp.f32 %v3844_v62 }
 0x6e6   :  { %v8066_v13 = vpop.eup %8065 }
 0x6e7   :  { %v8068_v41 = vpop.eup %8067  ;;  %v3848_v45 = vmul.f32 %v8066_v13, %v8064_v34  ;;  %v10936_v34 = vld [vmem:[#allocation63_spill] sm:$0xff] }
 0x6e8   :  { %v3847_v15 = vmul.f32 %v8068_v41, %v10922_v7  ;;  %v8070_v5 = vpop.eup %8069  ;;  %v10937_v13 = vld [vmem:[#allocation67_spill] sm:$0xff]  ;;  %v10938_v41 = vld [vmem:[#allocation68_spill] sm:$0xff] }
 0x6ea   :  { %v9801_v40 = vadd.f32 %v3848_v45, %v3847_v15  ;;  %v3984_v46 = vpop.f32.mrb[10].mxu0  ;;  %v4055_v21 = vpop.f32.mrb[10].mxu1  ;;  %v10939_v15 = vld [vmem:[#allocation69_spill] sm:$0xff] }
 0x6eb   :  { %v7817_v24 = vadd.f32 %v3984_v46, %v10923_v60  ;;  %v3986_v58 = vpop.f32.mrb[11].mxu0  ;;  %v4057_v30 = vpop.f32.mrb[11].mxu1  ;;  %v7833_v50 = vadd.f32 %v4055_v21, %v8803_v17  ;;  %v10940_v46 = vld [vmem:[#allocation70_spill] sm:$0xff] }
 0x6ec   :  { %v7818_v44 = vadd.f32 %v3986_v58, %v10924_v8  ;;  %8071 = vtanh.f32 %v9801_v40  ;;  %v7834_v22 = vadd.f32 %v4057_v30, %v10925_v23 }
 0x6ed   :  { %v6150_v0 = vmul.f32 -1.442695, %v7817_v24 }
 0x6ee   :  { %v6151_v61 = vmul.f32 -1.442695, %v7818_v44  ;;  %v6152_v48 = vmul.f32 -1.442695, %v7834_v22  ;;  %v4552_v22 = vld [vmem:[#allocation4 + $0x78] sm:$0xff] }
 0x6ef   :  { %8073 = vpow2.f32 %v6150_v0  ;;  %v4550_v0 = vld [vmem:[#allocation4 + $0x68] sm:$0xff] }
 0x6f0   :  { %8075 = vpow2.f32 %v6151_v61  ;;  %v4548_v61 = vld [vmem:[#allocation4 + $0x58] sm:$0xff] }
 0x6f1   :  { %8077 = vpow2.f32 %v6152_v48 }
 0x6f2   :  { %8079 = vtanh.f32 %v7833_v50 }
 0x6f6   :  { %v8072_v59 = vpop.eup %8071 }
 0x6f7   :  { %v9808_v19 = vmul.f32 %v8072_v59, %v8070_v5  ;;  %v4549_v59 = vld [vmem:[#allocation4 + $0x60] sm:$0xff] }
 0x6f9   :  { %10926 = vst [vmem:[#allocation23_spill] sm:$0xff] %v9808_v19  ;;  %v8074_v35 = vpop.eup %8073  ;;  %4189 = vmatmul.mubr.f32.vlgmr.msra.gmra.mrb[26].mxu0 %v9808_v19  ;;  %4260 = vmatmul.mubr.f32.vlgmr.msra.gmra.mrb[28].mxu1 %v9808_v19 }
 0x6fa   :  { %v8076_v36 = vpop.eup %8075  ;;  %v4280_v12 = vadd.f32 1.0, %v8074_v35  ;;  %7328 = vmatpush1.bf16.msra.mxu0 %v10927_v3  ;;  %7360 = vmatpush1.bf16.msra.mxu1 %v10928_v25  ;;  %v9862_v35 = vpack.c.bf16 %v4552_v22, %v4548_v61  ;;  %v4556_v3 = vld [vmem:[#allocation4 + $0x98] sm:$0xff]  ;;  %v4571_v61 = vld [vmem:[#allocation4 + $0x110] sm:$0xff] }
 0x6fb   :  { %v4286_v37 = vadd.f32 1.0, %v8076_v36  ;;  %7330 = vmatprep.subr.bf16.mxu0 %v10929_v1  ;;  %7362 = vmatprep.subr.bf16.mxu1 %v10930_v18  ;;  %v8078_v45 = vpop.eup %8077  ;;  %v4547_v36 = vld [vmem:[#allocation4 + $0x50] sm:$0xff]  ;;  %v4560_v25 = vld [vmem:[#allocation4 + $0xb8] sm:$0xff]  ;;  %v4553_v18 = vld [vmem:[#allocation4 + $0x80] sm:$0xff] }
 0x6fc   :  { %8081 = vrcp.f32 %v4280_v12  ;;  %4429 = vmatprep.mubr.f32.mxu0 %v10666_v43  ;;  %4500 = vmatprep.mubr.f32.mxu1 %v10666_v43  ;;  %v8080_v62 = vpop.eup %8079  ;;  %v4293_v58 = vadd.f32 1.0, %v8078_v45  ;;  %v4554_v12 = vld [vmem:[#allocation4 + $0x88] sm:$0xff]  ;;  %v4568_v45 = vld [vmem:[#allocation4 + $0xf8] sm:$0xff]  ;;  %v4575_v22 = vld [vmem:[#allocation4 + $0x130] sm:$0xff] }
 0x6fd   :  { %8083 = vrcp.f32 %v4286_v37 }
 0x6fe   :  { %7332 = vmatpush1.bf16.msra.mxu0 %v10931_v54  ;;  %7364 = vmatpush1.bf16.msra.mxu1 %v10932_v10  ;;  %8085 = vrcp.f32 %v4293_v58  ;;  %v4557_v54 = vld [vmem:[#allocation4 + $0xa0] sm:$0xff]  ;;  %v4563_v58 = vld [vmem:[#allocation4 + $0xd0] sm:$0xff] }
 0x6ff   :  { %7334 = vmatprep.subr.bf16.mxu0 %v10933_v51  ;;  %7366 = vmatprep.subr.bf16.mxu1 %v10934_v49  ;;  %v9876_v51 = vpack.c.bf16 %v4560_v25, %v4556_v3  ;;  %v4555_v49 = vld [vmem:[#allocation4 + $0x90] sm:$0xff] }
 0x702   :  { %7336 = vmatpush1.bf16.msra.mxu0 %v10935_v63  ;;  %7368 = vmatpush1.bf16.msra.mxu1 %v10936_v34  ;;  %v4559_v63 = vld [vmem:[#allocation4 + $0xb0] sm:$0xff]  ;;  %v4562_v34 = vld [vmem:[#allocation4 + $0xc8] sm:$0xff] }
 0x703   :  { %7338 = vmatprep.subr.bf16.mxu0 %v10937_v13  ;;  %7370 = vmatprep.subr.bf16.mxu1 %v10938_v41  ;;  %v4566_v13 = vld [vmem:[#allocation4 + $0xe8] sm:$0xff]  ;;  %v4564_v41 = vld [vmem:[#allocation4 + $0xd8] sm:$0xff] }
 0x706   :  { %v8082_v7 = vpop.eup %8081  ;;  %7340 = vmatpush1.bf16.msra.mxu0 %v10939_v15  ;;  %7372 = vmatpush1.bf16.msra.mxu1 %v10940_v46  ;;  %v4561_v15 = vld [vmem:[#allocation4 + $0xc0] sm:$0xff] }
 0x707   :  { %v8084_v21 = vpop.eup %8083  ;;  %v4297_v24 = vmul.f32 %v8082_v7, %v8080_v62  ;;  %7342 = vmatprep.subr.bf16.mxu0 %v9666_v11  ;;  %7374 = vmatprep.subr.bf16.mxu1 %v9668_v27  ;;  %v4542_v11 = vld [vmem:[#allocation4 + $0x28] sm:$0xff]  ;;  %v4540_v27 = vld [vmem:[#allocation4 + $0x18] sm:$0xff]  ;;  %v9882_v62 = vpack.c.bf16 %v4557_v54, %v4553_v18  ;;  %v9884_v7 = vpack.c.bf16 %v4559_v63, %v4555_v49  ;;  %v4565_v46 = vld [vmem:[#allocation4 + $0xe0] sm:$0xff] }
 0x708   :  { %v4296_v30 = vmul.f32 %v8084_v21, %v9683_v20  ;;  %v4538_v20 = vld [vmem:[#allocation4 + $0x8] sm:$0xff]  ;;  %v8086_v5 = vpop.eup %8085  ;;  %v9888_v21 = vpack.c.bf16 %v4566_v13, %v4562_v34  ;;  %v4579_v18 = vld [vmem:[#allocation4 + $0x150] sm:$0xff]  ;;  %v4588_v34 = vld [vmem:[#allocation4 + $0x198] sm:$0xff] }
 0x709   :  { %v4583_v54 = vld [vmem:[#allocation4 + $0x170] sm:$0xff]  ;;  %v4586_v49 = vld [vmem:[#allocation4 + $0x188] sm:$0xff]  ;;  %v4592_v13 = vld [vmem:[#allocation4 + $0x1b8] sm:$0xff] }
 0x70a   :  { %v9831_v44 = vadd.f32 %v4297_v24, %v4296_v30  ;;  %7344 = vmatpush1.bf16.msra.mxu0 %v9672_v39  ;;  %7376 = vmatpush1.bf16.msra.mxu1 %v9674_v26  ;;  %v4544_v39 = vld [vmem:[#allocation4 + $0x38] sm:$0xff]  ;;  %v9846_v26 = vpack.c.bf16 %v4542_v11, %v4538_v20  ;;  %v9890_v24 = vpack.c.bf16 %v4568_v45, %v4564_v41  ;;  %v4567_v30 = vld [vmem:[#allocation4 + $0xf0] sm:$0xff]  ;;  %v4570_v20 = vld [vmem:[#allocation4 + $0x108] sm:$0xff] }
 0x70b   :  { %7346 = vmatprep.subr.bf16.mxu0 %v9678_v52  ;;  %7378 = vmatprep.subr.bf16.mxu1 %v9680_v6  ;;  %v4537_v52 = vld [vmem:[#allocation4] sm:$0xff]  ;;  %v4574_v11 = vld [vmem:[#allocation4 + $0x128] sm:$0xff]  ;;  %v9920_v45 = vpack.c.bf16 %v4583_v54, %v4579_v18  ;;  %v4749_v18 = vld [vmem:[#allocation9 + $0x30] sm:$0xff] }
 0x70c   :  { %8087 = vtanh.f32 %v9831_v44  ;;  %v4541_v6 = vld [vmem:[#allocation4 + $0x20] sm:$0xff]  ;;  %v4590_v63 = vld [vmem:[#allocation4 + $0x1a8] sm:$0xff] }
 0x70d   :  { %v4752_v54 = vld [vmem:[#allocation9 + $0x48] sm:$0xff] }
 0x70e   :  { %7348 = vmatpush1.bf16.msra.mxu0 %v9687_v33  ;;  %7380 = vmatpush1.bf16.msra.mxu1 %v9689_v42  ;;  %v9848_v33 = vpack.c.bf16 %v4544_v39, %v4540_v27  ;;  %v4539_v42 = vld [vmem:[#allocation4 + $0x10] sm:$0xff]  ;;  %v4572_v27 = vld [vmem:[#allocation4 + $0x118] sm:$0xff] }
 0x70f   :  { %7350 = vmatprep.subr.bf16.mxu0 %v9693_v57  ;;  %7382 = vmatprep.subr.bf16.mxu1 %v9695_v4  ;;  %v4543_v57 = vld [vmem:[#allocation4 + $0x30] sm:$0xff]  ;;  %v4546_v4 = vld [vmem:[#allocation4 + $0x48] sm:$0xff]  ;;  %v4576_v39 = vld [vmem:[#allocation4 + $0x138] sm:$0xff] }
 0x710   :  { %v9860_v50 = vpack.c.bf16 %v4550_v0, %v4546_v4  ;;  %v9900_v4 = vpack.c.bf16 %v4574_v11, %v4570_v20  ;;  %v9902_v0 = vpack.c.bf16 %v4576_v39, %v4572_v27  ;;  %v4596_v20 = vld [vmem:[#allocation4 + $0x1d8] sm:$0xff] }
 0x711   :  { %v4600_v11 = vld [vmem:[#allocation4 + $0x1f8] sm:$0xff] }
 0x712   :  { %7352 = vmatpush1.bf16.msra.mxu0 %v9700_v56  ;;  %7384 = vmatpush1.bf16.msra.mxu1 %v9702_v32  ;;  %v9852_v32 = vpack.c.bf16 %v4541_v6, %v4537_v52  ;;  %v9894_v52 = vpack.c.bf16 %v4565_v46, %v4561_v15  ;;  %v9896_v6 = vpack.c.bf16 %v4567_v30, %v4563_v58  ;;  %v4587_v58 = vld [vmem:[#allocation4 + $0x190] sm:$0xff] }
 0x713   :  { %7354 = vmatprep.subr.bf16.mxu0 %v9706_v16  ;;  %7386 = vmatprep.subr.bf16.mxu1 %v9708_v28  ;;  %v9854_v16 = vpack.c.bf16 %v4543_v57, %v4539_v42  ;;  %v4545_v28 = vld [vmem:[#allocation4 + $0x40] sm:$0xff]  ;;  %v9924_v15 = vpack.c.bf16 %v4590_v63, %v4586_v49  ;;  %v9926_v46 = vpack.c.bf16 %v4592_v13, %v4588_v34  ;;  %v4591_v30 = vld [vmem:[#allocation4 + $0x1b0] sm:$0xff]  ;;  %v4756_v49 = vld [vmem:[#allocation9 + $0x68] sm:$0xff] }
 0x714   :  { %v9868_v37 = vpack.c.bf16 %v4549_v59, %v4545_v28  ;;  %v4569_v42 = vld [vmem:[#allocation4 + $0x100] sm:$0xff]  ;;  %v4580_v28 = vld [vmem:[#allocation4 + $0x158] sm:$0xff]  ;;  %v9930_v27 = vpack.c.bf16 %v4591_v30, %v4587_v58  ;;  %v9934_v39 = vpack.c.bf16 %v4600_v11, %v4596_v20  ;;  %v9960_v34 = vpack.c.bf16 %v4756_v49, %v4752_v54 }
 0x715   :  { %v4573_v57 = vld [vmem:[#allocation4 + $0x120] sm:$0xff]  ;;  %v4584_v59 = vld [vmem:[#allocation4 + $0x178] sm:$0xff] }
 0x716   :  { %v8088_v56 = vpop.eup %8087  ;;  %7356 = vmatpush1.bf16.msra.mxu0 %v9712_v2  ;;  %7388 = vmatpush1.bf16.msra.mxu1 %v9714_v9  ;;  %v4551_v2 = vld [vmem:[#allocation4 + $0x70] sm:$0xff]  ;;  %v4558_v9 = vld [vmem:[#allocation4 + $0xa8] sm:$0xff]  ;;  %v9914_v25 = vpack.c.bf16 %v4584_v59, %v4580_v28  ;;  %v4743_v28 = vld [vmem:[#allocation9] sm:$0xff] }
 0x717   :  { %v9856_v48 = vmul.f32 %v8088_v56, %v8086_v5  ;;  %7390 = vmatprep.subr.bf16.mxu0 %v9846_v26  ;;  %7422 = vmatprep.subr.bf16.mxu1 %v9848_v33  ;;  %v9870_v1 = vpack.c.bf16 %v4551_v2, %v4547_v36  ;;  %v9874_v10 = vpack.c.bf16 %v4558_v9, %v4554_v12  ;;  %v4578_v5 = vld [vmem:[#allocation4 + $0x148] sm:$0xff]  ;;  %v4577_v12 = vld [vmem:[#allocation4 + $0x140] sm:$0xff]  ;;  %v4754_v63 = vld [vmem:[#allocation9 + $0x58] sm:$0xff] }
 0x718   :  { %v4582_v56 = vld [vmem:[#allocation4 + $0x168] sm:$0xff]  ;;  %v9906_v36 = vpack.c.bf16 %v4573_v57, %v4569_v42  ;;  %v9908_v2 = vpack.c.bf16 %v4575_v22, %v4571_v61  ;;  %v4581_v9 = vld [vmem:[#allocation4 + $0x160] sm:$0xff]  ;;  %v4595_v42 = vld [vmem:[#allocation4 + $0x1d0] sm:$0xff] }
 0x719   :  { %4430 = vmatmul.mubr.f32.vlgmr.msra.gmra.mrb[26].mxu0 %v9856_v48  ;;  %4501 = vmatmul.mubr.f32.vlgmr.msra.gmra.mrb[28].mxu1 %v9856_v48  ;;  %v9912_v3 = vpack.c.bf16 %v4582_v56, %v4578_v5  ;;  %v9918_v41 = vpack.c.bf16 %v4581_v9, %v4577_v12  ;;  %v4599_v57 = vld [vmem:[#allocation4 + $0x1f0] sm:$0xff]  ;;  %v4748_v22 = vld [vmem:[#allocation9 + $0x28] sm:$0xff]  ;;  %v4746_v5 = vld [vmem:[#allocation9 + $0x18] sm:$0xff] }
 0x71a   :  { %7392 = vmatpush1.bf16.msra.mxu0 %v9852_v32  ;;  %7424 = vmatpush1.bf16.msra.mxu1 %v9854_v16  ;;  %v9938_v61 = vpack.c.bf16 %v4599_v57, %v4595_v42  ;;  %v4747_v59 = vld [vmem:[#allocation9 + $0x20] sm:$0xff]  ;;  %v4745_v9 = vld [vmem:[#allocation9 + $0x10] sm:$0xff]  ;;  %v4758_v13 = vld [vmem:[#allocation9 + $0x78] sm:$0xff] }
 0x71b   :  { %7394 = vmatprep.subr.bf16.mxu0 %v9860_v50  ;;  %7426 = vmatprep.subr.bf16.mxu1 %v9862_v35  ;;  %v4751_v58 = vld [vmem:[#allocation9 + $0x40] sm:$0xff]  ;;  %v9962_v20 = vpack.c.bf16 %v4758_v13, %v4754_v63  ;;  %v4753_v42 = vld [vmem:[#allocation9 + $0x50] sm:$0xff] }
 0x71c   :  { %4665 = vmatprep.mubr.f32.mxu0 %v10666_v43  ;;  %4736 = vmatprep.mubr.f32.mxu1 %v10666_v43  ;;  %v4755_v30 = vld [vmem:[#allocation9 + $0x60] sm:$0xff]  ;;  %v4757_v57 = vld [vmem:[#allocation9 + $0x70] sm:$0xff] }
 0x71d   :  { %v9964_v11 = vpack.c.bf16 %v4755_v30, %v4751_v58  ;;  %v4761_v63 = vld [vmem:[#allocation9 + $0x90] sm:$0xff]  ;;  %v4768_v30 = vld [vmem:[#allocation9 + $0xc8] sm:$0xff] }
 0x71e   :  { %7396 = vmatpush1.bf16.msra.mxu0 %v9868_v37  ;;  %7428 = vmatpush1.bf16.msra.mxu1 %v9870_v1  ;;  %v4765_v13 = vld [vmem:[#allocation9 + $0xb0] sm:$0xff] }
 0x71f   :  { %7398 = vmatprep.subr.bf16.mxu0 %v9874_v10  ;;  %7430 = vmatprep.subr.bf16.mxu1 %v9876_v51  ;;  %10941 = vst [vmem:[#allocation24_spill] sm:$0xff] %v9964_v11  ;;  %v9979_v58 = vpack.c.bf16 %v4765_v13, %v4761_v63  ;;  %v4769_v63 = vld [vmem:[#allocation9 + $0xd0] sm:$0xff] }
 0x720   :  { %v4773_v13 = vld [vmem:[#allocation9 + $0xf0] sm:$0xff] }
 0x721   :  { %10946 = vst [vmem:[#allocation29_spill] sm:$0xff] %v9979_v58  ;;  %v9991_v19 = vpack.c.bf16 %v4773_v13, %v4769_v63  ;;  %v4777_v63 = vld [vmem:[#allocation9 + $0x110] sm:$0xff] }
 0x722   :  { %7400 = vmatpush1.bf16.msra.mxu0 %v9882_v62  ;;  %7432 = vmatpush1.bf16.msra.mxu1 %v9884_v7  ;;  %v4781_v13 = vld [vmem:[#allocation9 + $0x130] sm:$0xff] }
 0x723   :  { %7402 = vmatprep.subr.bf16.mxu0 %v9888_v21  ;;  %7434 = vmatprep.subr.bf16.mxu1 %v9890_v24  ;;  %10950 = vst [vmem:[#allocation33_spill] sm:$0xff] %v9991_v19 }
 0x726   :  { %7404 = vmatpush1.bf16.msra.mxu0 %v9894_v52  ;;  %7436 = vmatpush1.bf16.msra.mxu1 %v9896_v6 }
 0x727   :  { %7406 = vmatprep.subr.bf16.mxu0 %v9900_v4  ;;  %7438 = vmatprep.subr.bf16.mxu1 %v9902_v0 }
 0x72a   :  { %7408 = vmatpush1.bf16.msra.mxu0 %v9906_v36  ;;  %7440 = vmatpush1.bf16.msra.mxu1 %v9908_v2 }
 0x72b   :  { %7410 = vmatprep.subr.bf16.mxu0 %v9912_v3  ;;  %7442 = vmatprep.subr.bf16.mxu1 %v9914_v25 }
 0x72e   :  { %7412 = vmatpush1.bf16.msra.mxu0 %v9918_v41  ;;  %7444 = vmatpush1.bf16.msra.mxu1 %v9920_v45 }
 0x72f   :  { %7414 = vmatprep.subr.bf16.mxu0 %v9924_v15  ;;  %7446 = vmatprep.subr.bf16.mxu1 %v9926_v46 }
 0x732   :  { %7416 = vmatpush1.bf16.msra.mxu0 %v9746_v31  ;;  %7448 = vmatpush1.bf16.msra.mxu1 %v9930_v27  ;;  %v4744_v31 = vld [vmem:[#allocation9 + $0x8] sm:$0xff] }
 0x733   :  { %7418 = vmatprep.subr.bf16.mxu0 %v9750_v14  ;;  %7450 = vmatprep.subr.bf16.mxu1 %v9934_v39  ;;  %v9948_v56 = vpack.c.bf16 %v4748_v22, %v4744_v31  ;;  %v4750_v14 = vld [vmem:[#allocation9 + $0x38] sm:$0xff]  ;;  %v9967_v31 = vpack.c.bf16 %v4757_v57, %v4753_v42  ;;  %v4760_v22 = vld [vmem:[#allocation9 + $0x88] sm:$0xff] }
 0x734   :  { %v9950_v12 = vpack.c.bf16 %v4750_v14, %v4746_v5  ;;  %v4764_v5 = vld [vmem:[#allocation9 + $0xa8] sm:$0xff]  ;;  %v4762_v14 = vld [vmem:[#allocation9 + $0x98] sm:$0xff] }
 0x735   :  { %10942 = vst [vmem:[#allocation25_spill] sm:$0xff] %v9967_v31  ;;  %v4772_v42 = vld [vmem:[#allocation9 + $0xe8] sm:$0xff]  ;;  %v4770_v57 = vld [vmem:[#allocation9 + $0xd8] sm:$0xff] }
 0x736   :  { %7420 = vmatpush1.bf16.msra.mxu0 %v9754_v53  ;;  %7452 = vmatpush1.bf16.msra.mxu1 %v9938_v61  ;;  %v9952_v53 = vpack.c.bf16 %v4747_v59, %v4743_v28  ;;  %v9972_v28 = vpack.c.bf16 %v4764_v5, %v4760_v22  ;;  %v4766_v59 = vld [vmem:[#allocation9 + $0xb8] sm:$0xff]  ;;  %v9984_v22 = vpack.c.bf16 %v4772_v42, %v4768_v30  ;;  %v4780_v30 = vld [vmem:[#allocation9 + $0x128] sm:$0xff] }
 0x737   :  { %7454 = vmatprep.subr.bf16.mxu0 %v9948_v56  ;;  %7486 = vmatprep.subr.bf16.mxu1 %v9950_v12  ;;  %v9974_v54 = vpack.c.bf16 %v4766_v59, %v4762_v14  ;;  %v4774_v5 = vld [vmem:[#allocation9 + $0xf8] sm:$0xff]  ;;  %v4767_v14 = vld [vmem:[#allocation9 + $0xc0] sm:$0xff] }
 0x738   :  { %10943 = vst [vmem:[#allocation26_spill] sm:$0xff] %v9972_v28  ;;  %10947 = vst [vmem:[#allocation30_spill] sm:$0xff] %v9984_v22  ;;  %v4771_v59 = vld [vmem:[#allocation9 + $0xe0] sm:$0xff]  ;;  %v4778_v42 = vld [vmem:[#allocation9 + $0x118] sm:$0xff] }
 0x739   :  { %4666 = vmatmul.mubr.f32.vlgmr.msra.gmra.mrb[12].mxu0 %v9856_v48  ;;  %4737 = vmatmul.mubr.f32.vlgmr.msra.gmra.mrb[12].mxu1 %v9856_v48  ;;  %v9955_v48 = vpack.c.bf16 %v4749_v18, %v4745_v9  ;;  %v4759_v9 = vld [vmem:[#allocation9 + $0x80] sm:$0xff]  ;;  %10944 = vst [vmem:[#allocation27_spill] sm:$0xff] %v9974_v54 }
 0x73a   :  { %4871 = vmatprep.mubr.f32.mxu0 %v10666_v43  ;;  %4942 = vmatprep.mubr.f32.mxu1 %v10666_v43  ;;  %v4763_v18 = vld [vmem:[#allocation9 + $0xa0] sm:$0xff] }
 0x73b   :  { %7456 = vmatpush1.bf16.msra.mxu0 %v9952_v53  ;;  %7488 = vmatpush1.bf16.msra.mxu1 %v9955_v48  ;;  %v9976_v49 = vpack.c.bf16 %v4763_v18, %v4759_v9  ;;  %v9986_v9 = vpack.c.bf16 %v4774_v5, %v4770_v57  ;;  %v9988_v18 = vpack.c.bf16 %v4771_v59, %v4767_v14  ;;  %v4782_v57 = vld [vmem:[#allocation9 + $0x138] sm:$0xff]  ;;  %v4775_v5 = vld [vmem:[#allocation9 + $0x100] sm:$0xff] }
 0x73c   :  { %7458 = vmatprep.subr.bf16.mxu0 %v9960_v34  ;;  %7490 = vmatprep.subr.bf16.mxu1 %v9962_v20  ;;  %v4779_v14 = vld [vmem:[#allocation9 + $0x120] sm:$0xff]  ;;  %v9998_v59 = vpack.c.bf16 %v4782_v57, %v4778_v42  ;;  %v4790_v42 = vld [vmem:[#allocation9 + $0x178] sm:$0xff] }
 0x73d   :  { %10945 = vst [vmem:[#allocation28_spill] sm:$0xff] %v9976_v49  ;;  %10948 = vst [vmem:[#allocation31_spill] sm:$0xff] %v9986_v9  ;;  %v4783_v57 = vld [vmem:[#allocation9 + $0x140] sm:$0xff] }
 0x73e   :  { %10949 = vst [vmem:[#allocation32_spill] sm:$0xff] %v9988_v18  ;;  %10952 = vst [vmem:[#allocation35_spill] sm:$0xff] %v9998_v59 }
 0x73f   :  { %7460 = vmatpush1.bf16.msra.mxu0 %v9964_v11  ;;  %7492 = vmatpush1.bf16.msra.mxu1 %v9967_v31  ;;  %v5005_v31 = vld [vmem:[#allocation7 + $0xa8] sm:$0xff]  ;;  %v5003_v11 = vld [vmem:[#allocation7 + $0x98] sm:$0xff] }
 0x740   :  { %7462 = vmatprep.subr.bf16.mxu0 %v9972_v28  ;;  %7494 = vmatprep.subr.bf16.mxu1 %v9974_v54  ;;  %v10000_v54 = vpack.c.bf16 %v4779_v14, %v4775_v5  ;;  %v4787_v5 = vld [vmem:[#allocation9 + $0x160] sm:$0xff]  ;;  %v5001_v28 = vld [vmem:[#allocation7 + $0x88] sm:$0xff] }
 0x742   :  { %10953 = vst [vmem:[#allocation36_spill] sm:$0xff] %v10000_v54 }
 0x743   :  { %7464 = vmatpush1.bf16.msra.mxu0 %v9976_v49  ;;  %7496 = vmatpush1.bf16.msra.mxu1 %v9979_v58  ;;  %v4776_v58 = vld [vmem:[#allocation9 + $0x108] sm:$0xff] }
 0x744   :  { %7466 = vmatprep.subr.bf16.mxu0 %v9984_v22  ;;  %7498 = vmatprep.subr.bf16.mxu1 %v9986_v9  ;;  %v9996_v49 = vpack.c.bf16 %v4780_v30, %v4776_v58  ;;  %v10003_v9 = vpack.c.bf16 %v4781_v13, %v4777_v63  ;;  %v4788_v58 = vld [vmem:[#allocation9 + $0x168] sm:$0xff]  ;;  %v4786_v30 = vld [vmem:[#allocation9 + $0x158] sm:$0xff]  ;;  %v10012_v22 = vpack.c.bf16 %v4787_v5, %v4783_v57  ;;  %v4785_v63 = vld [vmem:[#allocation9 + $0x150] sm:$0xff] }
 0x745   :  { %v10010_v14 = vpack.c.bf16 %v4790_v42, %v4786_v30  ;;  %v4789_v13 = vld [vmem:[#allocation9 + $0x170] sm:$0xff]  ;;  %v4798_v30 = vld [vmem:[#allocation9 + $0x1b8] sm:$0xff]  ;;  %v4791_v42 = vld [vmem:[#allocation9 + $0x180] sm:$0xff] }
 0x746   :  { %10951 = vst [vmem:[#allocation34_spill] sm:$0xff] %v9996_v49  ;;  %10954 = vst [vmem:[#allocation37_spill] sm:$0xff] %v10003_v9  ;;  %v4795_v57 = vld [vmem:[#allocation9 + $0x1a0] sm:$0xff] }
 0x747   :  { %7468 = vmatpush1.bf16.msra.mxu0 %v9988_v18  ;;  %7500 = vmatpush1.bf16.msra.mxu1 %v9991_v19  ;;  %v4784_v19 = vld [vmem:[#allocation9 + $0x148] sm:$0xff]  ;;  %10956 = vst [vmem:[#allocation39_spill] sm:$0xff] %v10010_v14  ;;  %10957 = vst [vmem:[#allocation40_spill] sm:$0xff] %v10012_v22 }
 0x748   :  { %7470 = vmatprep.subr.bf16.mxu0 %v9996_v49  ;;  %7502 = vmatprep.subr.bf16.mxu1 %v9998_v59  ;;  %v10008_v18 = vpack.c.bf16 %v4788_v58, %v4784_v19  ;;  %v10015_v59 = vpack.c.bf16 %v4789_v13, %v4785_v63  ;;  %v4796_v19 = vld [vmem:[#allocation9 + $0x1a8] sm:$0xff]  ;;  %v4794_v58 = vld [vmem:[#allocation9 + $0x198] sm:$0xff]  ;;  %v10024_v49 = vpack.c.bf16 %v4795_v57, %v4791_v42  ;;  %v4793_v63 = vld [vmem:[#allocation9 + $0x190] sm:$0xff] }
 0x749   :  { %v10022_v5 = vpack.c.bf16 %v4798_v30, %v4794_v58  ;;  %v4797_v13 = vld [vmem:[#allocation9 + $0x1b0] sm:$0xff]  ;;  %v4806_v58 = vld [vmem:[#allocation9 + $0x1f8] sm:$0xff]  ;;  %v4799_v30 = vld [vmem:[#allocation9 + $0x1c0] sm:$0xff] }
 0x74a   :  { %10955 = vst [vmem:[#allocation38_spill] sm:$0xff] %v10008_v18  ;;  %10958 = vst [vmem:[#allocation41_spill] sm:$0xff] %v10015_v59  ;;  %v4803_v42 = vld [vmem:[#allocation9 + $0x1e0] sm:$0xff] }
 0x74b   :  { %7472 = vmatpush1.bf16.msra.mxu0 %v10000_v54  ;;  %7504 = vmatpush1.bf16.msra.mxu1 %v10003_v9  ;;  %v4792_v9 = vld [vmem:[#allocation9 + $0x188] sm:$0xff]  ;;  %10960 = vst [vmem:[#allocation43_spill] sm:$0xff] %v10022_v5  ;;  %10961 = vst [vmem:[#allocation44_spill] sm:$0xff] %v10024_v49 }
 0x74c   :  { %7474 = vmatprep.subr.bf16.mxu0 %v10008_v18  ;;  %7506 = vmatprep.subr.bf16.mxu1 %v10010_v14  ;;  %v10020_v54 = vpack.c.bf16 %v4796_v19, %v4792_v9  ;;  %v10027_v14 = vpack.c.bf16 %v4797_v13, %v4793_v63  ;;  %v4804_v9 = vld [vmem:[#allocation9 + $0x1e8] sm:$0xff]  ;;  %v4802_v19 = vld [vmem:[#allocation9 + $0x1d8] sm:$0xff]  ;;  %v10036_v18 = vpack.c.bf16 %v4803_v42, %v4799_v30  ;;  %v4801_v63 = vld [vmem:[#allocation9 + $0x1d0] sm:$0xff] }
 0x74d   :  { %v10034_v57 = vpack.c.bf16 %v4806_v58, %v4802_v19  ;;  %v4805_v13 = vld [vmem:[#allocation9 + $0x1f0] sm:$0xff]  ;;  %v4991_v19 = vld [vmem:[#allocation7 + $0x38] sm:$0xff] }
 0x74e   :  { %10959 = vst [vmem:[#allocation42_spill] sm:$0xff] %v10020_v54  ;;  %10962 = vst [vmem:[#allocation45_spill] sm:$0xff] %v10027_v14 }
 0x74f   :  { %7476 = vmatpush1.bf16.msra.mxu0 %v10012_v22  ;;  %7508 = vmatpush1.bf16.msra.mxu1 %v10015_v59  ;;  %v4800_v59 = vld [vmem:[#allocation9 + $0x1c8] sm:$0xff]  ;;  %10964 = vst [vmem:[#allocation47_spill] sm:$0xff] %v10034_v57  ;;  %10965 = vst [vmem:[#allocation48_spill] sm:$0xff] %v10036_v18 }
 0x750   :  { %7478 = vmatprep.subr.bf16.mxu0 %v10020_v54  ;;  %7510 = vmatprep.subr.bf16.mxu1 %v10022_v5  ;;  %v10032_v22 = vpack.c.bf16 %v4804_v9, %v4800_v59  ;;  %v10039_v5 = vpack.c.bf16 %v4805_v13, %v4801_v63  ;;  %v4989_v59 = vld [vmem:[#allocation7 + $0x28] sm:$0xff]  ;;  %v4987_v9 = vld [vmem:[#allocation7 + $0x18] sm:$0xff] }
 0x751   :  { %v10046_v58 = vpack.c.bf16 %v4991_v19, %v4987_v9 }
 0x752   :  { %10963 = vst [vmem:[#allocation46_spill] sm:$0xff] %v10032_v22  ;;  %10966 = vst [vmem:[#allocation49_spill] sm:$0xff] %v10039_v5 }
 0x753   :  { %7480 = vmatpush1.bf16.msra.mxu0 %v10024_v49  ;;  %7512 = vmatpush1.bf16.msra.mxu1 %v10027_v14  ;;  %v4985_v14 = vld [vmem:[#allocation7 + $0x8] sm:$0xff]  ;;  %10968 = vst [vmem:[#allocation51_spill] sm:$0xff] %v10046_v58 }
 0x754   :  { %7482 = vmatprep.subr.bf16.mxu0 %v10032_v22  ;;  %7514 = vmatprep.subr.bf16.mxu1 %v10034_v57  ;;  %v10044_v49 = vpack.c.bf16 %v4989_v59, %v4985_v14 }
 0x756   :  { %10967 = vst [vmem:[#allocation50_spill] sm:$0xff] %v10044_v49 }
 0x757   :  { %7484 = vmatpush1.bf16.msra.mxu0 %v10036_v18  ;;  %7516 = vmatpush1.bf16.msra.mxu1 %v10039_v5 }
 0x758   :  { %7518 = vmatprep.subr.bf16.mxu0 %v10044_v49  ;;  %7550 = vmatprep.subr.bf16.mxu1 %v10046_v58 }
 0x7ec   :  { %v4431_v30 = vpop.f32.mrb[26].mxu0  ;;  %v4502_v42 = vpop.f32.mrb[28].mxu1 }
 0x7ed   :  { %v4507_v63 = vadd.f32 %v4431_v30, %v10918_v38  ;;  %v4433_v13 = vpop.f32.mrb[27].mxu0  ;;  %v4504_v18 = vpop.f32.mrb[29].mxu1  ;;  %v4509_v9 = vadd.f32 %v4502_v42, %v10921_v29 }
 0x7ee   :  { %v4508_v57 = vadd.f32 %v4433_v13, %v10919_v47  ;;  %v4510_v14 = vadd.f32 %v4504_v18, %v10920_v55  ;;  %v4998_v47 = vld [vmem:[#allocation7 + $0x70] sm:$0xff] }
 0x7ef   :  { %v6153_v22 = vmul.f32 -1.442695, %v4507_v63 }
 0x7f0   :  { %v6154_v54 = vmul.f32 -1.442695, %v4508_v57  ;;  %v6155_v59 = vmul.f32 -1.442695, %v4510_v14 }
 0x7f1   :  { %8089 = vpow2.f32 %v6153_v22 }
 0x7f2   :  { %8091 = vpow2.f32 %v6154_v54 }
 0x7f3   :  { %8093 = vpow2.f32 %v6155_v59 }
 0x7f4   :  { %8095 = vtanh.f32 %v4509_v9 }
 0x7fb   :  { %v8090_v19 = vpop.eup %8089 }
 0x7fc   :  { %v8092_v49 = vpop.eup %8091  ;;  %v4514_v58 = vadd.f32 1.0, %v8090_v19 }
 0x7fd   :  { %v4520_v5 = vadd.f32 1.0, %v8092_v49  ;;  %v8094_v30 = vpop.eup %8093 }
 0x7fe   :  { %8097 = vrcp.f32 %v4514_v58  ;;  %v8096_v38 = vpop.eup %8095  ;;  %v4527_v22 = vadd.f32 1.0, %v8094_v30  ;;  %v4988_v30 = vld [vmem:[#allocation7 + $0x20] sm:$0xff] }
 0x7ff   :  { %8099 = vrcp.f32 %v4520_v5 }
 0x800   :  { %8101 = vrcp.f32 %v4527_v22  ;;  %v4997_v22 = vld [vmem:[#allocation7 + $0x68] sm:$0xff] }
 0x808   :  { %v8098_v13 = vpop.eup %8097 }
 0x809   :  { %v8100_v63 = vpop.eup %8099  ;;  %v4531_v57 = vmul.f32 %v8098_v13, %v8096_v38  ;;  %v4986_v13 = vld [vmem:[#allocation7 + $0x10] sm:$0xff] }
 0x80a   :  { %v4530_v54 = vmul.f32 %v8100_v63, %v9801_v40  ;;  %v4984_v40 = vld [vmem:[#allocation7] sm:$0xff]  ;;  %v4990_v63 = vld [vmem:[#allocation7 + $0x30] sm:$0xff] }
 0x80c   :  { %v10055_v18 = vadd.f32 %v4531_v57, %v4530_v54  ;;  %v4667_v14 = vpop.f32.mrb[12].mxu0  ;;  %v4738_v42 = vpop.f32.mrb[12].mxu1  ;;  %v4993_v57 = vld [vmem:[#allocation7 + $0x48] sm:$0xff]  ;;  %v4995_v54 = vld [vmem:[#allocation7 + $0x58] sm:$0xff] }
 0x80d   :  { %v7819_v19 = vadd.f32 %v4667_v14, %v10923_v60  ;;  %v4669_v59 = vpop.f32.mrb[13].mxu0  ;;  %v4740_v9 = vpop.f32.mrb[13].mxu1  ;;  %v4999_v14 = vld [vmem:[#allocation7 + $0x78] sm:$0xff] }
 0x80e   :  { %10969 = vst [vmem:[#allocation52_spill] sm:$0xff] %v10055_v18  ;;  %v7820_v49 = vadd.f32 %v4669_v59, %v10924_v8  ;;  %8103 = vtanh.f32 %v10055_v18  ;;  %v7836_v38 = vadd.f32 %v4740_v9, %v10925_v23  ;;  %v8102_v60 = vpop.eup %8101  ;;  %v10061_v59 = vpack.c.bf16 %v4988_v30, %v4984_v40  ;;  %v4994_v18 = vld [vmem:[#allocation7 + $0x50] sm:$0xff] }
 0x80f   :  { %v6156_v5 = vmul.f32 -1.442695, %v7819_v19  ;;  %v10063_v8 = vpack.c.bf16 %v4990_v63, %v4986_v13  ;;  %v4992_v19 = vld [vmem:[#allocation7 + $0x40] sm:$0xff]  ;;  %v10070_v23 = vpack.c.bf16 %v4999_v14, %v4995_v54  ;;  %v5006_v14 = vld [vmem:[#allocation7 + $0xb0] sm:$0xff] }
 0x810   :  { %v6157_v58 = vmul.f32 -1.442695, %v7820_v49  ;;  %v6158_v55 = vmul.f32 -1.442695, %v7836_v38  ;;  %10970 = vst [vmem:[#allocation54_spill] sm:$0xff] %v10061_v59  ;;  %v4996_v49 = vld [vmem:[#allocation7 + $0x60] sm:$0xff] }
 0x811   :  { %8105 = vpow2.f32 %v6156_v5  ;;  %10971 = vst [vmem:[#allocation56_spill] sm:$0xff] %v10063_v8  ;;  %v7835_v5 = vadd.f32 %v4738_v42, %v8803_v17  ;;  %10974 = vst [vmem:[#allocation59_spill] sm:$0xff] %v10070_v23  ;;  %v5007_v38 = vld [vmem:[#allocation7 + $0xb8] sm:$0xff]  ;;  %v5000_v42 = vld [vmem:[#allocation7 + $0x80] sm:$0xff] }
 0x812   :  { %8107 = vpow2.f32 %v6157_v58  ;;  %v10068_v58 = vpack.c.bf16 %v4997_v22, %v4993_v57  ;;  %v5004_v63 = vld [vmem:[#allocation7 + $0xa0] sm:$0xff]  ;;  %v10082_v22 = vpack.c.bf16 %v5005_v31, %v5001_v28  ;;  %v10084_v54 = vpack.c.bf16 %v5007_v38, %v5003_v11 }
 0x813   :  { %8109 = vpow2.f32 %v6158_v55  ;;  %v5002_v55 = vld [vmem:[#allocation7 + $0x90] sm:$0xff]  ;;  %v10090_v31 = vpack.c.bf16 %v5004_v63, %v5000_v42  ;;  %v5008_v28 = vld [vmem:[#allocation7 + $0xc0] sm:$0xff] }
 0x814   :  { %10973 = vst [vmem:[#allocation58_spill] sm:$0xff] %v10068_v58  ;;  %8111 = vtanh.f32 %v7835_v5  ;;  %10977 = vst [vmem:[#allocation62_spill] sm:$0xff] %v10082_v22  ;;  %v10092_v11 = vpack.c.bf16 %v5006_v14, %v5002_v55  ;;  %v5016_v55 = vld [vmem:[#allocation7 + $0x100] sm:$0xff] }
 0x815   :  { %10978 = vst [vmem:[#allocation63_spill] sm:$0xff] %v10084_v54  ;;  %10979 = vst [vmem:[#allocation67_spill] sm:$0xff] %v10090_v31  ;;  %v5020_v14 = vld [vmem:[#allocation7 + $0x120] sm:$0xff] }
 0x816   :  { %10980 = vst [vmem:[#allocation68_spill] sm:$0xff] %v10092_v11 }
 0x818   :  { %v8104_v29 = vpop.eup %8103 }
 0x819   :  { %v10066_v9 = vmul.f32 %v8104_v29, %v8102_v60  ;;  %v10076_v29 = vpack.c.bf16 %v4996_v49, %v4992_v19  ;;  %v10078_v60 = vpack.c.bf16 %v4998_v47, %v4994_v18  ;;  %v5013_v19 = vld [vmem:[#allocation7 + $0xe8] sm:$0xff]  ;;  %v5011_v49 = vld [vmem:[#allocation7 + $0xd8] sm:$0xff]  ;;  %v5012_v18 = vld [vmem:[#allocation7 + $0xe0] sm:$0xff] }
 0x81a   :  { %v5015_v47 = vld [vmem:[#allocation7 + $0xf8] sm:$0xff]  ;;  %v10102_v42 = vpack.c.bf16 %v5012_v18, %v5008_v28 }
 0x81b   :  { %10972 = vst [vmem:[#allocation57_spill] sm:$0xff] %v10066_v9  ;;  %v8106_v40 = vpop.eup %8105  ;;  %4872 = vmatmul.mubr.f32.vlgmr.msra.gmra.mrb[28].mxu0 %v10066_v9  ;;  %4943 = vmatmul.mubr.f32.vlgmr.msra.gmra.mrb[30].mxu1 %v10066_v9  ;;  %10975 = vst [vmem:[#allocation60_spill] sm:$0xff] %v10076_v29  ;;  %v10098_v38 = vpack.c.bf16 %v5015_v47, %v5011_v49  ;;  %v5021_v9 = vld [vmem:[#allocation7 + $0x128] sm:$0xff]  ;;  %v5018_v49 = vld [vmem:[#allocation7 + $0x110] sm:$0xff] }
 0x81c   :  { %v8108_v30 = vpop.eup %8107  ;;  %v4963_v13 = vadd.f32 1.0, %v8106_v40  ;;  %7520 = vmatpush1.bf16.msra.mxu0 %v10061_v59  ;;  %7552 = vmatpush1.bf16.msra.mxu1 %v10063_v8  ;;  %10976 = vst [vmem:[#allocation61_spill] sm:$0xff] %v10078_v60  ;;  %v5009_v40 = vld [vmem:[#allocation7 + $0xc8] sm:$0xff]  ;;  %10983 = vst [vmem:[#allocation71_spill] sm:$0xff] %v10102_v42  ;;  %v5022_v47 = vld [vmem:[#allocation7 + $0x130] sm:$0xff] }
 0x81d   :  { %v4969_v57 = vadd.f32 1.0, %v8108_v30  ;;  %7522 = vmatprep.subr.bf16.mxu0 %v10068_v58  ;;  %7554 = vmatprep.subr.bf16.mxu1 %v10070_v23  ;;  %v10096_v5 = vpack.c.bf16 %v5013_v19, %v5009_v40  ;;  %10982 = vst [vmem:[#allocation70_spill] sm:$0xff] %v10098_v38  ;;  %v5010_v30 = vld [vmem:[#allocation7 + $0xd0] sm:$0xff]  ;;  %v5031_v28 = vld [vmem:[#allocation7 + $0x178] sm:$0xff] }
 0x81e   :  { %8113 = vrcp.f32 %v4963_v13  ;;  %5112 = vmatprep.mubr.f32.mxu0 %v10666_v43  ;;  %5183 = vmatprep.mubr.f32.mxu1 %v10666_v43  ;;  %v5014_v13 = vld [vmem:[#allocation7 + $0xf0] sm:$0xff] }
 0x81f   :  { %8115 = vrcp.f32 %v4969_v57  ;;  %10981 = vst [vmem:[#allocation69_spill] sm:$0xff] %v10096_v5  ;;  %v5017_v57 = vld [vmem:[#allocation7 + $0x108] sm:$0xff]  ;;  %v10104_v63 = vpack.c.bf16 %v5014_v13, %v5010_v30  ;;  %v10114_v13 = vpack.c.bf16 %v5020_v14, %v5016_v55  ;;  %v5030_v8 = vld [vmem:[#allocation7 + $0x170] sm:$0xff] }
 0x820   :  { %7524 = vmatpush1.bf16.msra.mxu0 %v10076_v29  ;;  %7556 = vmatpush1.bf16.msra.mxu1 %v10078_v60  ;;  %v5019_v29 = vld [vmem:[#allocation7 + $0x118] sm:$0xff]  ;;  %v10108_v40 = vpack.c.bf16 %v5021_v9, %v5017_v57  ;;  %v5024_v9 = vld [vmem:[#allocation7 + $0x140] sm:$0xff]  ;;  %v5037_v14 = vld [vmem:[#allocation7 + $0x1a8] sm:$0xff] }
 0x821   :  { %7526 = vmatprep.subr.bf16.mxu0 %v10082_v22  ;;  %7558 = vmatprep.subr.bf16.mxu1 %v10084_v54  ;;  %v5023_v60 = vld [vmem:[#allocation7 + $0x138] sm:$0xff]  ;;  %10984 = vst [vmem:[#allocation72_spill] sm:$0xff] %v10104_v63  ;;  %v5025_v54 = vld [vmem:[#allocation7 + $0x148] sm:$0xff] }
 0x822   :  { %v10110_v19 = vpack.c.bf16 %v5023_v60, %v5019_v29  ;;  %v5029_v22 = vld [vmem:[#allocation7 + $0x168] sm:$0xff]  ;;  %v5028_v29 = vld [vmem:[#allocation7 + $0x160] sm:$0xff] }
 0x823   :  { %v10120_v23 = vpack.c.bf16 %v5029_v22, %v5025_v54  ;;  %v5032_v54 = vld [vmem:[#allocation7 + $0x180] sm:$0xff] }
 0x824   :  { %7528 = vmatpush1.bf16.msra.mxu0 %v10090_v31  ;;  %7560 = vmatpush1.bf16.msra.mxu1 %v10092_v11  ;;  %v8110_v31 = vpop.eup %8109  ;;  %v5027_v11 = vld [vmem:[#allocation7 + $0x158] sm:$0xff] }
 0x825   :  { %7530 = vmatprep.subr.bf16.mxu0 %v10096_v5  ;;  %7562 = vmatprep.subr.bf16.mxu1 %v10098_v38  ;;  %v8112_v18 = vpop.eup %8111  ;;  %v10116_v38 = vpack.c.bf16 %v5022_v47, %v5018_v49  ;;  %v4976_v5 = vadd.f32 1.0, %v8110_v31  ;;  %v10122_v58 = vpack.c.bf16 %v5031_v28, %v5027_v11  ;;  %v5035_v49 = vld [vmem:[#allocation7 + $0x198] sm:$0xff]  ;;  %v10129_v31 = vpack.c.bf16 %v5028_v29, %v5024_v9  ;;  %v5036_v11 = vld [vmem:[#allocation7 + $0x1a0] sm:$0xff] }
 0x826   :  { %v5039_v47 = vld [vmem:[#allocation7 + $0x1b8] sm:$0xff] }
 0x827   :  { %8117 = vrcp.f32 %v4976_v5  ;;  %v10137_v28 = vpack.c.bf16 %v5039_v47, %v5035_v49  ;;  %v5047_v9 = vld [vmem:[#allocation7 + $0x1f8] sm:$0xff]  ;;  %v5042_v49 = vld [vmem:[#allocation7 + $0x1d0] sm:$0xff] }
 0x828   :  { %v8114_v30 = vpop.eup %8113  ;;  %7532 = vmatpush1.bf16.msra.mxu0 %v10102_v42  ;;  %7564 = vmatpush1.bf16.msra.mxu1 %v10104_v63  ;;  %v5026_v42 = vld [vmem:[#allocation7 + $0x150] sm:$0xff]  ;;  %v5033_v63 = vld [vmem:[#allocation7 + $0x188] sm:$0xff] }
 0x829   :  { %v8116_v60 = vpop.eup %8115  ;;  %v4980_v57 = vmul.f32 %v8114_v30, %v8112_v18  ;;  %7534 = vmatprep.subr.bf16.mxu0 %v10108_v40  ;;  %7566 = vmatprep.subr.bf16.mxu1 %v10110_v19  ;;  %v10131_v22 = vpack.c.bf16 %v5030_v8, %v5026_v42  ;;  %v5034_v18 = vld [vmem:[#allocation7 + $0x190] sm:$0xff]  ;;  %v10142_v8 = vpack.c.bf16 %v5036_v11, %v5032_v54  ;;  %v5040_v42 = vld [vmem:[#allocation7 + $0x1c0] sm:$0xff] }
 0x82a   :  { %v4979_v55 = vmul.f32 %v8116_v60, %v9831_v44  ;;  %v10135_v44 = vpack.c.bf16 %v5037_v14, %v5033_v63  ;;  %v5038_v30 = vld [vmem:[#allocation7 + $0x1b0] sm:$0xff]  ;;  %v5041_v60 = vld [vmem:[#allocation7 + $0x1c8] sm:$0xff]  ;;  %v5044_v14 = vld [vmem:[#allocation7 + $0x1e0] sm:$0xff] }
 0x82b   :  { %v10144_v5 = vpack.c.bf16 %v5038_v30, %v5034_v18  ;;  %v5046_v47 = vld [vmem:[#allocation7 + $0x1f0] sm:$0xff]  ;;  %v10154_v54 = vpack.c.bf16 %v5044_v14, %v5040_v42  ;;  %v11013_v14 = vld [vmem:[#allocation17_spill] sm:$0xff] }
 0x82c   :  { %v10125_v59 = vadd.f32 %v4980_v57, %v4979_v55  ;;  %7536 = vmatpush1.bf16.msra.mxu0 %v10114_v13  ;;  %7568 = vmatpush1.bf16.msra.mxu1 %v10116_v38  ;;  %v5045_v57 = vld [vmem:[#allocation7 + $0x1e8] sm:$0xff]  ;;  %v5043_v55 = vld [vmem:[#allocation7 + $0x1d8] sm:$0xff]  ;;  %v10156_v11 = vpack.c.bf16 %v5046_v47, %v5042_v49 }
 0x82d   :  { %7538 = vmatprep.subr.bf16.mxu0 %v10120_v23  ;;  %7570 = vmatprep.subr.bf16.mxu1 %v10122_v58  ;;  %v10148_v63 = vpack.c.bf16 %v5045_v57, %v5041_v60  ;;  %v10150_v29 = vpack.c.bf16 %v5047_v9, %v5043_v55  ;;  %v11011_v57 = vld [vmem:[#allocation50_spill] sm:$0xff]  ;;  %v11012_v55 = vld [vmem:[#allocation51_spill] sm:$0xff] }
 0x82e   :  { %8119 = vtanh.f32 %v10125_v59 }
 0x830   :  { %7540 = vmatpush1.bf16.msra.mxu0 %v10129_v31  ;;  %7572 = vmatpush1.bf16.msra.mxu1 %v10131_v22 }
 0x831   :  { %7542 = vmatprep.subr.bf16.mxu0 %v10135_v44  ;;  %7574 = vmatprep.subr.bf16.mxu1 %v10137_v28  ;;  %v8118_v18 = vpop.eup %8117 }
 0x834   :  { %7544 = vmatpush1.bf16.msra.mxu0 %v10142_v8  ;;  %7576 = vmatpush1.bf16.msra.mxu1 %v10144_v5 }
 0x835   :  { %7546 = vmatprep.subr.bf16.mxu0 %v10148_v63  ;;  %7578 = vmatprep.subr.bf16.mxu1 %v10150_v29 }
 0x838   :  { %v8120_v30 = vpop.eup %8119  ;;  %7548 = vmatpush1.bf16.msra.mxu0 %v10154_v54  ;;  %7580 = vmatpush1.bf16.msra.mxu1 %v10156_v11 }
 0x839   :  { %7582 = vmatprep.subr.bf16.mxu0 %v9846_v26  ;;  %7614 = vmatprep.subr.bf16.mxu1 %v9848_v33  ;;  %v4983_v60 = vmul.f32 %v8120_v30, %v8118_v18  ;;  %v5268_v26 = vld [vmem:[#allocation4 + $0x180] sm:$0xff]  ;;  %v11014_v30 = vld [vmem:[#allocation18_spill] sm:$0xff] }
 0x83a   :  { %v5272_v33 = vld [vmem:[#allocation4 + $0x1a0] sm:$0xff] }
 0x83b   :  { %5113 = vmatmul.mubr.f32.vlgmr.msra.gmra.mrb[28].mxu0 %v4983_v60  ;;  %5184 = vmatmul.mubr.f32.vlgmr.msra.gmra.mrb[30].mxu1 %v4983_v60 }
 0x83c   :  { %7584 = vmatpush1.bf16.msra.mxu0 %v9852_v32  ;;  %7616 = vmatpush1.bf16.msra.mxu1 %v9854_v16  ;;  %v5277_v32 = vld [vmem:[#allocation4 + $0x1c8] sm:$0xff] }
 0x83d   :  { %7586 = vmatprep.subr.bf16.mxu0 %v9860_v50  ;;  %7618 = vmatprep.subr.bf16.mxu1 %v9862_v35  ;;  %v5281_v16 = vld [vmem:[#allocation4 + $0x1e8] sm:$0xff]  ;;  %v7607_v50 = vpack.c.bf16 %v5272_v33, %v5268_v26 }
 0x83e   :  { %5348 = vmatprep.mubr.f32.mxu0 %v10666_v43  ;;  %5419 = vmatprep.mubr.f32.mxu1 %v10666_v43  ;;  %v7609_v35 = vpack.c.bf16 %v5281_v16, %v5277_v32  ;;  %v11015_v32 = vld [vmem:[#allocation19_spill] sm:$0xff] }
 0x840   :  { %7588 = vmatpush1.bf16.msra.mxu0 %v9868_v37  ;;  %7620 = vmatpush1.bf16.msra.mxu1 %v9870_v1  ;;  %v5276_v37 = vld [vmem:[#allocation4 + $0x1c0] sm:$0xff] }
 0x841   :  { %7590 = vmatprep.subr.bf16.mxu0 %v9874_v10  ;;  %7622 = vmatprep.subr.bf16.mxu1 %v9876_v51  ;;  %v5280_v1 = vld [vmem:[#allocation4 + $0x1e0] sm:$0xff]  ;;  %v10985_v51 = vld [vmem:[#allocation24_spill] sm:$0xff] }
 0x842   :  { %v7611_v10 = vpack.c.bf16 %v5280_v1, %v5276_v37 }
 0x844   :  { %7592 = vmatpush1.bf16.msra.mxu0 %v9882_v62  ;;  %7624 = vmatpush1.bf16.msra.mxu1 %v9884_v7  ;;  %v10986_v62 = vld [vmem:[#allocation25_spill] sm:$0xff]  ;;  %v10987_v7 = vld [vmem:[#allocation26_spill] sm:$0xff] }
 0x845   :  { %7594 = vmatprep.subr.bf16.mxu0 %v9888_v21  ;;  %7626 = vmatprep.subr.bf16.mxu1 %v9890_v24  ;;  %v10988_v21 = vld [vmem:[#allocation27_spill] sm:$0xff]  ;;  %v10989_v24 = vld [vmem:[#allocation28_spill] sm:$0xff] }
 0x848   :  { %7596 = vmatpush1.bf16.msra.mxu0 %v9894_v52  ;;  %7628 = vmatpush1.bf16.msra.mxu1 %v9896_v6  ;;  %v10990_v52 = vld [vmem:[#allocation29_spill] sm:$0xff]  ;;  %v10991_v6 = vld [vmem:[#allocation30_spill] sm:$0xff] }
 0x849   :  { %7598 = vmatprep.subr.bf16.mxu0 %v9900_v4  ;;  %7630 = vmatprep.subr.bf16.mxu1 %v9902_v0  ;;  %v10992_v4 = vld [vmem:[#allocation31_spill] sm:$0xff]  ;;  %v10993_v0 = vld [vmem:[#allocation32_spill] sm:$0xff] }
 0x84c   :  { %7600 = vmatpush1.bf16.msra.mxu0 %v9906_v36  ;;  %7632 = vmatpush1.bf16.msra.mxu1 %v9908_v2  ;;  %v10994_v36 = vld [vmem:[#allocation33_spill] sm:$0xff]  ;;  %v10995_v2 = vld [vmem:[#allocation34_spill] sm:$0xff] }
 0x84d   :  { %7602 = vmatprep.subr.bf16.mxu0 %v9912_v3  ;;  %7634 = vmatprep.subr.bf16.mxu1 %v9914_v25  ;;  %v10996_v3 = vld [vmem:[#allocation35_spill] sm:$0xff]  ;;  %v10997_v25 = vld [vmem:[#allocation36_spill] sm:$0xff] }
 0x850   :  { %7604 = vmatpush1.bf16.msra.mxu0 %v9918_v41  ;;  %7636 = vmatpush1.bf16.msra.mxu1 %v9920_v45  ;;  %v10998_v41 = vld [vmem:[#allocation37_spill] sm:$0xff]  ;;  %v10999_v45 = vld [vmem:[#allocation38_spill] sm:$0xff] }
 0x851   :  { %7606 = vmatprep.subr.bf16.mxu0 %v9924_v15  ;;  %7638 = vmatprep.subr.bf16.mxu1 %v9926_v46  ;;  %v11000_v15 = vld [vmem:[#allocation39_spill] sm:$0xff]  ;;  %v11001_v46 = vld [vmem:[#allocation40_spill] sm:$0xff] }
 0x854   :  { %7608 = vmatpush1.bf16.msra.mxu0 %v7607_v50  ;;  %7640 = vmatpush1.bf16.msra.mxu1 %v9930_v27  ;;  %v11002_v27 = vld [vmem:[#allocation41_spill] sm:$0xff] }
 0x855   :  { %7610 = vmatprep.subr.bf16.mxu0 %v7609_v35  ;;  %7642 = vmatprep.subr.bf16.mxu1 %v9934_v39  ;;  %v11003_v39 = vld [vmem:[#allocation42_spill] sm:$0xff]  ;;  %v11016_v35 = vld [vmem:[#allocation20_spill] sm:$0xff] }
 0x858   :  { %7612 = vmatpush1.bf16.msra.mxu0 %v7611_v10  ;;  %7644 = vmatpush1.bf16.msra.mxu1 %v9938_v61  ;;  %v11004_v61 = vld [vmem:[#allocation43_spill] sm:$0xff] }
 0x859   :  { %7646 = vmatprep.subr.bf16.mxu0 %v9948_v56  ;;  %7678 = vmatprep.subr.bf16.mxu1 %v9950_v12  ;;  %v11005_v56 = vld [vmem:[#allocation44_spill] sm:$0xff]  ;;  %v11006_v12 = vld [vmem:[#allocation45_spill] sm:$0xff] }
 0x85b   :  { %5349 = vmatmul.mubr.f32.vlgmr.msra.gmra.mrb[14].mxu0 %v4983_v60  ;;  %5420 = vmatmul.mubr.f32.vlgmr.msra.gmra.mrb[14].mxu1 %v4983_v60 }
 0x85c   :  { %7648 = vmatpush1.bf16.msra.mxu0 %v9952_v53  ;;  %7680 = vmatpush1.bf16.msra.mxu1 %v9955_v48  ;;  %v11007_v53 = vld [vmem:[#allocation46_spill] sm:$0xff]  ;;  %v11008_v48 = vld [vmem:[#allocation47_spill] sm:$0xff] }
 0x85d   :  { %7650 = vmatprep.subr.bf16.mxu0 %v9960_v34  ;;  %7682 = vmatprep.subr.bf16.mxu1 %v9962_v20  ;;  %v11009_v34 = vld [vmem:[#allocation48_spill] sm:$0xff]  ;;  %v11010_v20 = vld [vmem:[#allocation49_spill] sm:$0xff] }
 0x85e   :  { %5554 = vmatprep.mubr.f32.mxu0 %v10666_v43  ;;  %5625 = vmatprep.mubr.f32.mxu1 %v10666_v43 }
 0x860   :  { %7652 = vmatpush1.bf16.msra.mxu0 %v10985_v51  ;;  %7684 = vmatpush1.bf16.msra.mxu1 %v10986_v62 }
 0x861   :  { %7654 = vmatprep.subr.bf16.mxu0 %v10987_v7  ;;  %7686 = vmatprep.subr.bf16.mxu1 %v10988_v21 }
 0x864   :  { %7656 = vmatpush1.bf16.msra.mxu0 %v10989_v24  ;;  %7688 = vmatpush1.bf16.msra.mxu1 %v10990_v52 }
 0x865   :  { %7658 = vmatprep.subr.bf16.mxu0 %v10991_v6  ;;  %7690 = vmatprep.subr.bf16.mxu1 %v10992_v4 }
 0x868   :  { %7660 = vmatpush1.bf16.msra.mxu0 %v10993_v0  ;;  %7692 = vmatpush1.bf16.msra.mxu1 %v10994_v36  ;;  %v11017_v0 = vld [vmem:[#allocation52_spill] sm:$0xff] }
 0x869   :  { %7662 = vmatprep.subr.bf16.mxu0 %v10995_v2  ;;  %7694 = vmatprep.subr.bf16.mxu1 %v10996_v3 }
 0x86c   :  { %7664 = vmatpush1.bf16.msra.mxu0 %v10997_v25  ;;  %7696 = vmatpush1.bf16.msra.mxu1 %v10998_v41  ;;  %v11018_v41 = vld [vmem:[#allocation64_spill] sm:$0xff] }
 0x86d   :  { %7666 = vmatprep.subr.bf16.mxu0 %v10999_v45  ;;  %7698 = vmatprep.subr.bf16.mxu1 %v11000_v15 }
 0x870   :  { %7668 = vmatpush1.bf16.msra.mxu0 %v11001_v46  ;;  %7700 = vmatpush1.bf16.msra.mxu1 %v11002_v27  ;;  %v11019_v27 = vld [vmem:[#allocation65_spill] sm:$0xff] }
 0x871   :  { %7670 = vmatprep.subr.bf16.mxu0 %v11003_v39  ;;  %7702 = vmatprep.subr.bf16.mxu1 %v11004_v61 }
 0x874   :  { %7672 = vmatpush1.bf16.msra.mxu0 %v11005_v56  ;;  %7704 = vmatpush1.bf16.msra.mxu1 %v11006_v12  ;;  %v11020_v12 = vld [vmem:[#allocation66_spill] sm:$0xff] }
 0x875   :  { %7674 = vmatprep.subr.bf16.mxu0 %v11007_v53  ;;  %7706 = vmatprep.subr.bf16.mxu1 %v11008_v48 }
 0x878   :  { %7676 = vmatpush1.bf16.msra.mxu0 %v11009_v34  ;;  %7708 = vmatpush1.bf16.msra.mxu1 %v11010_v20 }
 0x879   :  { %7710 = vmatprep.subr.bf16.mxu0 %v11011_v57  ;;  %7742 = vmatprep.subr.bf16.mxu1 %v11012_v55 }
 0x90e   :  { %v5114_v9 = vpop.f32.mrb[28].mxu0  ;;  %v5185_v42 = vpop.f32.mrb[30].mxu1 }
 0x90f   :  { %v5190_v49 = vadd.f32 %v5114_v9, %v11013_v14  ;;  %v5116_v47 = vpop.f32.mrb[29].mxu0  ;;  %v5187_v18 = vpop.f32.mrb[31].mxu1  ;;  %v5192_v37 = vadd.f32 %v5185_v42, %v11016_v35 }
 0x910   :  { %v5191_v60 = vadd.f32 %v5116_v47, %v11014_v30  ;;  %v5193_v16 = vadd.f32 %v5187_v18, %v11015_v32  ;;  %v11021_v47 = vld [vmem:[#allocation54_spill] sm:$0xff]  ;;  %v11022_v18 = vld [vmem:[#allocation56_spill] sm:$0xff] }
 0x911   :  { %v6159_v26 = vmul.f32 -1.442695, %v5190_v49 }
 0x912   :  { %v6160_v33 = vmul.f32 -1.442695, %v5191_v60  ;;  %v6161_v50 = vmul.f32 -1.442695, %v5193_v16  ;;  %v11026_v16 = vld [vmem:[#allocation61_spill] sm:$0xff] }
 0x913   :  { %8121 = vpow2.f32 %v6159_v26  ;;  %v11023_v26 = vld [vmem:[#allocation58_spill] sm:$0xff] }
 0x914   :  { %8123 = vpow2.f32 %v6160_v33  ;;  %v11024_v33 = vld [vmem:[#allocation59_spill] sm:$0xff] }
 0x915   :  { %8125 = vpow2.f32 %v6161_v50  ;;  %v11027_v50 = vld [vmem:[#allocation62_spill] sm:$0xff] }
 0x916   :  { %8127 = vtanh.f32 %v5192_v37  ;;  %v11028_v37 = vld [vmem:[#allocation63_spill] sm:$0xff] }
 0x91d   :  { %v8122_v1 = vpop.eup %8121 }
 0x91e   :  { %v8124_v10 = vpop.eup %8123  ;;  %v5197_v51 = vadd.f32 1.0, %v8122_v1  ;;  %v11029_v1 = vld [vmem:[#allocation67_spill] sm:$0xff] }
 0x91f   :  { %v5203_v62 = vadd.f32 1.0, %v8124_v10  ;;  %v8126_v7 = vpop.eup %8125  ;;  %v11030_v10 = vld [vmem:[#allocation68_spill] sm:$0xff] }
 0x920   :  { %8129 = vrcp.f32 %v5197_v51  ;;  %v8128_v21 = vpop.eup %8127  ;;  %v5210_v4 = vadd.f32 1.0, %v8126_v7  ;;  %v11031_v51 = vld [vmem:[#allocation69_spill] sm:$0xff] }
 0x921   :  { %8131 = vrcp.f32 %v5203_v62  ;;  %v11032_v62 = vld [vmem:[#allocation70_spill] sm:$0xff] }
 0x922   :  { %8133 = vrcp.f32 %v5210_v4 }
 0x92a   :  { %v8130_v24 = vpop.eup %8129 }
 0x92b   :  { %v8132_v52 = vpop.eup %8131  ;;  %v5214_v6 = vmul.f32 %v8130_v24, %v8128_v21  ;;  %v11033_v24 = vld [vmem:[#allocation71_spill] sm:$0xff] }
 0x92c   :  { %v5213_v36 = vmul.f32 %v8132_v52, %v11017_v0  ;;  %v8134_v48 = vpop.eup %8133  ;;  %v11034_v52 = vld [vmem:[#allocation72_spill] sm:$0xff] }
 0x92e   :  { %v10234_v2 = vadd.f32 %v5214_v6, %v5213_v36  ;;  %v5350_v3 = vpop.f32.mrb[14].mxu0  ;;  %v5421_v25 = vpop.f32.mrb[14].mxu1 }
 0x92f   :  { %v7821_v45 = vadd.f32 %v5350_v3, %v11018_v41  ;;  %v5352_v15 = vpop.f32.mrb[15].mxu0  ;;  %v5423_v46 = vpop.f32.mrb[15].mxu1  ;;  %v7837_v57 = vadd.f32 %v5421_v25, %v8803_v17  ;;  %v11025_v17 = vld [vmem:[#allocation60_spill] sm:$0xff]  ;;  %v5926_v25 = vld [vmem:[%s10423_s9 + $0x48] sm:$0xff] }
 0x930   :  { %v7822_v39 = vadd.f32 %v5352_v15, %v11019_v27  ;;  %8135 = vtanh.f32 %v10234_v2  ;;  %v7838_v53 = vadd.f32 %v5423_v46, %v11020_v12  ;;  %v5928_v15 = vld [vmem:[%s10423_s9 + $0x58] sm:$0xff]  ;;  %v5929_v27 = vld [vmem:[%s10423_s9 + $0x60] sm:$0xff] }
 0x931   :  { %v6162_v61 = vmul.f32 -1.442695, %v7821_v45  ;;  %v5927_v45 = vld [vmem:[%s10423_s9 + $0x50] sm:$0xff]  ;;  %v5932_v12 = vld [vmem:[%s10423_s9 + $0x78] sm:$0xff] }
 0x932   :  { %v6163_v56 = vmul.f32 -1.442695, %v7822_v39  ;;  %v6164_v20 = vmul.f32 -1.442695, %v7838_v53  ;;  %v7793_v46 = vpack.c.bf16 %v5928_v15, %v5927_v45  ;;  %v5930_v39 = vld [vmem:[%s10423_s9 + $0x68] sm:$0xff] }
 0x933   :  { %8137 = vpow2.f32 %v6162_v61  ;;  %v7797_v61 = vpack.c.bf16 %v5930_v39, %v5929_v27 }
 0x934   :  { %8139 = vpow2.f32 %v6163_v56  ;;  %v5931_v56 = vld [vmem:[%s10423_s9 + $0x70] sm:$0xff] }
 0x935   :  { %8141 = vpow2.f32 %v6164_v20  ;;  %v7801_v53 = vpack.c.bf16 %v5932_v12, %v5931_v56  ;;  %v11038_v20 = vld [vmem:[#allocation55_spill] sm:$0xff] }
 0x936   :  { %8143 = vtanh.f32 %v7837_v57  ;;  %v11039_v57 = vld [vmem:[#allocation23_spill] sm:$0xff] }
 0x93a   :  { %v8136_v34 = vpop.eup %8135 }
 0x93b   :  { %v10241_v55 = vmul.f32 %v8136_v34, %v8134_v48  ;;  %v11036_v48 = vld [vmem:[#allocation53_spill] sm:$0xff]  ;;  %v11037_v34 = vld [vmem:[#allocation22_spill] sm:$0xff] }
 0x93d   :  { %v8138_v9 = vpop.eup %8137  ;;  %5555 = vmatmul.mubr.f32.vlgmr.msra.gmra.mrb[30].mxu0 %v10241_v55  ;;  %5626 = vmatmul.mubr.f32.vlgmr.msra.gmra.mrb[32].mxu1 %v10241_v55 }
 0x93e   :  { %v8140_v42 = vpop.eup %8139  ;;  %v5646_v49 = vadd.f32 1.0, %v8138_v9  ;;  %7712 = vmatpush1.bf16.msra.mxu0 %v11021_v47  ;;  %7744 = vmatpush1.bf16.msra.mxu1 %v11022_v18  ;;  %v11040_v9 = vld [vmem:[#allocation57_spill] sm:$0xff] }
 0x93f   :  { %v5652_v60 = vadd.f32 1.0, %v8140_v42  ;;  %7714 = vmatprep.subr.bf16.mxu0 %v11023_v26  ;;  %7746 = vmatprep.subr.bf16.mxu1 %v11024_v33  ;;  %v8142_v7 = vpop.eup %8141 }
 0x940   :  { %8145 = vrcp.f32 %v5646_v49  ;;  %5795 = vmatprep.mubr.f32.mxu0 %v10666_v43  ;;  %5866 = vmatprep.mubr.f32.mxu1 %v10666_v43  ;;  %v8144_v21 = vpop.eup %8143  ;;  %v5659_v0 = vadd.f32 1.0, %v8142_v7 }
 0x941   :  { %8147 = vrcp.f32 %v5652_v60 }
 0x942   :  { %7716 = vmatpush1.bf16.msra.mxu0 %v11025_v17  ;;  %7748 = vmatpush1.bf16.msra.mxu1 %v11026_v16  ;;  %8149 = vrcp.f32 %v5659_v0 }
 0x943   :  { %7718 = vmatprep.subr.bf16.mxu0 %v11027_v50  ;;  %7750 = vmatprep.subr.bf16.mxu1 %v11028_v37 }
 0x946   :  { %7720 = vmatpush1.bf16.msra.mxu0 %v11029_v1  ;;  %7752 = vmatpush1.bf16.msra.mxu1 %v11030_v10 }
 0x947   :  { %7722 = vmatprep.subr.bf16.mxu0 %v11031_v51  ;;  %7754 = vmatprep.subr.bf16.mxu1 %v11032_v62 }
 0x94a   :  { %v8146_v43 = vpop.eup %8145  ;;  %7724 = vmatpush1.bf16.msra.mxu0 %v11033_v24  ;;  %7756 = vmatpush1.bf16.msra.mxu1 %v11034_v52 }
 0x94b   :  { %v8148_v6 = vpop.eup %8147  ;;  %v5663_v4 = vmul.f32 %v8146_v43, %v8144_v21  ;;  %7726 = vmatprep.subr.bf16.mxu0 %v10108_v40  ;;  %7758 = vmatprep.subr.bf16.mxu1 %v10110_v19  ;;  %v5920_v40 = vld [vmem:[%s10423_s9 + $0x18] sm:$0xff] }
 0x94c   :  { %v5662_v36 = vmul.f32 %v8148_v6, %v10125_v59  ;;  %v5917_v59 = vld [vmem:[%s10423_s9] sm:$0xff]  ;;  %v8150_v19 = vpop.eup %8149 }
 0x94e   :  { %v5664_v3 = vadd.f32 %v5663_v4, %v5662_v36  ;;  %7728 = vmatpush1.bf16.msra.mxu0 %v10114_v13  ;;  %7760 = vmatpush1.bf16.msra.mxu1 %v10116_v38  ;;  %v5919_v38 = vld [vmem:[%s10423_s9 + $0x10] sm:$0xff] }
 0x94f   :  { %7730 = vmatprep.subr.bf16.mxu0 %v10120_v23  ;;  %7762 = vmatprep.subr.bf16.mxu1 %v10122_v58  ;;  %v5918_v23 = vld [vmem:[%s10423_s9 + $0x8] sm:$0xff] }
 0x950   :  { %5906 = vst [vmem:[#allocation11] sm:$0xff] %v5664_v3  ;;  %8151 = vtanh.f32 %v5664_v3  ;;  %v7773_v58 = vpack.c.bf16 %v5918_v23, %v5917_v59 }
 0x952   :  { %7732 = vmatpush1.bf16.msra.mxu0 %v10129_v31  ;;  %7764 = vmatpush1.bf16.msra.mxu1 %v10131_v22  ;;  %v7777_v22 = vpack.c.bf16 %v5920_v40, %v5919_v38 }
 0x953   :  { %7734 = vmatprep.subr.bf16.mxu0 %v10135_v44  ;;  %7766 = vmatprep.subr.bf16.mxu1 %v10137_v28  ;;  %v5921_v44 = vld [vmem:[%s10423_s9 + $0x20] sm:$0xff]  ;;  %v5922_v28 = vld [vmem:[%s10423_s9 + $0x28] sm:$0xff] }
 0x956   :  { %7736 = vmatpush1.bf16.msra.mxu0 %v10142_v8  ;;  %7768 = vmatpush1.bf16.msra.mxu1 %v10144_v5  ;;  %v11035_v8 = vld [vmem:[#allocation21_spill] sm:$0xff]  ;;  %v7781_v5 = vpack.c.bf16 %v5922_v28, %v5921_v44 }
 0x957   :  { %7738 = vmatprep.subr.bf16.mxu0 %v10148_v63  ;;  %7770 = vmatprep.subr.bf16.mxu1 %v10150_v29  ;;  %v5923_v63 = vld [vmem:[%s10423_s9 + $0x30] sm:$0xff]  ;;  %v5924_v29 = vld [vmem:[%s10423_s9 + $0x38] sm:$0xff] }
 0x95a   :  { %v8152_v13 = vpop.eup %8151  ;;  %7740 = vmatpush1.bf16.msra.mxu0 %v10154_v54  ;;  %7772 = vmatpush1.bf16.msra.mxu1 %v10156_v11  ;;  %v7785_v54 = vpack.c.bf16 %v5924_v29, %v5923_v63  ;;  %v5925_v11 = vld [vmem:[%s10423_s9 + $0x40] sm:$0xff] }
 0x95b   :  { %v5666_v31 = vmul.f32 %v8152_v13, %v8150_v19  ;;  %7774 = vmatprep.subr.bf16.mxu0 %v7773_v58  ;;  %v7789_v41 = vpack.c.bf16 %v5926_v25, %v5925_v11 }
 0x95d   :  { %5796 = vmatmul.mubr.f32.vlgmr.msra.gmra.mrb[30].mxu0 %v5666_v31  ;;  %5903 = vst [vmem:[#allocation10] sm:$0xff] %v5666_v31  ;;  %5867 = vmatmul.mubr.f32.vlgmr.msra.gmra.mrb[32].mxu1 %v5666_v31 }
 0x95e   :  { %7776 = vmatpush3.bf16.msra.mxu0 %v7773_v58  ;;  %6225 = vmatprep.mubr.f32.mxu0 %v11035_v8 }
 0x95f   :  { %7778 = vmatprep.subr.bf16.mxu0 %v7777_v22 }
 0x962   :  { %7780 = vmatpush3.bf16.msra.mxu0 %v7777_v22 }
 0x963   :  { %7782 = vmatprep.subr.bf16.mxu0 %v7781_v5 }
 0x966   :  { %7784 = vmatpush3.bf16.msra.mxu0 %v7781_v5 }
 0x967   :  { %7786 = vmatprep.subr.bf16.mxu0 %v7785_v54 }
 0x96a   :  { %7788 = vmatpush3.bf16.msra.mxu0 %v7785_v54 }
 0x96b   :  { %7790 = vmatprep.subr.bf16.mxu0 %v7789_v41 }
 0x96e   :  { %7792 = vmatpush3.bf16.msra.mxu0 %v7789_v41 }
 0x96f   :  { %7794 = vmatprep.subr.bf16.mxu0 %v7793_v46 }
 0x972   :  { %7796 = vmatpush3.bf16.msra.mxu0 %v7793_v46 }
 0x973   :  { %7798 = vmatprep.subr.bf16.mxu0 %v7797_v61 }
 0x976   :  { %7800 = vmatpush3.bf16.msra.mxu0 %v7797_v61 }
 0x977   :  { %7802 = vmatprep.subr.bf16.mxu0 %v7801_v53 }
 0x97a   :  { %7804 = vmatpush3.bf16.msra.mxu0 %v7801_v53 }
 0x97d   :  { %6226 = vmatmul.mubr.f32.vlgmr.msra.gmra.mrb[32].mxu0 %v11036_v48 }
 0x97e   :  { %6228 = vmatprep.mubr.f32.mxu0 %v11037_v34 }
 0x981   :  { %6229 = vmatmul.mubr.f32.gmra.mrb[34].mxu0 %v11038_v20 }
 0x982   :  { %6231 = vmatprep.mubr.f32.mxu0 %v11039_v57 }
 0x985   :  { %6232 = vmatmul.mubr.f32.gmra.mrb[36].mxu0 %v11040_v9 }
 0x986   :  { %6234 = vmatprep.mubr.f32.mxu0 %v10241_v55 }
 0xa30   :  { %v5797_v42 = vpop.f32.mrb[30].mxu0  ;;  %v5868_v49 = vpop.f32.mrb[32].mxu1 }
 0xa31   :  { %v5873_v47 = vadd.f32 %v5797_v42, %v11013_v14  ;;  %v5799_v18 = vpop.f32.mrb[31].mxu0  ;;  %v5870_v60 = vpop.f32.mrb[33].mxu1  ;;  %v5875_v37 = vadd.f32 %v5868_v49, %v11016_v35 }
 0xa32   :  { %v5874_v26 = vadd.f32 %v5799_v18, %v11014_v30  ;;  %v5876_v16 = vadd.f32 %v5870_v60, %v11015_v32  ;;  %v10341_v32 = vld [vmem:[%s10424_s10] ss:$0 sm:$0xff] }
 0xa33   :  { %v6165_v33 = vmul.f32 -1.442695, %v5873_v47 }
 0xa34   :  { %v6166_v17 = vmul.f32 -1.442695, %v5874_v26  ;;  %v6167_v50 = vmul.f32 -1.442695, %v5876_v16 }
 0xa35   :  { %8153 = vpow2.f32 %v6165_v33 }
 0xa36   :  { %8155 = vpow2.f32 %v6166_v17 }
 0xa37   :  { %8157 = vpow2.f32 %v6167_v50 }
 0xa38   :  { %8159 = vtanh.f32 %v5875_v37 }
 0xa3f   :  { %v8154_v1 = vpop.eup %8153 }
 0xa40   :  { %v8156_v10 = vpop.eup %8155  ;;  %v5880_v55 = vadd.f32 1.0, %v8154_v1 }
 0xa41   :  { %v5886_v51 = vadd.f32 1.0, %v8156_v10  ;;  %v8158_v14 = vpop.eup %8157 }
 0xa42   :  { %8161 = vrcp.f32 %v5880_v55  ;;  %v8160_v62 = vpop.eup %8159  ;;  %v5893_v43 = vadd.f32 1.0, %v8158_v14 }
 0xa43   :  { %8163 = vrcp.f32 %v5886_v51 }
 0xa44   :  { %8165 = vrcp.f32 %v5893_v43 }
 0xa4c   :  { %v8162_v30 = vpop.eup %8161 }
 0xa4d   :  { %v8164_v7 = vpop.eup %8163  ;;  %v5897_v21 = vmul.f32 %v8162_v30, %v8160_v62 }
 0xa4e   :  { %v5896_v24 = vmul.f32 %v8164_v7, %v10234_v2  ;;  %v8166_v19 = vpop.eup %8165 }
 0xa50   :  { %v6227_v35 = vpop.f32.mrb[32].mxu0  ;;  %v5898_v52 = vadd.f32 %v5897_v21, %v5896_v24 }
 0xa51   :  { %v6012_v6 = vadd.f32 %v6227_v35, %v10341_v32  ;;  %v6006_v4 = vpop.f32.mrb[33].mxu0 }
 0xa52   :  { %v6007_v0 = vadd.f32 %v10341_v32, %v6006_v4  ;;  %8167 = vtanh.f32 %v5898_v52  ;;  %5908 = vst [vmem:[#allocation11 + $0x8] sm:$0xff] %v5898_v52 }
 0xa53   :  { %6046 = vst.msk [vmem:[%s10425_s11 + $0x8] sm:$0xff] %vm120_vm1, %v6012_v6 }
 0xa54   :  { %6045 = vst.msk [vmem:[%s10425_s11] sm:$0xff] %vm120_vm1, %v6007_v0  ;;  %v6230_v2 = vpop.f32.mrb[34].mxu0 }
 0xa55   :  { %v6022_v36 = vadd.f32 %v6230_v2, %v10341_v32  ;;  %v6016_v3 = vpop.f32.mrb[35].mxu0 }
 0xa56   :  { %v6017_v59 = vadd.f32 %v10341_v32, %v6016_v3 }
 0xa57   :  { %6048 = vst.msk [vmem:[%s10425_s11 + $0x18] sm:$0xff] %vm120_vm1, %v6022_v36 }
 0xa58   :  { %6047 = vst.msk [vmem:[%s10425_s11 + $0x10] sm:$0xff] %vm120_vm1, %v6017_v59  ;;  %v6233_v23 = vpop.f32.mrb[36].mxu0 }
 0xa59   :  { %v6032_v58 = vadd.f32 %v6233_v23, %v10341_v32  ;;  %v6026_v38 = vpop.f32.mrb[37].mxu0 }
 0xa5a   :  { %v6027_v40 = vadd.f32 %v10341_v32, %v6026_v38 }
 0xa5b   :  { %6050 = vst.msk [vmem:[%s10425_s11 + $0x28] sm:$0xff] %vm120_vm1, %v6032_v58 }
 0xa5c   :  { %v8168_v13 = vpop.eup %8167  ;;  %6049 = vst.msk [vmem:[%s10425_s11 + $0x20] sm:$0xff] %vm120_vm1, %v6027_v40 }
 0xa5d   :  { %v5900_v31 = vmul.f32 %v8168_v13, %v8166_v19 }
 0xa5f   :  { %5905 = vst [vmem:[#allocation10 + $0x8] sm:$0xff] %v5900_v31  ;;  %6235 = vmatmul.mubr.f32.gmra.mrb[38].mxu0 %v5900_v31 }
 0xa60   :  { %8246 = shalt.err (!%p8243_p0)
}
 0xa61   :  { %s8247_s6 = scalar_lea.hbm %s10426_s12, 256 }
 0xa62   :  { %p8248_p1 = scmp.ne.s32.totalorder %s10426_s12, %s8247_s6  ;;  %p8251_p2 = scmp.lt.u32.totalorder %s8247_s6, %s10426_s12 }
 0xa64   :  { %p8253_p3 = pnand %p8251_p2, %p8248_p1 }
 0xa66   :  { %8256 = shalt.err (!%p8253_p3)
}
 0xa67   :  { %s8295_s19 = smov 128   ;;  %s8296_s22 = smov 8  }
 0xa68   :  { %6066 = dma.vmem_to_hbm [thread:$0]  %s6061_s7, 256, %s10426_s12, [#allocation6], %s8295_s19, %s8295_s19, %s8296_s22  }
 0xa69   :  { %s8257_s23 = scalar_lea.vmem %s10373_s20, 256  ;;  %p8262_p5 = scmp.lt.s32.totalorder %s10373_s20, %s10373_s20 }
 0xa6a   :  { %p8258_p4 = scmp.ne.s32.totalorder %s10373_s20, %s8257_s23  ;;  %p8263_p6 = scmp.lt.s32.totalorder %s8257_s23, %s8257_s23 }
 0xa6c   :  { %p8264_p7 = por %p8263_p6, %p8262_p5 }
 0xa6e   :  { %p8265_p8 = pnand %p8264_p7, %p8258_p4 }
 0xa70   :  { %8268 = shalt.err (!%p8265_p8)
}
 0xa71   :  { %s8269_s27 = scalar_lea.hbm %s10427_s13, 256 }
 0xa72   :  { %p8270_p9 = scmp.ne.s32.totalorder %s10427_s13, %s8269_s27  ;;  %p8273_p10 = scmp.lt.u32.totalorder %s8269_s27, %s10427_s13 }
 0xa74   :  { %p8275_p11 = pnand %p8273_p10, %p8270_p9 }
 0xa76   :  { %8278 = shalt.err (!%p8275_p11)
}
 0xa77   :  { %6078 = dma.vmem_to_hbm [thread:$0]  %s10373_s20, 256, %s10427_s13, [#allocation12], %s8295_s19, %s8295_s19, %s8296_s22  }
 0xb32   :  { %v6236_v22 = vpop.f32.mrb[38].mxu0 }
 0xb33   :  { %v6042_v44 = vadd.f32 %v6236_v22, %v10341_v32  ;;  %v6036_v28 = vpop.f32.mrb[39].mxu0 }
 0xb34   :  { %v6037_v8 = vadd.f32 %v10341_v32, %v6036_v28 }
 0xb35   :  { %6052 = vst.msk [vmem:[%s10425_s11 + $0x38] sm:$0xff] %vm120_vm1, %v6042_v44 }
 0xb36   :  { %6051 = vst.msk [vmem:[%s10425_s11 + $0x30] sm:$0xff] %vm120_vm1, %v6037_v8 }
 0xb37   :  { %8283 = dma.done.wait [#allocation6], 256  }
 0xb38   :  { %8284 = vsyncadd [#allocation6], 4294967040 }
 0xb39   :  { %8285 = dma.done.wait [#allocation12], 256  }
 0xb3a   :  { %8286 = vsyncadd [#allocation12], 4294967040 }
 0xb3b   :  { %6087 = vsyncpa [#allocation5], 1 }
 0xb3c   :  { %6088 = vsyncpa [#allocation8], 1 }
 0xb3d   :  { %6089 = vsyncpa [#allocation6], 1 }
 0xb3e   :  { %6090 = vsyncpa [#allocation12], 1 }

</bundles_post_ra>
